<compile_context>
chip_gen: v7x
topology: tpu7x:2x2x1
jax: 0.10.0
libtpu: 0.0.40
codegen_flags: <defaults>
</compile_context>

<pallas_src>
import numpy as np
import jax
import jax.numpy as jnp
from jax.experimental import pallas as pl
from jax.experimental.pallas import tpu as pltpu

# ----------------------------- configuration (small shapes) -----------------------------
B = 2                      # batch
H_RES, W_RES = 8, 8        # input_resolution
C = 32                     # dim
NUM_HEADS = 4
HEAD_DIM = C // NUM_HEADS
WINDOW = 4                 # window_size
SHIFT = 2                  # shift_size (exercises the SW-MSA mask path)
MLP_RATIO = 4.0
HIDDEN = int(C * MLP_RATIO)
L = H_RES * W_RES
N_TOK = WINDOW * WINDOW
N_WIN = (H_RES // WINDOW) * (W_RES // WINDOW)
B_WIN = B * N_WIN
SCALE = HEAD_DIM ** (-0.5)
EPS = 1e-5


# ----------------------------- static token permutations --------------------------------
def _window_partition_index(idx2d):
    Hx, Wx = idx2d.shape
    t = idx2d.reshape(Hx // WINDOW, WINDOW, Wx // WINDOW, WINDOW)
    return t.transpose(0, 2, 1, 3).reshape(-1)


_IDX = np.arange(L, dtype=np.int32).reshape(H_RES, W_RES)
PERM1 = _window_partition_index(_IDX)                                       # plain windows
PERM2 = _window_partition_index(np.roll(_IDX, (-SHIFT, -SHIFT), (0, 1)))    # shifted windows
INV_PERM1 = np.argsort(PERM1).astype(np.int32)
INV_PERM2 = np.argsort(PERM2).astype(np.int32)


# ----------------------------- glue used by the reference & mask build -------------------
def window_partition(x):
    Bx, Hx, Wx, Cx = x.shape
    x = x.reshape(Bx, Hx // WINDOW, WINDOW, Wx // WINDOW, WINDOW, Cx)
    return x.transpose(0, 1, 3, 2, 4, 5).reshape(-1, WINDOW, WINDOW, Cx)


def window_reverse(windows, Hx, Wx):
    Bx = windows.shape[0] // (Hx * Wx // WINDOW // WINDOW)
    x = windows.reshape(Bx, Hx // WINDOW, Wx // WINDOW, WINDOW, WINDOW, -1)
    return x.transpose(0, 1, 3, 2, 4, 5).reshape(Bx, Hx, Wx, -1)


# ----------------------------- fused Pallas kernel ---------------------------------------
def _ln(x, g, b):
    mu = jnp.mean(x, axis=-1, keepdims=True)
    var = jnp.mean(jnp.square(x - mu), axis=-1, keepdims=True)
    return (x - mu) * jax.lax.rsqrt(var + EPS) * g + b


def _erf(x):
    # Abramowitz & Stegun 7.1.26 rational approximation (|err| < 1.5e-7); the reciprocal is
    # pushed to the EUP so the exact-GELU (erf) semantics cost no VALU divide.
    a1, a2, a3, a4, a5 = 0.254829592, -0.284496736, 1.421413741, -1.453152027, 1.061405429
    p = 0.3275911
    s = jnp.where(x >= 0.0, 1.0, -1.0)
    ax = jnp.abs(x)
    t = pl.reciprocal(1.0 + p * ax, approx=True)
    poly = ((((a5 * t + a4) * t + a3) * t + a2) * t + a1) * t
    return s * (1.0 - poly * jnp.exp(-ax * ax))


def _swin_block_kernel(xs1_ref, xs2_ref, g1_ref, b1_ref, wqkv_ref, bqkv_ref,
                       wproj_ref, bproj_ref, bias_ref, g2_ref, b2_ref,
                       w1_ref, b1f_ref, w2_ref, b2f_ref, o_ref):
    xs1 = xs1_ref[0]                       # (L, C)  shifted-window token order (attn "x1")
    xs2 = xs2_ref[0]                       # (L, C)  plain-window token order   (attn "x2")
    g1 = g1_ref[...]
    b1 = b1_ref[...]

    # ---- norm1 (per-token, so applying it post-permutation is exact) ----
    xn1 = _ln(xs1, g1, b1)
    xn2 = _ln(xs2, g1, b1)

    # ---- fused qkv projection (q-columns pre-scaled by head_dim**-0.5) ----
    wqkv = wqkv_ref[...]
    bqkv = bqkv_ref[...]
    qkv1 = jnp.dot(xn1, wqkv, preferred_element_type=jnp.float32) + bqkv     # (L, 3C)
    qkv2 = jnp.dot(xn2, wqkv, preferred_element_type=jnp.float32) + bqkv

    qkv1 = qkv1.reshape(N_WIN, N_TOK, 3 * C)
    qkv2 = qkv2.reshape(N_WIN, N_TOK, 3 * C)

    def heads(t, base):
        # (N_WIN, N_TOK, 3C) -> (NUM_HEADS*N_WIN, N_TOK, HEAD_DIM), head-major on axis 0.
        return jnp.concatenate(
            [t[:, :, base + h * HEAD_DIM: base + (h + 1) * HEAD_DIM]
             for h in range(NUM_HEADS)], axis=0)

    q1 = heads(qkv1, 0)
    k1 = heads(qkv1, C)
    v1 = heads(qkv1, 2 * C)
    k2 = heads(qkv2, C)
    v2 = heads(qkv2, 2 * C)

    # ---- dual-stream attention, all windows x heads batched ----
    bias = bias_ref[...]                   # (NUM_HEADS*N_WIN, N, N) = rel_pos_bias + shift mask
    s1 = jnp.einsum('bqd,bkd->bqk', q1, k1, preferred_element_type=jnp.float32) + bias
    s2 = jnp.einsum('bqd,bkd->bqk', q1, k2, preferred_element_type=jnp.float32) + bias

    s = jnp.concatenate([s1, s2], axis=0)  # (2*nH*nW, N, N): one softmax for both streams
    s = s - jnp.max(s, axis=-1, keepdims=True)
    e = jnp.exp(s)
    p = e * pl.reciprocal(jnp.sum(e, axis=-1, keepdims=True), approx=True)

    v = jnp.concatenate([v1, v2], axis=0)  # (2*nH*nW, N, HEAD_DIM)
    o = jnp.einsum('bqk,bkd->bqd', p, v, preferred_element_type=jnp.float32)

    HB = NUM_HEADS * N_WIN
    o1 = jnp.concatenate([o[h * N_WIN:(h + 1) * N_WIN] for h in range(NUM_HEADS)],
                         axis=-1).reshape(L, C)            # stream-1, head-major channels
    o2 = jnp.concatenate([o[HB + h * N_WIN: HB + (h + 1) * N_WIN] for h in range(NUM_HEADS)],
                         axis=-1).reshape(L, C)            # stream-2
    weights = jnp.concatenate([o1, o2], axis=-1)           # (L, 2C)  == torch "weights"

    # ---- output projection + first residual (drop_path = Identity in eval) ----
    attn_out = jnp.dot(o1, wproj_ref[...], preferred_element_type=jnp.float32) + bproj_ref[...]
    y = xs1 + attn_out                                     # residual, still in permuted order

    # ---- norm2 + MLP (fc1 -> exact GELU -> fc2) + second residual ----
    yn = _ln(y, g2_ref[...], b2_ref[...])
    hid = jnp.dot(yn, w1_ref[...], preferred_element_type=jnp.float32) + b1f_ref[...]
    hid = 0.5 * hid * (1.0 + _erf(hid * 0.7071067811865476))
    out = y + jnp.dot(hid, w2_ref[...], preferred_element_type=jnp.float32) + b2f_ref[...]

    # ---- lane-dense packed output: [block_out (C) | weights (2C) | zero pad (C)] = 128 lanes
    pad = jnp.zeros((L, C), jnp.float32)
    o_ref[0] = jnp.concatenate([out, weights, pad], axis=-1)


# ----------------------------- SwinTransformerBlock forward (eval) -----------------------
def swin_block_forward(x, params):
    # window partition / cyclic shift as static token gathers (LayerNorm is per-token, so
    # gather-then-norm == norm-then-gather).
    xs1 = jnp.take(x, jnp.asarray(PERM2), axis=1)   # attn "x1": shifted-window ordering
    xs2 = jnp.take(x, jnp.asarray(PERM1), axis=1)   # attn "x2": plain-window ordering

    # fold the qk scale into the q-columns of the fused qkv projection
    wqkv = jnp.concatenate([params['wqkv'][:, :C] * SCALE, params['wqkv'][:, C:]], axis=1)
    bqkv = jnp.concatenate([params['bqkv'][:, :C] * SCALE, params['bqkv'][:, C:]], axis=1)
    # pre-combined relative-position bias + shift mask (mask1 == mask2), head-major layout
    bias = (params['rel_bias'][:, None] + params['mask'][None, :]
            ).reshape(NUM_HEADS * N_WIN, N_TOK, N_TOK)

    def full(shape):
        return pl.BlockSpec(shape, lambda i, _n=len(shape): (0,) * _n)

    tok_spec = pl.BlockSpec((1, L, C), lambda i: (i, 0, 0))

    packed = pl.pallas_call(
        _swin_block_kernel,
        out_shape=jax.ShapeDtypeStruct((B, L, 4 * C), jnp.float32),
        grid=(B,),
        in_specs=[tok_spec, tok_spec,
                  full((1, C)), full((1, C)),
                  full((C, 3 * C)), full((1, 3 * C)),
                  full((C, C)), full((1, C)),
                  full((NUM_HEADS * N_WIN, N_TOK, N_TOK)),
                  full((1, C)), full((1, C)),
                  full((C, HIDDEN)), full((1, HIDDEN)),
                  full((HIDDEN, C)), full((1, C))],
        out_specs=pl.BlockSpec((1, L, 4 * C), lambda i: (i, 0, 0)),
        compiler_params=pltpu.CompilerParams(dimension_semantics=("parallel",)),
    )(xs1, xs2, params['g1'], params['b1'], wqkv, bqkv,
      params['wproj'], params['bproj'], bias, params['g2'], params['b2'],
      params['w1'], params['b1f'], params['w2'], params['b2f'])

    # undo window permutations (window_reverse + roll-back for the block output;
    # window_reverse only -- no roll-back -- for att_weights, matching the module).
    out = jnp.take(packed[..., :C], jnp.asarray(INV_PERM2), axis=1)           # (B, L, C)
    att_weights = jnp.take(packed[..., C:3 * C], jnp.asarray(INV_PERM1), axis=1
                           ).reshape(B, H_RES, W_RES, 2 * C)
    loss_ad = 0.0                                                             # ad_net is None
    # TODO(synk): is_train branch (x_t stream, WindowAttention.fc1/fc_rel adapters) and the
    # ad_net adversarial-entropy reweighting are not exercised in this eval-path kernel.
    return out, att_weights, loss_ad


# ----------------------------- pure-JAX reference (for validation) -----------------------
def ref_forward(x, params):
    def ln(z, g, b):
        mu = z.mean(-1, keepdims=True)
        var = ((z - mu) ** 2).mean(-1, keepdims=True)
        return (z - mu) / jnp.sqrt(var + EPS) * g + b

    shortcut = x
    xn = ln(x, params['g1'], params['b1']).reshape(B, H_RES, W_RES, C)
    x1 = window_partition(xn).reshape(-1, N_TOK, C)
    x2 = (window_partition(jnp.roll(xn, (-SHIFT, -SHIFT), axis=(1, 2))).reshape(-1, N_TOK, C)
          if SHIFT > 0 else x1)
    a_in1, a_in2 = x2, x1
    qkv1 = a_in1 @ params['wqkv'] + params['bqkv']
    qkv2 = a_in2 @ params['wqkv'] + params['bqkv']

    def heads(t):
        return t.reshape(B_WIN, N_TOK, NUM_HEADS, HEAD_DIM).transpose(0, 2, 1, 3)

    q1 = heads(qkv1[..., :C]) * SCALE
    k1, v1 = heads(qkv1[..., C:2 * C]), heads(qkv1[..., 2 * C:])
    k2, v2 = heads(qkv2[..., C:2 * C]), heads(qkv2[..., 2 * C:])
    rb = params['rel_bias'][None]
    mask_b = jnp.tile(params['mask'], (B, 1, 1))[:, None]
    a1 = jnp.einsum('bhqd,bhkd->bhqk', q1, k1) + rb + mask_b
    a2 = jnp.einsum('bhqd,bhkd->bhqk', q1, k2) + rb + mask_b
    a1 = jax.nn.softmax(a1, -1)
    a2 = jax.nn.softmax(a2, -1)
    o1 = jnp.einsum('bhqk,bhkd->bqhd', a1, v1).reshape(B_WIN, N_TOK, C)
    o2 = jnp.einsum('bhqk,bhkd->bqhd', a2, v2).reshape(B_WIN, N_TOK, C)
    weights = jnp.concatenate([o1, o2], -1)
    attn_out = weights[..., :C] @ params['wproj'] + params['bproj']
    attn_windows = attn_out.reshape(-1, WINDOW, WINDOW, C)
    if SHIFT > 0:
        xo = jnp.roll(window_reverse(attn_windows, H_RES, W_RES), (SHIFT, SHIFT), axis=(1, 2))
    else:
        xo = window_reverse(attn_windows, H_RES, W_RES)
    att_weights = window_reverse(weights.reshape(-1, WINDOW, WINDOW, 2 * C), H_RES, W_RES)
    xo = shortcut + xo.reshape(B, L, C)
    xn2 = ln(xo, params['g2'], params['b2'])
    hid = jax.nn.gelu(xn2 @ params['w1'] + params['b1f'], approximate=False)
    return xo + (hid @ params['w2'] + params['b2f']), att_weights


# ----------------------------- parameter / buffer construction ---------------------------
def build_relative_position_index():
    coords = np.stack(np.meshgrid(np.arange(WINDOW), np.arange(WINDOW), indexing='ij'))
    cf = coords.reshape(2, -1)
    rel = cf[:, :, None] - cf[:, None, :]
    rel = rel.transpose(1, 2, 0).copy()
    rel[:, :, 0] += WINDOW - 1
    rel[:, :, 1] += WINDOW - 1
    rel[:, :, 0] *= 2 * WINDOW - 1
    return rel.sum(-1)                                          # (N, N) int


def build_attn_mask():
    if SHIFT == 0:
        return np.zeros((N_WIN, N_TOK, N_TOK), np.float32)
    img_mask = np.zeros((1, H_RES, W_RES, 1), np.float32)
    slices = (slice(0, -WINDOW), slice(-WINDOW, -SHIFT), slice(-SHIFT, None))
    cnt = 0
    for hs in slices:
        for ws in slices:
            img_mask[:, hs, ws, :] = cnt
            cnt += 1
    mw = window_partition(img_mask).reshape(-1, N_TOK)
    am = mw[:, None, :] - mw[:, :, None]
    return np.where(am != 0, -100.0, 0.0).astype(np.float32)    # (nW, N, N); mask==mask2


def make_params(key):
    ks = jax.random.split(key, 12)

    def nrm(k, shape, std=0.02):
        return (std * jax.random.normal(k, shape)).astype(jnp.float32)

    rel_table = nrm(ks[6], ((2 * WINDOW - 1) * (2 * WINDOW - 1), NUM_HEADS), 0.02)
    rel_idx = jnp.asarray(build_relative_position_index().reshape(-1))
    rel_bias = rel_table[rel_idx].reshape(N_TOK, N_TOK, NUM_HEADS).transpose(2, 0, 1)
    return dict(
        g1=(1.0 + 0.1 * jax.random.normal(ks[0], (1, C))).astype(jnp.float32),
        b1=nrm(ks[1], (1, C), 0.05),
        wqkv=nrm(ks[2], (C, 3 * C)),
        bqkv=nrm(ks[3], (1, 3 * C), 0.02),
        wproj=nrm(ks[4], (C, C)),
        bproj=nrm(ks[5], (1, C), 0.02),
        rel_bias=rel_bias,
        mask=jnp.asarray(build_attn_mask()),                    # (N_WIN, N, N)
        g2=(1.0 + 0.1 * jax.random.normal(ks[7], (1, C))).astype(jnp.float32),
        b2=nrm(ks[8], (1, C), 0.05),
        w1=nrm(ks[9], (C, HIDDEN)),
        b1f=nrm(ks[10], (1, HIDDEN), 0.02),
        w2=nrm(ks[11], (HIDDEN, C)),
        b2f=jnp.zeros((1, C), jnp.float32),
    )


# ----------------------------- main -------------------------------------------------------
if __name__ == "__main__":
    key = jax.random.PRNGKey(0)
    kp, kx = jax.random.split(key)
    params = make_params(kp)
    x = jax.random.normal(kx, (B, L, C), jnp.float32)

    out, att_w, loss_ad = jax.jit(swin_block_forward)(x, params)
    jax.block_until_ready((out, att_w))

    ref_out, ref_w = ref_forward(x, params)
    np.testing.assert_allclose(np.asarray(out), np.asarray(ref_out), rtol=2e-3, atol=2e-3)
    np.testing.assert_allclose(np.asarray(att_w), np.asarray(ref_w), rtol=2e-3, atol=2e-3)

    print("KERNEL_OK")
</pallas_src>

<mosaic_0001>
module attributes {stable_mosaic.version = 11 : i64} {
  func.func @_swin_block_kernel(%arg0: i32, %arg1: memref<1x64x32xf32, #tpu.memory_space<vmem>>, %arg2: memref<1x64x32xf32, #tpu.memory_space<vmem>>, %arg3: memref<1x32xf32, #tpu.memory_space<vmem>>, %arg4: memref<1x32xf32, #tpu.memory_space<vmem>>, %arg5: memref<32x96xf32, #tpu.memory_space<vmem>>, %arg6: memref<1x96xf32, #tpu.memory_space<vmem>>, %arg7: memref<32x32xf32, #tpu.memory_space<vmem>>, %arg8: memref<1x32xf32, #tpu.memory_space<vmem>>, %arg9: memref<16x16x16xf32, #tpu.memory_space<vmem>>, %arg10: memref<1x32xf32, #tpu.memory_space<vmem>>, %arg11: memref<1x32xf32, #tpu.memory_space<vmem>>, %arg12: memref<32x128xf32, #tpu.memory_space<vmem>>, %arg13: memref<1x128xf32, #tpu.memory_space<vmem>>, %arg14: memref<128x32xf32, #tpu.memory_space<vmem>>, %arg15: memref<1x32xf32, #tpu.memory_space<vmem>>, %arg16: memref<1x64x128xf32, #tpu.memory_space<vmem>>) attributes {dimension_semantics = [#tpu.dimension_semantics<parallel>], iteration_bounds = array<i64: 2>, scalar_prefetch = 0 : i64, scratch_operands = 0 : i64, tpu.core_type = #tpu.core_type<tc>, window_params = [{transform_indices = @transform_0, window_bounds = array<i64: 1, 64, 32>}, {transform_indices = @transform_1, window_bounds = array<i64: 1, 64, 32>}, {pipeline_mode = #tpu.pipeline_mode<synchronous>, transform_indices = @transform_2, window_bounds = array<i64: 1, 32>}, {pipeline_mode = #tpu.pipeline_mode<synchronous>, transform_indices = @transform_3, window_bounds = array<i64: 1, 32>}, {pipeline_mode = #tpu.pipeline_mode<synchronous>, transform_indices = @transform_4, window_bounds = array<i64: 32, 96>}, {pipeline_mode = #tpu.pipeline_mode<synchronous>, transform_indices = @transform_5, window_bounds = array<i64: 1, 96>}, {pipeline_mode = #tpu.pipeline_mode<synchronous>, transform_indices = @transform_6, window_bounds = array<i64: 32, 32>}, {pipeline_mode = #tpu.pipeline_mode<synchronous>, transform_indices = @transform_7, window_bounds = array<i64: 1, 32>}, {pipeline_mode = #tpu.pipeline_mode<synchronous>, transform_indices = @transform_8, window_bounds = array<i64: 16, 16, 16>}, {pipeline_mode = #tpu.pipeline_mode<synchronous>, transform_indices = @transform_9, window_bounds = array<i64: 1, 32>}, {pipeline_mode = #tpu.pipeline_mode<synchronous>, transform_indices = @transform_10, window_bounds = array<i64: 1, 32>}, {pipeline_mode = #tpu.pipeline_mode<synchronous>, transform_indices = @transform_11, window_bounds = array<i64: 32, 128>}, {pipeline_mode = #tpu.pipeline_mode<synchronous>, transform_indices = @transform_12, window_bounds = array<i64: 1, 128>}, {pipeline_mode = #tpu.pipeline_mode<synchronous>, transform_indices = @transform_13, window_bounds = array<i64: 128, 32>}, {pipeline_mode = #tpu.pipeline_mode<synchronous>, transform_indices = @transform_14, window_bounds = array<i64: 1, 32>}, {transform_indices = @transform_15, window_bounds = array<i64: 1, 64, 128>}]} {
    %c0 = arith.constant 0 : index
    %c0_0 = arith.constant 0 : index
    %c0_1 = arith.constant 0 : index
    %0 = vector.load %arg1[%c0, %c0_0, %c0_1] : memref<1x64x32xf32, #tpu.memory_space<vmem>>, vector<1x64x32xf32>
    %1 = vector.shape_cast %0 : vector<1x64x32xf32> to vector<64x32xf32>
    %c0_2 = arith.constant 0 : index
    %c0_3 = arith.constant 0 : index
    %c0_4 = arith.constant 0 : index
    %2 = vector.load %arg2[%c0_2, %c0_3, %c0_4] : memref<1x64x32xf32, #tpu.memory_space<vmem>>, vector<1x64x32xf32>
    %3 = vector.shape_cast %2 : vector<1x64x32xf32> to vector<64x32xf32>
    %c0_5 = arith.constant 0 : index
    %c0_6 = arith.constant 0 : index
    %4 = vector.load %arg3[%c0_5, %c0_6] : memref<1x32xf32, #tpu.memory_space<vmem>>, vector<1x32xf32>
    %c0_7 = arith.constant 0 : index
    %c0_8 = arith.constant 0 : index
    %5 = vector.load %arg4[%c0_7, %c0_8] : memref<1x32xf32, #tpu.memory_space<vmem>>, vector<1x32xf32>
    %cst = arith.constant dense<0.000000e+00> : vector<64xf32>
    %6 = vector.multi_reduction <add>, %1, %cst [1] : vector<64x32xf32> to vector<64xf32>
    %7 = vector.shape_cast %6 : vector<64xf32> to vector<64x1xf32>
    %cst_9 = arith.constant 3.200000e+01 : f32
    %8 = vector.broadcast %cst_9 : f32 to vector<64x1xf32>
    %9 = arith.divf %7, %8 : vector<64x1xf32>
    %10 = vector.broadcast %9 : vector<64x1xf32> to vector<64x32xf32>
    %11 = arith.subf %1, %10 : vector<64x32xf32>
    %12 = arith.mulf %11, %11 : vector<64x32xf32>
    %cst_10 = arith.constant dense<0.000000e+00> : vector<64xf32>
    %13 = vector.multi_reduction <add>, %12, %cst_10 [1] : vector<64x32xf32> to vector<64xf32>
    %14 = vector.shape_cast %13 : vector<64xf32> to vector<64x1xf32>
    %cst_11 = arith.constant 3.200000e+01 : f32
    %15 = vector.broadcast %cst_11 : f32 to vector<64x1xf32>
    %16 = arith.divf %14, %15 : vector<64x1xf32>
    %17 = vector.broadcast %9 : vector<64x1xf32> to vector<64x32xf32>
    %18 = arith.subf %1, %17 : vector<64x32xf32>
    %cst_12 = arith.constant 9.99999974E-6 : f32
    %19 = vector.broadcast %cst_12 : f32 to vector<64x1xf32>
    %20 = arith.addf %16, %19 : vector<64x1xf32>
    %21 = math.rsqrt %20 : vector<64x1xf32>
    %22 = vector.broadcast %21 : vector<64x1xf32> to vector<64x32xf32>
    %23 = arith.mulf %18, %22 : vector<64x32xf32>
    %24 = vector.broadcast %4 : vector<1x32xf32> to vector<64x32xf32>
    %25 = arith.mulf %23, %24 : vector<64x32xf32>
    %26 = vector.broadcast %5 : vector<1x32xf32> to vector<64x32xf32>
    %27 = arith.addf %25, %26 : vector<64x32xf32>
    %cst_13 = arith.constant dense<0.000000e+00> : vector<64xf32>
    %28 = vector.multi_reduction <add>, %3, %cst_13 [1] : vector<64x32xf32> to vector<64xf32>
    %29 = vector.shape_cast %28 : vector<64xf32> to vector<64x1xf32>
    %cst_14 = arith.constant 3.200000e+01 : f32
    %30 = vector.broadcast %cst_14 : f32 to vector<64x1xf32>
    %31 = arith.divf %29, %30 : vector<64x1xf32>
    %32 = vector.broadcast %31 : vector<64x1xf32> to vector<64x32xf32>
    %33 = arith.subf %3, %32 : vector<64x32xf32>
    %34 = arith.mulf %33, %33 : vector<64x32xf32>
    %cst_15 = arith.constant dense<0.000000e+00> : vector<64xf32>
    %35 = vector.multi_reduction <add>, %34, %cst_15 [1] : vector<64x32xf32> to vector<64xf32>
    %36 = vector.shape_cast %35 : vector<64xf32> to vector<64x1xf32>
    %cst_16 = arith.constant 3.200000e+01 : f32
    %37 = vector.broadcast %cst_16 : f32 to vector<64x1xf32>
    %38 = arith.divf %36, %37 : vector<64x1xf32>
    %39 = vector.broadcast %31 : vector<64x1xf32> to vector<64x32xf32>
    %40 = arith.subf %3, %39 : vector<64x32xf32>
    %cst_17 = arith.constant 9.99999974E-6 : f32
    %41 = vector.broadcast %cst_17 : f32 to vector<64x1xf32>
    %42 = arith.addf %38, %41 : vector<64x1xf32>
    %43 = math.rsqrt %42 : vector<64x1xf32>
    %44 = vector.broadcast %43 : vector<64x1xf32> to vector<64x32xf32>
    %45 = arith.mulf %40, %44 : vector<64x32xf32>
    %46 = vector.broadcast %4 : vector<1x32xf32> to vector<64x32xf32>
    %47 = arith.mulf %45, %46 : vector<64x32xf32>
    %48 = vector.broadcast %5 : vector<1x32xf32> to vector<64x32xf32>
    %49 = arith.addf %47, %48 : vector<64x32xf32>
    %c0_18 = arith.constant 0 : index
    %c0_19 = arith.constant 0 : index
    %50 = vector.load %arg5[%c0_18, %c0_19] : memref<32x96xf32, #tpu.memory_space<vmem>>, vector<32x96xf32>
    %c0_20 = arith.constant 0 : index
    %c0_21 = arith.constant 0 : index
    %51 = vector.load %arg6[%c0_20, %c0_21] : memref<1x96xf32, #tpu.memory_space<vmem>>, vector<1x96xf32>
    %cst_22 = arith.constant dense<0.000000e+00> : vector<64x96xf32>
    %52 = tpu.matmul %27, %50, %cst_22 {dimension_numbers = #tpu.dot_dimension_numbers<[1], [0], [0], [1], [0, 0, 1, 1], [], []>} : vector<64x32xf32>, vector<32x96xf32>, vector<64x96xf32> -> vector<64x96xf32>
    %53 = vector.broadcast %51 : vector<1x96xf32> to vector<64x96xf32>
    %54 = arith.addf %52, %53 : vector<64x96xf32>
    %cst_23 = arith.constant dense<0.000000e+00> : vector<64x96xf32>
    %55 = tpu.matmul %49, %50, %cst_23 {dimension_numbers = #tpu.dot_dimension_numbers<[1], [0], [0], [1], [0, 0, 1, 1], [], []>} : vector<64x32xf32>, vector<32x96xf32>, vector<64x96xf32> -> vector<64x96xf32>
    %56 = vector.broadcast %51 : vector<1x96xf32> to vector<64x96xf32>
    %57 = arith.addf %55, %56 : vector<64x96xf32>
    %58 = vector.shape_cast %54 : vector<64x96xf32> to vector<4x16x96xf32>
    %59 = vector.shape_cast %57 : vector<64x96xf32> to vector<4x16x96xf32>
    %60 = vector.extract_strided_slice %58 {offsets = [0, 0, 0], sizes = [4, 16, 8], strides = [1, 1, 1]} : vector<4x16x96xf32> to vector<4x16x8xf32>
    %61 = vector.extract_strided_slice %58 {offsets = [0, 0, 8], sizes = [4, 16, 8], strides = [1, 1, 1]} : vector<4x16x96xf32> to vector<4x16x8xf32>
    %62 = vector.extract_strided_slice %58 {offsets = [0, 0, 16], sizes = [4, 16, 8], strides = [1, 1, 1]} : vector<4x16x96xf32> to vector<4x16x8xf32>
    %63 = vector.extract_strided_slice %58 {offsets = [0, 0, 24], sizes = [4, 16, 8], strides = [1, 1, 1]} : vector<4x16x96xf32> to vector<4x16x8xf32>
    %64 = tpu.concatenate %60, %61, %62, %63 in 0 : vector<4x16x8xf32>, vector<4x16x8xf32>, vector<4x16x8xf32>, vector<4x16x8xf32> -> vector<16x16x8xf32>
    %65 = vector.extract_strided_slice %58 {offsets = [0, 0, 32], sizes = [4, 16, 8], strides = [1, 1, 1]} : vector<4x16x96xf32> to vector<4x16x8xf32>
    %66 = vector.extract_strided_slice %58 {offsets = [0, 0, 40], sizes = [4, 16, 8], strides = [1, 1, 1]} : vector<4x16x96xf32> to vector<4x16x8xf32>
    %67 = vector.extract_strided_slice %58 {offsets = [0, 0, 48], sizes = [4, 16, 8], strides = [1, 1, 1]} : vector<4x16x96xf32> to vector<4x16x8xf32>
    %68 = vector.extract_strided_slice %58 {offsets = [0, 0, 56], sizes = [4, 16, 8], strides = [1, 1, 1]} : vector<4x16x96xf32> to vector<4x16x8xf32>
    %69 = tpu.concatenate %65, %66, %67, %68 in 0 : vector<4x16x8xf32>, vector<4x16x8xf32>, vector<4x16x8xf32>, vector<4x16x8xf32> -> vector<16x16x8xf32>
    %70 = vector.extract_strided_slice %58 {offsets = [0, 0, 64], sizes = [4, 16, 8], strides = [1, 1, 1]} : vector<4x16x96xf32> to vector<4x16x8xf32>
    %71 = vector.extract_strided_slice %58 {offsets = [0, 0, 72], sizes = [4, 16, 8], strides = [1, 1, 1]} : vector<4x16x96xf32> to vector<4x16x8xf32>
    %72 = vector.extract_strided_slice %58 {offsets = [0, 0, 80], sizes = [4, 16, 8], strides = [1, 1, 1]} : vector<4x16x96xf32> to vector<4x16x8xf32>
    %73 = vector.extract_strided_slice %58 {offsets = [0, 0, 88], sizes = [4, 16, 8], strides = [1, 1, 1]} : vector<4x16x96xf32> to vector<4x16x8xf32>
    %74 = tpu.concatenate %70, %71, %72, %73 in 0 : vector<4x16x8xf32>, vector<4x16x8xf32>, vector<4x16x8xf32>, vector<4x16x8xf32> -> vector<16x16x8xf32>
    %75 = vector.extract_strided_slice %59 {offsets = [0, 0, 32], sizes = [4, 16, 8], strides = [1, 1, 1]} : vector<4x16x96xf32> to vector<4x16x8xf32>
    %76 = vector.extract_strided_slice %59 {offsets = [0, 0, 40], sizes = [4, 16, 8], strides = [1, 1, 1]} : vector<4x16x96xf32> to vector<4x16x8xf32>
    %77 = vector.extract_strided_slice %59 {offsets = [0, 0, 48], sizes = [4, 16, 8], strides = [1, 1, 1]} : vector<4x16x96xf32> to vector<4x16x8xf32>
    %78 = vector.extract_strided_slice %59 {offsets = [0, 0, 56], sizes = [4, 16, 8], strides = [1, 1, 1]} : vector<4x16x96xf32> to vector<4x16x8xf32>
    %79 = tpu.concatenate %75, %76, %77, %78 in 0 : vector<4x16x8xf32>, vector<4x16x8xf32>, vector<4x16x8xf32>, vector<4x16x8xf32> -> vector<16x16x8xf32>
    %80 = vector.extract_strided_slice %59 {offsets = [0, 0, 64], sizes = [4, 16, 8], strides = [1, 1, 1]} : vector<4x16x96xf32> to vector<4x16x8xf32>
    %81 = vector.extract_strided_slice %59 {offsets = [0, 0, 72], sizes = [4, 16, 8], strides = [1, 1, 1]} : vector<4x16x96xf32> to vector<4x16x8xf32>
    %82 = vector.extract_strided_slice %59 {offsets = [0, 0, 80], sizes = [4, 16, 8], strides = [1, 1, 1]} : vector<4x16x96xf32> to vector<4x16x8xf32>
    %83 = vector.extract_strided_slice %59 {offsets = [0, 0, 88], sizes = [4, 16, 8], strides = [1, 1, 1]} : vector<4x16x96xf32> to vector<4x16x8xf32>
    %84 = tpu.concatenate %80, %81, %82, %83 in 0 : vector<4x16x8xf32>, vector<4x16x8xf32>, vector<4x16x8xf32>, vector<4x16x8xf32> -> vector<16x16x8xf32>
    %c0_24 = arith.constant 0 : index
    %c0_25 = arith.constant 0 : index
    %c0_26 = arith.constant 0 : index
    %85 = vector.load %arg9[%c0_24, %c0_25, %c0_26] : memref<16x16x16xf32, #tpu.memory_space<vmem>>, vector<16x16x16xf32>
    "tpu.trace_start"() <{level = 10 : i32, message = "bqd,bkd->bqk"}> : () -> ()
    %cst_27 = arith.constant dense<0.000000e+00> : vector<16x16x16xf32>
    %86 = tpu.matmul %64, %69, %cst_27 {dimension_numbers = #tpu.dot_dimension_numbers<[2], [2], [1], [1], [0, 0, 0, 1, 1, 1], [0], [0]>} : vector<16x16x8xf32>, vector<16x16x8xf32>, vector<16x16x16xf32> -> vector<16x16x16xf32>
    "tpu.trace_stop"() : () -> ()
    %87 = arith.addf %86, %85 : vector<16x16x16xf32>
    "tpu.trace_start"() <{level = 10 : i32, message = "bqd,bkd->bqk"}> : () -> ()
    %cst_28 = arith.constant dense<0.000000e+00> : vector<16x16x16xf32>
    %88 = tpu.matmul %64, %79, %cst_28 {dimension_numbers = #tpu.dot_dimension_numbers<[2], [2], [1], [1], [0, 0, 0, 1, 1, 1], [0], [0]>} : vector<16x16x8xf32>, vector<16x16x8xf32>, vector<16x16x16xf32> -> vector<16x16x16xf32>
    "tpu.trace_stop"() : () -> ()
    %89 = arith.addf %88, %85 : vector<16x16x16xf32>
    %90 = tpu.concatenate %87, %89 in 0 : vector<16x16x16xf32>, vector<16x16x16xf32> -> vector<32x16x16xf32>
    %cst_29 = arith.constant dense<0xFF800000> : vector<32x16xf32>
    %91 = vector.multi_reduction <maximumf>, %90, %cst_29 [2] : vector<32x16x16xf32> to vector<32x16xf32>
    %92 = vector.shape_cast %91 : vector<32x16xf32> to vector<32x16x1xf32>
    %93 = vector.broadcast %92 : vector<32x16x1xf32> to vector<32x16x16xf32>
    %94 = arith.subf %90, %93 : vector<32x16x16xf32>
    %95 = math.exp %94 : vector<32x16x16xf32>
    %cst_30 = arith.constant dense<0.000000e+00> : vector<32x16xf32>
    %96 = vector.multi_reduction <add>, %95, %cst_30 [2] : vector<32x16x16xf32> to vector<32x16xf32>
    %97 = vector.shape_cast %96 : vector<32x16xf32> to vector<32x16x1xf32>
    %98 = tpu.reciprocal %97 {approx = true} : vector<32x16x1xf32> -> vector<32x16x1xf32>
    %99 = vector.broadcast %98 : vector<32x16x1xf32> to vector<32x16x16xf32>
    %100 = arith.mulf %95, %99 : vector<32x16x16xf32>
    %101 = tpu.concatenate %74, %84 in 0 : vector<16x16x8xf32>, vector<16x16x8xf32> -> vector<32x16x8xf32>
    "tpu.trace_start"() <{level = 10 : i32, message = "bqk,bkd->bqd"}> : () -> ()
    %cst_31 = arith.constant dense<0.000000e+00> : vector<32x16x8xf32>
    %102 = tpu.matmul %100, %101, %cst_31 {dimension_numbers = #tpu.dot_dimension_numbers<[2], [1], [1], [2], [0, 0, 0, 1, 1, 2], [0], [0]>} : vector<32x16x16xf32>, vector<32x16x8xf32>, vector<32x16x8xf32> -> vector<32x16x8xf32>
    "tpu.trace_stop"() : () -> ()
    %103 = vector.extract_strided_slice %102 {offsets = [0, 0, 0], sizes = [4, 16, 8], strides = [1, 1, 1]} : vector<32x16x8xf32> to vector<4x16x8xf32>
    %104 = vector.extract_strided_slice %102 {offsets = [4, 0, 0], sizes = [4, 16, 8], strides = [1, 1, 1]} : vector<32x16x8xf32> to vector<4x16x8xf32>
    %105 = vector.extract_strided_slice %102 {offsets = [8, 0, 0], sizes = [4, 16, 8], strides = [1, 1, 1]} : vector<32x16x8xf32> to vector<4x16x8xf32>
    %106 = vector.extract_strided_slice %102 {offsets = [12, 0, 0], sizes = [4, 16, 8], strides = [1, 1, 1]} : vector<32x16x8xf32> to vector<4x16x8xf32>
    %107 = tpu.concatenate %103, %104, %105, %106 in 2 : vector<4x16x8xf32>, vector<4x16x8xf32>, vector<4x16x8xf32>, vector<4x16x8xf32> -> vector<4x16x32xf32>
    %108 = vector.shape_cast %107 : vector<4x16x32xf32> to vector<64x32xf32>
    %109 = vector.extract_strided_slice %102 {offsets = [16, 0, 0], sizes = [4, 16, 8], strides = [1, 1, 1]} : vector<32x16x8xf32> to vector<4x16x8xf32>
    %110 = vector.extract_strided_slice %102 {offsets = [20, 0, 0], sizes = [4, 16, 8], strides = [1, 1, 1]} : vector<32x16x8xf32> to vector<4x16x8xf32>
    %111 = vector.extract_strided_slice %102 {offsets = [24, 0, 0], sizes = [4, 16, 8], strides = [1, 1, 1]} : vector<32x16x8xf32> to vector<4x16x8xf32>
    %112 = vector.extract_strided_slice %102 {offsets = [28, 0, 0], sizes = [4, 16, 8], strides = [1, 1, 1]} : vector<32x16x8xf32> to vector<4x16x8xf32>
    %113 = tpu.concatenate %109, %110, %111, %112 in 2 : vector<4x16x8xf32>, vector<4x16x8xf32>, vector<4x16x8xf32>, vector<4x16x8xf32> -> vector<4x16x32xf32>
    %114 = vector.shape_cast %113 : vector<4x16x32xf32> to vector<64x32xf32>
    %115 = tpu.concatenate %108, %114 in 1 : vector<64x32xf32>, vector<64x32xf32> -> vector<64x64xf32>
    %c0_32 = arith.constant 0 : index
    %c0_33 = arith.constant 0 : index
    %116 = vector.load %arg7[%c0_32, %c0_33] : memref<32x32xf32, #tpu.memory_space<vmem>>, vector<32x32xf32>
    %cst_34 = arith.constant dense<0.000000e+00> : vector<64x32xf32>
    %117 = tpu.matmul %108, %116, %cst_34 {dimension_numbers = #tpu.dot_dimension_numbers<[1], [0], [0], [1], [0, 0, 1, 1], [], []>} : vector<64x32xf32>, vector<32x32xf32>, vector<64x32xf32> -> vector<64x32xf32>
    %c0_35 = arith.constant 0 : index
    %c0_36 = arith.constant 0 : index
    %118 = vector.load %arg8[%c0_35, %c0_36] : memref<1x32xf32, #tpu.memory_space<vmem>>, vector<1x32xf32>
    %119 = vector.broadcast %118 : vector<1x32xf32> to vector<64x32xf32>
    %120 = arith.addf %117, %119 : vector<64x32xf32>
    %121 = arith.addf %1, %120 : vector<64x32xf32>
    %c0_37 = arith.constant 0 : index
    %c0_38 = arith.constant 0 : index
    %122 = vector.load %arg10[%c0_37, %c0_38] : memref<1x32xf32, #tpu.memory_space<vmem>>, vector<1x32xf32>
    %c0_39 = arith.constant 0 : index
    %c0_40 = arith.constant 0 : index
    %123 = vector.load %arg11[%c0_39, %c0_40] : memref<1x32xf32, #tpu.memory_space<vmem>>, vector<1x32xf32>
    %cst_41 = arith.constant dense<0.000000e+00> : vector<64xf32>
    %124 = vector.multi_reduction <add>, %121, %cst_41 [1] : vector<64x32xf32> to vector<64xf32>
    %125 = vector.shape_cast %124 : vector<64xf32> to vector<64x1xf32>
    %cst_42 = arith.constant 3.200000e+01 : f32
    %126 = vector.broadcast %cst_42 : f32 to vector<64x1xf32>
    %127 = arith.divf %125, %126 : vector<64x1xf32>
    %128 = vector.broadcast %127 : vector<64x1xf32> to vector<64x32xf32>
    %129 = arith.subf %121, %128 : vector<64x32xf32>
    %130 = arith.mulf %129, %129 : vector<64x32xf32>
    %cst_43 = arith.constant dense<0.000000e+00> : vector<64xf32>
    %131 = vector.multi_reduction <add>, %130, %cst_43 [1] : vector<64x32xf32> to vector<64xf32>
    %132 = vector.shape_cast %131 : vector<64xf32> to vector<64x1xf32>
    %cst_44 = arith.constant 3.200000e+01 : f32
    %133 = vector.broadcast %cst_44 : f32 to vector<64x1xf32>
    %134 = arith.divf %132, %133 : vector<64x1xf32>
    %135 = vector.broadcast %127 : vector<64x1xf32> to vector<64x32xf32>
    %136 = arith.subf %121, %135 : vector<64x32xf32>
    %cst_45 = arith.constant 9.99999974E-6 : f32
    %137 = vector.broadcast %cst_45 : f32 to vector<64x1xf32>
    %138 = arith.addf %134, %137 : vector<64x1xf32>
    %139 = math.rsqrt %138 : vector<64x1xf32>
    %140 = vector.broadcast %139 : vector<64x1xf32> to vector<64x32xf32>
    %141 = arith.mulf %136, %140 : vector<64x32xf32>
    %142 = vector.broadcast %122 : vector<1x32xf32> to vector<64x32xf32>
    %143 = arith.mulf %141, %142 : vector<64x32xf32>
    %144 = vector.broadcast %123 : vector<1x32xf32> to vector<64x32xf32>
    %145 = arith.addf %143, %144 : vector<64x32xf32>
    %c0_46 = arith.constant 0 : index
    %c0_47 = arith.constant 0 : index
    %146 = vector.load %arg12[%c0_46, %c0_47] : memref<32x128xf32, #tpu.memory_space<vmem>>, vector<32x128xf32>
    %cst_48 = arith.constant dense<0.000000e+00> : vector<64x128xf32>
    %147 = tpu.matmul %145, %146, %cst_48 {dimension_numbers = #tpu.dot_dimension_numbers<[1], [0], [0], [1], [0, 0, 1, 1], [], []>} : vector<64x32xf32>, vector<32x128xf32>, vector<64x128xf32> -> vector<64x128xf32>
    %c0_49 = arith.constant 0 : index
    %c0_50 = arith.constant 0 : index
    %148 = vector.load %arg13[%c0_49, %c0_50] : memref<1x128xf32, #tpu.memory_space<vmem>>, vector<1x128xf32>
    %149 = vector.broadcast %148 : vector<1x128xf32> to vector<64x128xf32>
    %150 = arith.addf %147, %149 : vector<64x128xf32>
    %cst_51 = arith.constant 5.000000e-01 : f32
    %151 = vector.broadcast %cst_51 : f32 to vector<64x128xf32>
    %152 = arith.mulf %151, %150 : vector<64x128xf32>
    %cst_52 = arith.constant 0.707106769 : f32
    %153 = vector.broadcast %cst_52 : f32 to vector<64x128xf32>
    %154 = arith.mulf %150, %153 : vector<64x128xf32>
    %cst_53 = arith.constant 0.000000e+00 : f32
    %155 = vector.broadcast %cst_53 : f32 to vector<64x128xf32>
    %156 = arith.cmpf oge, %154, %155 : vector<64x128xf32>
    %cst_54 = arith.constant 1.000000e+00 : f32
    %cst_55 = arith.constant -1.000000e+00 : f32
    %157 = vector.broadcast %cst_54 : f32 to vector<64x128xf32>
    %158 = vector.broadcast %cst_55 : f32 to vector<64x128xf32>
    %159 = arith.select %156, %157, %158 : vector<64x128xi1>, vector<64x128xf32>
    %160 = math.absf %154 : vector<64x128xf32>
    %cst_56 = arith.constant 0.327591091 : f32
    %161 = vector.broadcast %cst_56 : f32 to vector<64x128xf32>
    %162 = arith.mulf %161, %160 : vector<64x128xf32>
    %cst_57 = arith.constant 1.000000e+00 : f32
    %163 = vector.broadcast %cst_57 : f32 to vector<64x128xf32>
    %164 = arith.addf %163, %162 : vector<64x128xf32>
    %165 = tpu.reciprocal %164 {approx = true} : vector<64x128xf32> -> vector<64x128xf32>
    %cst_58 = arith.constant 1.06140542 : f32
    %166 = vector.broadcast %cst_58 : f32 to vector<64x128xf32>
    %167 = arith.mulf %166, %165 : vector<64x128xf32>
    %cst_59 = arith.constant -1.45315206 : f32
    %168 = vector.broadcast %cst_59 : f32 to vector<64x128xf32>
    %169 = arith.addf %167, %168 : vector<64x128xf32>
    %170 = arith.mulf %169, %165 : vector<64x128xf32>
    %cst_60 = arith.constant 1.42141378 : f32
    %171 = vector.broadcast %cst_60 : f32 to vector<64x128xf32>
    %172 = arith.addf %170, %171 : vector<64x128xf32>
    %173 = arith.mulf %172, %165 : vector<64x128xf32>
    %cst_61 = arith.constant -0.284496725 : f32
    %174 = vector.broadcast %cst_61 : f32 to vector<64x128xf32>
    %175 = arith.addf %173, %174 : vector<64x128xf32>
    %176 = arith.mulf %175, %165 : vector<64x128xf32>
    %cst_62 = arith.constant 0.254829586 : f32
    %177 = vector.broadcast %cst_62 : f32 to vector<64x128xf32>
    %178 = arith.addf %176, %177 : vector<64x128xf32>
    %179 = arith.mulf %178, %165 : vector<64x128xf32>
    %cst_63 = arith.constant 0.000000e+00 : f32
    %180 = vector.broadcast %cst_63 : f32 to vector<64x128xf32>
    %181 = arith.subf %180, %160 : vector<64x128xf32>
    %182 = arith.mulf %181, %160 : vector<64x128xf32>
    %183 = math.exp %182 : vector<64x128xf32>
    %184 = arith.mulf %179, %183 : vector<64x128xf32>
    %cst_64 = arith.constant 1.000000e+00 : f32
    %185 = vector.broadcast %cst_64 : f32 to vector<64x128xf32>
    %186 = arith.subf %185, %184 : vector<64x128xf32>
    %187 = arith.mulf %159, %186 : vector<64x128xf32>
    %cst_65 = arith.constant 1.000000e+00 : f32
    %188 = vector.broadcast %cst_65 : f32 to vector<64x128xf32>
    %189 = arith.addf %188, %187 : vector<64x128xf32>
    %190 = arith.mulf %152, %189 : vector<64x128xf32>
    %c0_66 = arith.constant 0 : index
    %c0_67 = arith.constant 0 : index
    %191 = vector.load %arg14[%c0_66, %c0_67] : memref<128x32xf32, #tpu.memory_space<vmem>>, vector<128x32xf32>
    %cst_68 = arith.constant dense<0.000000e+00> : vector<64x32xf32>
    %192 = tpu.matmul %190, %191, %cst_68 {dimension_numbers = #tpu.dot_dimension_numbers<[1], [0], [0], [1], [0, 0, 1, 1], [], []>} : vector<64x128xf32>, vector<128x32xf32>, vector<64x32xf32> -> vector<64x32xf32>
    %193 = arith.addf %121, %192 : vector<64x32xf32>
    %c0_69 = arith.constant 0 : index
    %c0_70 = arith.constant 0 : index
    %194 = vector.load %arg15[%c0_69, %c0_70] : memref<1x32xf32, #tpu.memory_space<vmem>>, vector<1x32xf32>
    %195 = vector.broadcast %194 : vector<1x32xf32> to vector<64x32xf32>
    %196 = arith.addf %193, %195 : vector<64x32xf32>
    %cst_71 = arith.constant 0.000000e+00 : f32
    %197 = vector.broadcast %cst_71 : f32 to vector<64x32xf32>
    %198 = tpu.concatenate %196, %115, %197 in 1 : vector<64x32xf32>, vector<64x64xf32>, vector<64x32xf32> -> vector<64x128xf32>
    %c0_72 = arith.constant 0 : index
    %c0_73 = arith.constant 0 : index
    %c0_74 = arith.constant 0 : index
    %199 = vector.load %arg16[%c0_72, %c0_73, %c0_74] : memref<1x64x128xf32, #tpu.memory_space<vmem>>, vector<1x64x128xf32>
    %200 = vector.shape_cast %199 : vector<1x64x128xf32> to vector<64x128xf32>
    %201 = vector.shape_cast %198 : vector<64x128xf32> to vector<1x64x128xf32>
    tpu.vector_store %arg16[%c0_72, %c0_73, %c0_74], %201 {strides = array<i32>} : memref<1x64x128xf32, #tpu.memory_space<vmem>>, vector<1x64x128xf32>,
    return
  }
  func.func @transform_0(%arg0: i32) -> (i32, i32, i32) {
    %c0_i32 = arith.constant 0 : i32
    %c0_i32_0 = arith.constant 0 : i32
    %c0_i32_1 = arith.constant 0 : i32
    return %arg0, %c0_i32, %c0_i32_0 : i32, i32, i32
  }
  func.func @transform_1(%arg0: i32) -> (i32, i32, i32) {
    %c0_i32 = arith.constant 0 : i32
    %c0_i32_0 = arith.constant 0 : i32
    %c0_i32_1 = arith.constant 0 : i32
    return %arg0, %c0_i32, %c0_i32_0 : i32, i32, i32
  }
  func.func @transform_2(%arg0: i32) -> (i32, i32) {
    %c0_i32 = arith.constant 0 : i32
    %c0_i32_0 = arith.constant 0 : i32
    %c0_i32_1 = arith.constant 0 : i32
    return %c0_i32, %c0_i32_0 : i32, i32
  }
  func.func @transform_3(%arg0: i32) -> (i32, i32) {
    %c0_i32 = arith.constant 0 : i32
    %c0_i32_0 = arith.constant 0 : i32
    %c0_i32_1 = arith.constant 0 : i32
    return %c0_i32, %c0_i32_0 : i32, i32
  }
  func.func @transform_4(%arg0: i32) -> (i32, i32) {
    %c0_i32 = arith.constant 0 : i32
    %c0_i32_0 = arith.constant 0 : i32
    %c0_i32_1 = arith.constant 0 : i32
    return %c0_i32, %c0_i32_0 : i32, i32
  }
  func.func @transform_5(%arg0: i32) -> (i32, i32) {
    %c0_i32 = arith.constant 0 : i32
    %c0_i32_0 = arith.constant 0 : i32
    %c0_i32_1 = arith.constant 0 : i32
    return %c0_i32, %c0_i32_0 : i32, i32
  }
  func.func @transform_6(%arg0: i32) -> (i32, i32) {
    %c0_i32 = arith.constant 0 : i32
    %c0_i32_0 = arith.constant 0 : i32
    %c0_i32_1 = arith.constant 0 : i32
    return %c0_i32, %c0_i32_0 : i32, i32
  }
  func.func @transform_7(%arg0: i32) -> (i32, i32) {
    %c0_i32 = arith.constant 0 : i32
    %c0_i32_0 = arith.constant 0 : i32
    %c0_i32_1 = arith.constant 0 : i32
    return %c0_i32, %c0_i32_0 : i32, i32
  }
  func.func @transform_8(%arg0: i32) -> (i32, i32, i32) {
    %c0_i32 = arith.constant 0 : i32
    %c0_i32_0 = arith.constant 0 : i32
    %c0_i32_1 = arith.constant 0 : i32
    %c0_i32_2 = arith.constant 0 : i32
    return %c0_i32, %c0_i32_0, %c0_i32_1 : i32, i32, i32
  }
  func.func @transform_9(%arg0: i32) -> (i32, i32) {
    %c0_i32 = arith.constant 0 : i32
    %c0_i32_0 = arith.constant 0 : i32
    %c0_i32_1 = arith.constant 0 : i32
    return %c0_i32, %c0_i32_0 : i32, i32
  }
  func.func @transform_10(%arg0: i32) -> (i32, i32) {
    %c0_i32 = arith.constant 0 : i32
    %c0_i32_0 = arith.constant 0 : i32
    %c0_i32_1 = arith.constant 0 : i32
    return %c0_i32, %c0_i32_0 : i32, i32
  }
  func.func @transform_11(%arg0: i32) -> (i32, i32) {
    %c0_i32 = arith.constant 0 : i32
    %c0_i32_0 = arith.constant 0 : i32
    %c0_i32_1 = arith.constant 0 : i32
    return %c0_i32, %c0_i32_0 : i32, i32
  }
  func.func @transform_12(%arg0: i32) -> (i32, i32) {
    %c0_i32 = arith.constant 0 : i32
    %c0_i32_0 = arith.constant 0 : i32
    %c0_i32_1 = arith.constant 0 : i32
    return %c0_i32, %c0_i32_0 : i32, i32
  }
  func.func @transform_13(%arg0: i32) -> (i32, i32) {
    %c0_i32 = arith.constant 0 : i32
    %c0_i32_0 = arith.constant 0 : i32
    %c0_i32_1 = arith.constant 0 : i32
    return %c0_i32, %c0_i32_0 : i32, i32
  }
  func.func @transform_14(%arg0: i32) -> (i32, i32) {
    %c0_i32 = arith.constant 0 : i32
    %c0_i32_0 = arith.constant 0 : i32
    %c0_i32_1 = arith.constant 0 : i32
    return %c0_i32, %c0_i32_0 : i32, i32
  }
  func.func @transform_15(%arg0: i32) -> (i32, i32, i32) {
    %c0_i32 = arith.constant 0 : i32
    %c0_i32_0 = arith.constant 0 : i32
    %c0_i32_1 = arith.constant 0 : i32
    return %arg0, %c0_i32, %c0_i32_0 : i32, i32, i32
  }
}

</mosaic_0001>

<bundles_post_ra>
// kernel: swin_block_forward.1
= control target key start
LH: loop header
LB: loop body
LE: loop exit
PB: predicated region body
PF: predicated region fallthrough
CT: control target
= control target key end

     0   :  { %s10986_s18 = smov 0   ;;  %s13748_s0 = inlined_call_operand.vmem [shape: f32[2,64,32], index: 0, kind: input, shape index: {}]   ;;  %s13749_s1 = inlined_call_operand.vmem [shape: f32[2,64,32], index: 1, kind: input, shape index: {}]   ;;  %s13750_s2 = inlined_call_operand.vmem [shape: f32[1,32], index: 2, kind: input, shape index: {}]   ;;  %s13751_s3 = inlined_call_operand.vmem [shape: f32[1,32], index: 3, kind: input, shape index: {}]   ;;  %s13752_s4 = inlined_call_operand.vmem [shape: f32[32,96], index: 4, kind: input, shape index: {}]   ;;  %s13753_s5 = inlined_call_operand.vmem [shape: f32[1,96], index: 5, kind: input, shape index: {}]   ;;  %s13754_s6 = inlined_call_operand.vmem [shape: f32[32,32], index: 6, kind: input, shape index: {}]   ;;  %s13755_s7 = inlined_call_operand.vmem [shape: f32[1,32], index: 7, kind: input, shape index: {}]   ;;  %s13756_s8 = inlined_call_operand.vmem [shape: f32[16,16,16], index: 8, kind: input, shape index: {}]   ;;  %s13757_s9 = inlined_call_operand.vmem [shape: f32[1,32], index: 9, kind: input, shape index: {}]   ;;  %s13758_s10 = inlined_call_operand.vmem [shape: f32[1,32], index: 10, kind: input, shape index: {}]   ;;  %s13759_s11 = inlined_call_operand.vmem [shape: f32[32,128], index: 11, kind: input, shape index: {}]   ;;  %s13760_s12 = inlined_call_operand.vmem [shape: f32[1,128], index: 12, kind: input, shape index: {}]   ;;  %s13761_s13 = inlined_call_operand.vmem [shape: f32[128,32], index: 13, kind: input, shape index: {}]   ;;  %s13762_s14 = inlined_call_operand.vmem [shape: f32[1,32], index: 14, kind: input, shape index: {}]   ;;  %s13763_s15 = inlined_call_operand.vmem [shape: f32[2,64,128], index: 15, kind: output, shape index: {}]  }
   0x1 LB: > { %s8589_s19 = sadd.s32 4294967295, %s10894_s18   ;;  %p8593_p0 = scmp.ge.s32.totalorder %s10894_s18, 1  ;;  %s10894_s18 = sphi %s10986_s18, %s25_s18  }
   0x2   : > { %p447_p1 = scmp.lt.s32.totalorder %s10894_s18, 3 }
   0x4   : > { %p448_p2 = pnand %p8593_p0, %p447_p1 }
   0x6   : > { %451 = sbr.rel (%p448_p2) target bundleno = 3080 (0xc08), region = 80 }
   0xd   : > { %p500_p3 = scmp.lt.s32.totalorder %s8589_s19, 1  ;;  %vm533_vm0 = vcmask 261120   ;;  %vm1204_vm1 = vcmask 64512   ;;  %s10896_s29 = smov 120   ;;  %vm3921_vm3 = vcmask 130048   ;;  %vm7522_vm4 = vcmask 195584  }
   0xe   : > { %s10897_s30 = smov 112   ;;  %s10898_s16 = smov 104   ;;  %vm11416_vm2 = vmpackc.low %vm1204_vm1, %vm1204_vm1  ;;  %vm8505_vm13 = vcmask 785408  }
   0xf   : > { %s13929_s19 = smov (!%p500_p3, %s8589_s19), 1  ;;  %s10899_s17 = smov 96  }
  0x10   : > { %s10994_s20 = sshll.u32 %s13929_s19, 6  ;;  %s10900_s19 = smov 64  }
  0x11   : > { %s11000_s23 = scalar_lea.vmem %s13748_s0, %s10994_s20  ;;  %s11055_s26 = scalar_lea.vmem %s13749_s1, %s10994_s20 }
  0x12   : > { %v515_v0 = vld [vmem:[%s11000_s23] sm:$0xff]  ;;  %v517_v1 = vld [vmem:[%s11000_s23 + $0x10] sm:$0xff]  ;;  %v516_v2 = vld [vmem:[%s11000_s23 + $0x8] sm:$0xff]  ;;  %s10901_s28 = smov 8  }
  0x13   : > { %v534_v3 = vsel %vm533_vm0, %v515_v0, 0.0  ;;  %v540_v4 = vsel %vm533_vm0, %v517_v1, 0.0  ;;  %v518_v5 = vld [vmem:[%s11000_s23 + $0x18] sm:$0xff]  ;;  %v537_v6 = vsel %vm533_vm0, %v516_v2, 0.0  ;;  %v519_v8 = vld [vmem:[%s11000_s23 + $0x20] sm:$0xff]  ;;  %v520_v9 = vld [vmem:[%s11000_s23 + $0x28] sm:$0xff] }
  0x14   : > { %535 = vadd.xlane.f32.xlu0 %v534_v3  ;;  %541 = vadd.xlane.f32.xlu1 %v540_v4  ;;  %v543_v7 = vsel %vm533_vm0, %v518_v5, 0.0  ;;  %v546_v10 = vsel %vm533_vm0, %v519_v8, 0.0  ;;  %v549_v11 = vsel %vm533_vm0, %v520_v9, 0.0  ;;  %v521_v12 = vld [vmem:[%s11000_s23 + $0x30] sm:$0xff]  ;;  %v522_v13 = vld [vmem:[%s11000_s23 + $0x38] sm:$0xff]  ;;  %v11063_v54 = vld [vmem:[%s11055_s26] sm:$0xff] }
  0x15   : > { %v552_v14 = vsel %vm533_vm0, %v521_v12, 0.0  ;;  %v555_v15 = vsel %vm533_vm0, %v522_v13, 0.0  ;;  %v667_v57 = vsel %vm533_vm0, %v11063_v54, 0.0  ;;  %v11070_v58 = vld [vmem:[%s11055_s26 + $0x8] sm:$0xff]  ;;  %v11073_v59 = vld [vmem:[%s11055_s26 + $0x10] sm:$0xff]  ;;  %v11080_v62 = vld [vmem:[%s11055_s26 + $0x18] sm:$0xff] }
  0x16   : > { %v670_v60 = vsel %vm533_vm0, %v11070_v58, 0.0  ;;  %v673_v61 = vsel %vm533_vm0, %v11073_v59, 0.0  ;;  %v11083_v63 = vld [vmem:[%s11055_s26 + $0x20] sm:$0xff]  ;;  %v11093_v3 = vld [vmem:[%s11055_s26 + $0x30] sm:$0xff] }
  0x18   : > { %538 = vadd.xlane.f32.xlu0 %v537_v6  ;;  %544 = vadd.xlane.f32.xlu1 %v543_v7  ;;  %v787_v6 = vld [vmem:[%s13752_s4] sm:$0xff]  ;;  %v788_v7 = vld [vmem:[%s13752_s4 + $0x8] sm:$0xff] }
  0x1c   : > { %547 = vadd.xlane.f32.xlu0 %v546_v10  ;;  %550 = vadd.xlane.f32.xlu1 %v549_v11  ;;  %v790_v10 = vld [vmem:[%s13752_s4 + $0x18] sm:$0xff] }
  0x20   : > { %553 = vadd.xlane.f32.xlu0 %v552_v14  ;;  %556 = vadd.xlane.f32.xlu1 %v555_v15 }
  0xa1   : > { %v536_v16 = vpop.xlane.xlu0 %535  ;;  %v542_v17 = vpop.xlane.xlu1 %541 }
  0xa2   : > { %v559_v18 = vmul.f32 0.03125, %v536_v16  ;;  %v561_v19 = vmul.f32 0.03125, %v542_v17 }
  0xa4   : > { %v11018_v20 = vsub.f32 %v515_v0, %v559_v18  ;;  %v11020_v21 = vsub.f32 %v517_v1, %v561_v19  ;;  %v676_v0 = vsel %vm533_vm0, %v11080_v62, 0.0  ;;  %v679_v1 = vsel %vm533_vm0, %v11083_v63, 0.0 }
  0xa5   : > { %v539_v22 = vpop.xlane.xlu0 %538  ;;  %v545_v23 = vpop.xlane.xlu1 %544 }
  0xa6   : > { %v560_v24 = vmul.f32 0.03125, %v539_v22  ;;  %v562_v25 = vmul.f32 0.03125, %v545_v23  ;;  %v575_v26 = vmul.f32 %v11018_v20, %v11018_v20  ;;  %v577_v27 = vmul.f32 %v11020_v21, %v11020_v21 }
  0xa8   : > { %v11026_v28 = vsub.f32 %v516_v2, %v560_v24  ;;  %v11028_v29 = vsub.f32 %v518_v5, %v562_v25  ;;  %v583_v30 = vsel %vm533_vm0, %v575_v26, 0.0  ;;  %v589_v33 = vsel %vm533_vm0, %v577_v27, 0.0  ;;  %v11090_v2 = vld [vmem:[%s11055_s26 + $0x28] sm:$0xff] }
  0xa9   : > { %584 = vadd.xlane.f32.xlu0 %v583_v30  ;;  %v548_v31 = vpop.xlane.xlu0 %547  ;;  %v551_v32 = vpop.xlane.xlu1 %550  ;;  %v682_v4 = vsel %vm533_vm0, %v11090_v2, 0.0  ;;  %v685_v5 = vsel %vm533_vm0, %v11093_v3, 0.0 }
  0xaa   : > { %v563_v34 = vmul.f32 0.03125, %v548_v31  ;;  %v564_v35 = vmul.f32 0.03125, %v551_v32  ;;  %v576_v36 = vmul.f32 %v11026_v28, %v11026_v28  ;;  %v578_v37 = vmul.f32 %v11028_v29, %v11028_v29 }
  0xac   : > { %v11036_v38 = vsub.f32 %v519_v8, %v563_v34  ;;  %v11038_v39 = vsub.f32 %v520_v9, %v564_v35  ;;  %v586_v40 = vsel %vm533_vm0, %v576_v36, 0.0  ;;  %v592_v43 = vsel %vm533_vm0, %v578_v37, 0.0  ;;  %v789_v9 = vld [vmem:[%s13752_s4 + $0x10] sm:$0xff] }
  0xad   : > { %590 = vadd.xlane.f32.xlu0 %v589_v33  ;;  %587 = vadd.xlane.f32.xlu1 %v586_v40  ;;  %v554_v41 = vpop.xlane.xlu0 %553  ;;  %v557_v42 = vpop.xlane.xlu1 %556  ;;  %v11105_v8 = vpack.c.bf16 %v788_v7, %v787_v6  ;;  %v11115_v11 = vpack.c.bf16 %v790_v10, %v789_v9 }
  0xae   : > { %v565_v44 = vmul.f32 0.03125, %v554_v41  ;;  %v566_v45 = vmul.f32 0.03125, %v557_v42  ;;  %v579_v46 = vmul.f32 %v11036_v38, %v11036_v38  ;;  %v580_v47 = vmul.f32 %v11038_v39, %v11038_v39  ;;  %v11128_v42 = vld [vmem:[%s13750_s2] ss:$0 sm:$0xff] }
  0xaf   : > { %9738 = vmatprep.subr.bf16.mxu1 %v11105_v8 }
  0xb0   : > { %v11046_v48 = vsub.f32 %v521_v12, %v565_v44  ;;  %v11048_v49 = vsub.f32 %v522_v13, %v566_v45  ;;  %v595_v50 = vsel %vm533_vm0, %v579_v46, 0.0  ;;  %v598_v51 = vsel %vm533_vm0, %v580_v47, 0.0  ;;  %9740 = vmatpush3.bf16.msra.mxu1 %v11105_v8  ;;  %v11121_v12 = vld [vmem:[%s11055_s26 + $0x38] sm:$0xff]  ;;  %v11134_v47 = vld [vmem:[%s13751_s3] ss:$0 sm:$0xff] }
  0xb1   : > { %593 = vadd.xlane.f32.xlu1 %v592_v43  ;;  %596 = vadd.xlane.f32.xlu0 %v595_v50  ;;  %v688_v13 = vsel %vm533_vm0, %v11121_v12, 0.0 }
  0xb2   : > { %v581_v52 = vmul.f32 %v11046_v48, %v11046_v48  ;;  %v582_v53 = vmul.f32 %v11048_v49, %v11048_v49  ;;  %9742 = vmatprep.subr.bf16.mxu1 %v11115_v11 }
  0xb4   : > { %v601_v55 = vsel %vm533_vm0, %v581_v52, 0.0  ;;  %v604_v56 = vsel %vm533_vm0, %v582_v53, 0.0  ;;  %9744 = vmatpush3.bf16.msra.mxu1 %v11115_v11 }
  0xb5   : > { %599 = vadd.xlane.f32.xlu1 %v598_v51  ;;  %602 = vadd.xlane.f32.xlu0 %v601_v55 }
  0xb6   : > { %9746 = vmatprep.subr.bf16.mxu1 %v11105_v8 }
  0xb9   : > { %605 = vadd.xlane.f32.xlu1 %v604_v56  ;;  %668 = vadd.xlane.f32.xlu0 %v667_v57 }
  0xbd   : > { %671 = vadd.xlane.f32.xlu1 %v670_v60  ;;  %674 = vadd.xlane.f32.xlu0 %v673_v61 }
  0xc1   : > { %677 = vadd.xlane.f32.xlu1 %v676_v0  ;;  %680 = vadd.xlane.f32.xlu0 %v679_v1 }
  0xc5   : > { %683 = vadd.xlane.f32.xlu1 %v682_v4  ;;  %686 = vadd.xlane.f32.xlu0 %v685_v5 }
  0xc9   : > { %689 = vadd.xlane.f32.xlu1 %v688_v13 }
 0x136   : > { %v585_v14 = vpop.xlane.xlu0 %584 }
 0x137   : > { %v607_v15 = vmul.f32 0.03125, %v585_v14 }
 0x139   : > { %v615_v16 = vadd.f32 1e-05, %v607_v15 }
 0x13a   : > { %v588_v17 = vpop.xlane.xlu1 %587  ;;  %v591_v18 = vpop.xlane.xlu0 %590 }
 0x13b   : > { %10519 = vrsqrt.f32 %v615_v16  ;;  %v608_v19 = vmul.f32 0.03125, %v588_v17  ;;  %v609_v22 = vmul.f32 0.03125, %v591_v18 }
 0x13d   : > { %v616_v23 = vadd.f32 1e-05, %v608_v19  ;;  %v617_v24 = vadd.f32 1e-05, %v609_v22 }
 0x13e   : > { %v594_v25 = vpop.xlane.xlu1 %593  ;;  %v597_v26 = vpop.xlane.xlu0 %596 }
 0x13f   : > { %10521 = vrsqrt.f32 %v616_v23  ;;  %v610_v27 = vmul.f32 0.03125, %v594_v25  ;;  %v611_v30 = vmul.f32 0.03125, %v597_v26 }
 0x140   : > { %10523 = vrsqrt.f32 %v617_v24 }
 0x141   : > { %v618_v31 = vadd.f32 1e-05, %v610_v27  ;;  %v619_v32 = vadd.f32 1e-05, %v611_v30 }
 0x142   : > { %v600_v33 = vpop.xlane.xlu1 %599  ;;  %v603_v34 = vpop.xlane.xlu0 %602 }
 0x143   : > { %10525 = vrsqrt.f32 %v618_v31  ;;  %v612_v35 = vmul.f32 0.03125, %v600_v33  ;;  %v613_v36 = vmul.f32 0.03125, %v603_v34 }
 0x144   : > { %10527 = vrsqrt.f32 %v619_v32 }
 0x145   : > { %v10520_v37 = vpop.eup %10519  ;;  %v620_v40 = vadd.f32 1e-05, %v612_v35  ;;  %v621_v41 = vadd.f32 1e-05, %v613_v36 }
 0x146   : > { %v606_v43 = vpop.xlane.xlu1 %605  ;;  %v631_v44 = vmul.f32 %v10520_v37, %v11018_v20  ;;  %v669_v45 = vpop.xlane.xlu0 %668 }
 0x147   : > { %10529 = vrsqrt.f32 %v620_v40  ;;  %v614_v46 = vmul.f32 0.03125, %v606_v43  ;;  %v691_v50 = vmul.f32 0.03125, %v669_v45 }
 0x148   : > { %10531 = vrsqrt.f32 %v621_v41  ;;  %v645_v51 = vmul.f32 %v11128_v42, %v631_v44 }
 0x149   : > { %v10522_v52 = vpop.eup %10521  ;;  %v622_v53 = vadd.f32 1e-05, %v614_v46  ;;  %v11138_v55 = vsub.f32 %v11063_v54, %v691_v50 }
 0x14a   : > { %v10524_v56 = vpop.eup %10523  ;;  %v659_v20 = vadd.f32 %v11134_v47, %v645_v51  ;;  %v632_v57 = vmul.f32 %v10522_v52, %v11026_v28  ;;  %v672_v60 = vpop.xlane.xlu1 %671 }
 0x14b   : > { %v675_v61 = vpop.xlane.xlu0 %674  ;;  %10533 = vrsqrt.f32 %v622_v53  ;;  %v633_v0 = vmul.f32 %v10524_v56, %v11020_v21  ;;  %v692_v1 = vmul.f32 0.03125, %v672_v60  ;;  %v707_v54 = vmul.f32 %v11138_v55, %v11138_v55 }
 0x14c   : > { %v693_v4 = vmul.f32 0.03125, %v675_v61  ;;  %9173 = vmatprep.mubr.msk.f32.mxu1 %vm533_vm0, %v659_v20  ;;  %v646_v5 = vmul.f32 %v11128_v42, %v632_v57 }
 0x14d   : > { %v10526_v6 = vpop.eup %10525  ;;  %v647_v7 = vmul.f32 %v11128_v42, %v633_v0  ;;  %v11149_v9 = vsub.f32 %v11070_v58, %v692_v1  ;;  %v715_v15 = vsel %vm533_vm0, %v707_v54, 0.0 }
 0x14e   : > { %v11152_v28 = vsub.f32 %v11073_v59, %v693_v4  ;;  %v10528_v10 = vpop.eup %10527  ;;  %v660_v21 = vadd.f32 %v11134_v47, %v646_v5  ;;  %v634_v13 = vmul.f32 %v10526_v6, %v11028_v29  ;;  %v678_v14 = vpop.xlane.xlu1 %677  ;;  %716 = vadd.xlane.f32.xlu0 %v715_v15 }
 0x14f   : > { %v681_v16 = vpop.xlane.xlu0 %680  ;;  %v661_v17 = vadd.f32 %v11134_v47, %v647_v7  ;;  %v635_v18 = vmul.f32 %v10528_v10, %v11036_v38  ;;  %v694_v19 = vmul.f32 0.03125, %v678_v14  ;;  %v708_v22 = vmul.f32 %v11149_v9, %v11149_v9 }
 0x150   : > { %v695_v58 = vmul.f32 0.03125, %v681_v16  ;;  %9174 = vmatmul.mubr.msk.f32.vlgmr.msra.gmra.mrb[0].mxu1 %vm533_vm0, %v660_v21  ;;  %v648_v59 = vmul.f32 %v11128_v42, %v634_v13  ;;  %v709_v29 = vmul.f32 %v11152_v28, %v11152_v28 }
 0x151   : > { %v10530_v23 = vpop.eup %10529  ;;  %9176 = vmatprep.mubr.msk.f32.mxu1 %vm533_vm0, %v661_v17  ;;  %v649_v24 = vmul.f32 %v11128_v42, %v635_v18  ;;  %v11168_v38 = vsub.f32 %v11080_v62, %v694_v19  ;;  %9748 = vmatpush3.bf16.msra.mxu1 %v11105_v8  ;;  %v718_v31 = vsel %vm533_vm0, %v708_v22, 0.0 }
 0x152   : > { %v11171_v25 = vsub.f32 %v11083_v63, %v695_v58  ;;  %v10532_v26 = vpop.eup %10531  ;;  %v662_v27 = vadd.f32 %v11134_v47, %v648_v59  ;;  %v636_v30 = vmul.f32 %v10530_v23, %v11038_v39  ;;  %v684_v32 = vpop.xlane.xlu1 %683  ;;  %v721_v33 = vsel %vm533_vm0, %v709_v29, 0.0  ;;  %9750 = vmatprep.subr.bf16.mxu1 %v11115_v11  ;;  %719 = vadd.xlane.f32.xlu1 %v718_v31 }
 0x153   : > { %v687_v34 = vpop.xlane.xlu0 %686  ;;  %v663_v62 = vadd.f32 %v11134_v47, %v649_v24  ;;  %v637_v63 = vmul.f32 %v10532_v26, %v11046_v48  ;;  %v696_v35 = vmul.f32 0.03125, %v684_v32  ;;  %722 = vadd.xlane.f32.xlu0 %v721_v33  ;;  %v710_v8 = vmul.f32 %v11168_v38, %v11168_v38 }
 0x154   : > { %9177 = vmatmul.mubr.msk.f32.gmra.mrb[2].mxu1 %vm533_vm0, %v662_v27  ;;  %v650_v39 = vmul.f32 %v11128_v42, %v636_v30  ;;  %v711_v36 = vmul.f32 %v11171_v25, %v11171_v25  ;;  %v697_v37 = vmul.f32 0.03125, %v687_v34 }
 0x155   : > { %v10534_v40 = vpop.eup %10533  ;;  %9179 = vmatprep.mubr.msk.f32.mxu1 %vm533_vm0, %v663_v62  ;;  %v651_v41 = vmul.f32 %v11128_v42, %v637_v63  ;;  %v11190_v48 = vsub.f32 %v11090_v2, %v696_v35  ;;  %v724_v43 = vsel %vm533_vm0, %v710_v8, 0.0  ;;  %9752 = vmatpush3.bf16.msra.mxu1 %v11115_v11 }
 0x156   : > { %v664_v44 = vadd.f32 %v11134_v47, %v650_v39  ;;  %v638_v45 = vmul.f32 %v10534_v40, %v11048_v49  ;;  %v727_v46 = vsel %vm533_vm0, %v711_v36, 0.0  ;;  %v11198_v50 = vsub.f32 %v11093_v3, %v697_v37  ;;  %725 = vadd.xlane.f32.xlu1 %v724_v43  ;;  %v11212_v56 = vpop.xlane.xlu1 %689 }
 0x157   : > { %v665_v51 = vadd.f32 %v11134_v47, %v651_v41  ;;  %728 = vadd.xlane.f32.xlu0 %v727_v46  ;;  %v712_v2 = vmul.f32 %v11190_v48, %v11190_v48 }
 0x158   : > { %9180 = vmatmul.mubr.msk.f32.gmra.mrb[4].mxu1 %vm533_vm0, %v664_v44  ;;  %v652_v11 = vmul.f32 %v11128_v42, %v638_v45  ;;  %v713_v52 = vmul.f32 %v11198_v50, %v11198_v50 }
 0x159   : > { %9182 = vmatprep.mubr.msk.f32.mxu1 %vm533_vm0, %v665_v51  ;;  %v730_v49 = vsel %vm533_vm0, %v712_v2, 0.0 }
 0x15a   : > { %v666_v3 = vadd.f32 %v11134_v47, %v652_v11  ;;  %v733_v53 = vsel %vm533_vm0, %v713_v52, 0.0  ;;  %731 = vadd.xlane.f32.xlu1 %v730_v49 }
 0x15b   : > { %734 = vadd.xlane.f32.xlu0 %v733_v53 }
 0x15c   : > { %9183 = vmatmul.mubr.msk.f32.gmra.mrb[6].mxu1 %vm533_vm0, %v666_v3 }
 0x1db   : > { %v717_v20 = vpop.xlane.xlu0 %716 }
 0x1dc   : > { %v739_v57 = vmul.f32 0.03125, %v717_v20 }
 0x1de   : > { %v747_v60 = vadd.f32 1e-05, %v739_v57 }
 0x1df   : > { %v720_v61 = vpop.xlane.xlu1 %719 }
 0x1e0   : > { %v723_v0 = vpop.xlane.xlu0 %722  ;;  %10535 = vrsqrt.f32 %v747_v60  ;;  %v740_v1 = vmul.f32 0.03125, %v720_v61 }
 0x1e1   : > { %v741_v4 = vmul.f32 0.03125, %v723_v0 }
 0x1e2   : > { %v748_v5 = vadd.f32 1e-05, %v740_v1 }
 0x1e3   : > { %v749_v54 = vadd.f32 1e-05, %v741_v4  ;;  %v726_v6 = vpop.xlane.xlu1 %725 }
 0x1e4   : > { %v729_v7 = vpop.xlane.xlu0 %728  ;;  %10537 = vrsqrt.f32 %v748_v5  ;;  %v742_v10 = vmul.f32 0.03125, %v726_v6  ;;  %v698_v5 = vmul.f32 0.03125, %v11212_v56 }
 0x1e5   : > { %v743_v21 = vmul.f32 0.03125, %v729_v7  ;;  %10539 = vrsqrt.f32 %v749_v54 }
 0x1e6   : > { %v750_v13 = vadd.f32 1e-05, %v742_v10  ;;  %v11313_v54 = vsub.f32 %v11121_v12, %v698_v5 }
 0x1e7   : > { %v751_v14 = vadd.f32 1e-05, %v743_v21  ;;  %v732_v15 = vpop.xlane.xlu1 %731 }
 0x1e8   : > { %v735_v16 = vpop.xlane.xlu0 %734  ;;  %10541 = vrsqrt.f32 %v750_v13  ;;  %v744_v17 = vmul.f32 0.03125, %v732_v15  ;;  %v714_v56 = vmul.f32 %v11313_v54, %v11313_v54 }
 0x1e9   : > { %v745_v18 = vmul.f32 0.03125, %v735_v16  ;;  %10543 = vrsqrt.f32 %v751_v14 }
 0x1ea   : > { %v10536_v19 = vpop.eup %10535  ;;  %v752_v58 = vadd.f32 1e-05, %v744_v17  ;;  %v736_v7 = vsel %vm533_vm0, %v714_v56, 0.0 }
 0x1eb   : > { %v753_v59 = vadd.f32 1e-05, %v745_v18  ;;  %v763_v22 = vmul.f32 %v10536_v19, %v11138_v55 }
 0x1ec   : > { %10545 = vrsqrt.f32 %v752_v58 }
 0x1ed   : > { %v771_v29 = vmul.f32 %v11128_v42, %v763_v22  ;;  %10547 = vrsqrt.f32 %v753_v59 }
 0x1ee   : > { %v10538_v23 = vpop.eup %10537 }
 0x1ef   : > { %v10540_v24 = vpop.eup %10539  ;;  %v764_v26 = vmul.f32 %v10538_v23, %v11149_v9  ;;  %v779_v27 = vadd.f32 %v11134_v47, %v771_v29 }
 0x1f0   : > { %v765_v30 = vmul.f32 %v10540_v24, %v11152_v28 }
 0x1f1   : > { %v772_v31 = vmul.f32 %v11128_v42, %v764_v26  ;;  %9193 = vmatprep.mubr.msk.f32.mxu1 %vm533_vm0, %v779_v27 }
 0x1f2   : > { %v10542_v32 = vpop.eup %10541  ;;  %v773_v33 = vmul.f32 %v11128_v42, %v765_v30 }
 0x1f3   : > { %v10544_v55 = vpop.eup %10543  ;;  %v780_v34 = vadd.f32 %v11134_v47, %v772_v31  ;;  %v766_v62 = vmul.f32 %v10542_v32, %v11168_v38 }
 0x1f4   : > { %v781_v63 = vadd.f32 %v11134_v47, %v773_v33  ;;  %v767_v9 = vmul.f32 %v10544_v55, %v11171_v25 }
 0x1f5   : > { %9194 = vmatmul.mubr.msk.f32.vlgmr.msra.gmra.mrb[8].mxu1 %vm533_vm0, %v780_v34  ;;  %v774_v28 = vmul.f32 %v11128_v42, %v766_v62 }
 0x1f6   : > { %v10546_v35 = vpop.eup %10545  ;;  %9196 = vmatprep.mubr.msk.f32.mxu1 %vm533_vm0, %v781_v63  ;;  %v775_v8 = vmul.f32 %v11128_v42, %v767_v9 }
 0x1f7   : > { %v10548_v39 = vpop.eup %10547  ;;  %v782_v36 = vadd.f32 %v11134_v47, %v774_v28  ;;  %v768_v37 = vmul.f32 %v10546_v35, %v11190_v48  ;;  %v11245_v48 = vld [vmem:[%s13753_s5] ss:$0 sm:$0xff] }
 0x1f8   : > { %v783_v38 = vadd.f32 %v11134_v47, %v775_v8  ;;  %v769_v40 = vmul.f32 %v10548_v39, %v11198_v50 }
 0x1f9   : > { %9197 = vmatmul.mubr.msk.f32.gmra.mrb[10].mxu1 %vm533_vm0, %v782_v36  ;;  %v776_v25 = vmul.f32 %v11128_v42, %v768_v37 }
 0x1fa   : > { %9199 = vmatprep.mubr.msk.f32.mxu1 %vm533_vm0, %v783_v38  ;;  %v777_v41 = vmul.f32 %v11128_v42, %v769_v40 }
 0x1fb   : > { %v784_v43 = vadd.f32 %v11134_v47, %v776_v25 }
 0x1fc   : > { %v785_v44 = vadd.f32 %v11134_v47, %v777_v41 }
 0x1fd   : > { %9200 = vmatmul.mubr.msk.f32.gmra.mrb[12].mxu1 %vm533_vm0, %v784_v43 }
 0x1fe   : > { %9202 = vmatprep.mubr.msk.f32.mxu1 %vm533_vm0, %v785_v44 }
 0x223   : > { %v9175_v45 = vpop.f32.mrb[0].mxu1 }
 0x224   : > { %v11248_v46 = vadd.f32 %v9175_v45, %v11245_v48  ;;  %v888_v50 = vpop.f32.mrb[1].mxu1 }
 0x225   : > { %v11251_v51 = vadd.f32 %v11245_v48, %v888_v50 }
 0x226   : > { %1066 = vrot.lane.b32.xlu1 %v11248_v46, %s10896_s29 }
 0x227   : > { %v9178_v2 = vpop.f32.mrb[2].mxu1  ;;  %9209 = vmatprep.mubr.msk.f32.mxu0 %vm1204_vm1, %v11251_v51  ;;  %1064 = vrot.lane.b32.xlu0 %v11251_v51, %s10896_s29  ;;  %v11307_v4 = vpack.i.bf16 %v11248_v46, %v11251_v51 }
 0x228   : > { %v898_v11 = vpop.f32.mrb[3].mxu1  ;;  %v11264_v49 = vadd.f32 %v9178_v2, %v11245_v48 }
 0x229   : > { %v11274_v57 = vadd.f32 %v11245_v48, %v898_v11 }
 0x22a   : > { %1082 = vrot.lane.b32.xlu1 %v11248_v46, %s10897_s30 }
 0x22b   : > { %v9181_v52 = vpop.f32.mrb[4].mxu1  ;;  %1080 = vrot.lane.b32.xlu0 %v11251_v51, %s10897_s30  ;;  %v11342_v12 = vpack.i.bf16 %v11264_v49, %v11274_v57 }
 0x22c   : > { %v908_v3 = vpop.f32.mrb[5].mxu1  ;;  %v11284_v0 = vadd.f32 %v9181_v52, %v11245_v48 }
 0x22d   : > { %v11267_v53 = vadd.f32 %v11245_v48, %v908_v3 }
 0x22e   : > { %1070 = vrot.lane.b32.xlu1 %v11264_v49, %s10896_s29 }
 0x22f   : > { %v9184_v20 = vpop.f32.mrb[6].mxu1  ;;  %1072 = vrot.lane.b32.xlu0 %v11267_v53, %s10896_s29  ;;  %v11319_v6 = vpack.i.bf16 %v11284_v0, %v11267_v53 }
 0x230   : > { %v918_v60 = vpop.f32.mrb[7].mxu1  ;;  %v11291_v1 = vadd.f32 %v9184_v20, %v11245_v48 }
 0x231   : > { %v11277_v61 = vadd.f32 %v11245_v48, %v918_v60 }
 0x232   : > { %1068 = vrot.lane.b32.xlu1 %v11274_v57, %s10896_s29 }
 0x233   : > { %1076 = vrot.lane.b32.xlu0 %v11277_v61, %s10896_s29  ;;  %v11348_v10 = vpack.i.bf16 %v11291_v1, %v11277_v61 }
 0x236   : > { %1074 = vrot.lane.b32.xlu1 %v11284_v0, %s10896_s29 }
 0x237   : > { %1084 = vrot.lane.b32.xlu0 %v11274_v57, %s10897_s30 }
 0x23a   : > { %1078 = vrot.lane.b32.xlu1 %v11291_v1, %s10896_s29 }
 0x23b   : > { %1088 = vrot.lane.b32.xlu0 %v11267_v53, %s10897_s30 }
 0x23f   : > { %1096 = vrot.lane.b32.xlu0 %v11251_v51, %s10898_s16 }
 0x243   : > { %1092 = vrot.lane.b32.xlu0 %v11277_v61, %s10897_s30 }
 0x247   : > { %1100 = vrot.lane.b32.xlu0 %v11274_v57, %s10898_s16 }
 0x24b   : > { %1104 = vrot.lane.b32.xlu0 %v11267_v53, %s10898_s16 }
 0x24f   : > { %10140 = vrot.lane.b32.xlu0 %v11307_v4, %s10899_s17 }
 0x253   : > { %1110 = vrot.lane.b32.xlu0 %v11291_v1, %s10898_s16 }
 0x257   : > { %10150 = vrot.lane.b32.xlu0 %v11319_v6, %s10899_s17 }
 0x25e   : > { %737 = vadd.xlane.f32.xlu1 %v736_v7 }
 0x26f   : > { %1086 = vrot.lane.b32.xlu1 %v11264_v49, %s10897_s30 }
 0x273   : > { %1090 = vrot.lane.b32.xlu1 %v11284_v0, %s10897_s30 }
 0x277   : > { %1094 = vrot.lane.b32.xlu1 %v11291_v1, %s10897_s30 }
 0x27b   : > { %1098 = vrot.lane.b32.xlu1 %v11248_v46, %s10898_s16 }
 0x27f   : > { %1102 = vrot.lane.b32.xlu1 %v11264_v49, %s10898_s16 }
 0x283   : > { %1106 = vrot.lane.b32.xlu1 %v11284_v0, %s10898_s16 }
 0x287   : > { %1108 = vrot.lane.b32.xlu1 %v11277_v61, %s10898_s16 }
 0x28b   : > { %10145 = vrot.lane.b32.xlu1 %v11342_v12, %s10899_s17 }
 0x28f   : > { %10155 = vrot.lane.b32.xlu1 %v11348_v10, %s10899_s17 }
 0x298   : > { %v11352_v21 = vpop.permute.xlu1 %1066 }
 0x299   : > { %v11354_v13 = vpop.permute.xlu0 %1064 }
 0x29a   : > { %v11358_v14 = vpack.i.bf16 %v11352_v21, %v11354_v13 }
 0x29c   : > { %v11360_v15 = vpop.permute.xlu1 %1082  ;;  %10160 = vrot.lane.b32.xlu0 %v11358_v14, %s10899_s17 }
 0x29d   : > { %v11364_v16 = vpop.permute.xlu0 %1080 }
 0x29e   : > { %v11396_v27 = vpack.i.bf16 %v11360_v15, %v11364_v16 }
 0x2a0   : > { %v11366_v17 = vpop.permute.xlu1 %1070 }
 0x2a1   : > { %v11368_v18 = vpop.permute.xlu0 %1072 }
 0x2a4   : > { %v11370_v19 = vpop.permute.xlu1 %1068 }
 0x2a5   : > { %v11372_v58 = vpop.permute.xlu0 %1076  ;;  %v11376_v59 = vpack.i.bf16 %v11366_v17, %v11370_v19 }
 0x2a7   : > { %10165 = vrot.lane.b32.xlu1 %v11376_v59, %s10899_s17 }
 0x2a8   : > { %v11380_v22 = vpop.permute.xlu1 %1074 }
 0x2a9   : > { %v11382_v29 = vpop.permute.xlu0 %1084  ;;  %v11386_v23 = vpack.i.bf16 %v11380_v22, %v11368_v18 }
 0x2ab   : > { %10170 = vrot.lane.b32.xlu0 %v11386_v23, %s10899_s17 }
 0x2ac   : > { %v11390_v24 = vpop.permute.xlu1 %1078 }
 0x2ad   : > { %v11392_v26 = vpop.permute.xlu0 %1088  ;;  %v11400_v30 = vpack.i.bf16 %v11390_v24, %v11372_v58 }
 0x2af   : > { %10180 = vrot.lane.b32.xlu0 %v11396_v27, %s10899_s17  ;;  %10175 = vrot.lane.b32.xlu1 %v11400_v30, %s10899_s17 }
 0x2b1   : > { %v11406_v31 = vpop.permute.xlu0 %1096 }
 0x2b5   : > { %v11408_v32 = vpop.permute.xlu0 %1092 }
 0x2b9   : > { %v11410_v33 = vpop.permute.xlu0 %1100 }
 0x2bd   : > { %v11412_v55 = vpop.permute.xlu0 %1104 }
 0x2c1   : > { %v10141_v34 = vpop.permute.xlu0 %10140 }
 0x2c2   : > { %v10143_v62 = vunpack.i.h.bf16 %v10141_v34  ;;  %v10142_v63 = vunpack.i.l.bf16 %v10141_v34 }
 0x2c4   : > { %v9753_v28 = vpack.c.bf16 %v10143_v62, %v10142_v63 }
 0x2c5   : > { %v11420_v35 = vpop.permute.xlu0 %1110 }
 0x2c6   : > { %13810 = vst [vmem:[#allocation2_spill] sm:$0xff] %v11420_v35  ;;  %9755 = vmatprep.subr.msk.bf16.mxu0 %vm11416_vm2, %v9753_v28 }
 0x2c7   : > { %9758 = vmatpush3.bf16.xpose.msk.msra.mxu0 %vm11416_vm2, %v9753_v28 }
 0x2c8   : > { %v9195_v39 = vpop.f32.mrb[8].mxu1 }
 0x2c9   : > { %v10151_v8 = vpop.permute.xlu0 %10150  ;;  %v1023_v38 = vadd.f32 %v9195_v39, %v11245_v48  ;;  %v1017_v40 = vpop.f32.mrb[9].mxu1 }
 0x2ca   : > { %v10153_v36 = vunpack.i.h.bf16 %v10151_v8  ;;  %v10152_v37 = vunpack.i.l.bf16 %v10151_v8  ;;  %v1018_v25 = vadd.f32 %v11245_v48, %v1017_v40 }
 0x2cc   : > { %v9765_v41 = vpack.c.bf16 %v10153_v36, %v10152_v37  ;;  %v9198_v43 = vpop.f32.mrb[10].mxu1  ;;  %v11428_v44 = vpack.i.bf16 %v1023_v38, %v1018_v25 }
 0x2cd   : > { %v1033_v45 = vadd.f32 %v9198_v43, %v11245_v48  ;;  %v1027_v50 = vpop.f32.mrb[11].mxu1 }
 0x2ce   : > { %13811 = vst [vmem:[#allocation3_spill] sm:$0xff] %v11428_v44  ;;  %9210 = vmatmul.mubr.msk.f32.vlgmr.msra.gmra.mrb[0].mxu0 %vm1204_vm1, %v11248_v46  ;;  %9767 = vmatprep.subr.msk.bf16.mxu0 %vm11416_vm2, %v9765_v41  ;;  %v1028_v2 = vadd.f32 %v11245_v48, %v1027_v50 }
 0x2cf   : > { %9770 = vmatpush3.bf16.xpose.msk.msra.mxu0 %vm11416_vm2, %v9765_v41  ;;  %9223 = vmatprep.mubr.msk.f32.mxu0 %vm1204_vm1, %v11267_v53 }
 0x2d0   : > { %v9201_v11 = vpop.f32.mrb[12].mxu1  ;;  %v11440_v52 = vpack.i.bf16 %v1033_v45, %v1028_v2 }
 0x2d1   : > { %v1043_v3 = vadd.f32 %v9201_v11, %v11245_v48  ;;  %v1037_v20 = vpop.f32.mrb[13].mxu1 }
 0x2d2   : > { %13812 = vst [vmem:[#allocation4_spill] sm:$0xff] %v11440_v52  ;;  %v1038_v60 = vadd.f32 %v11245_v48, %v1037_v20 }
 0x2d4   : > { %v11444_v5 = vpack.i.bf16 %v1043_v3, %v1038_v60 }
 0x2d6   : > { %13813 = vst [vmem:[#allocation5_spill] sm:$0xff] %v11444_v5  ;;  %9224 = vmatmul.mubr.msk.f32.vlgmr.msra.gmra.mrb[2].mxu0 %vm1204_vm1, %v11284_v0 }
 0x2d7   : > { %9237 = vmatprep.mubr.msk.f32.mxu0 %vm1204_vm1, %v11354_v13 }
 0x2eb   : > { %v738_v56 = vpop.xlane.xlu1 %737 }
 0x2ec   : > { %v746_v7 = vmul.f32 0.03125, %v738_v56 }
 0x2ee   : > { %v754_v34 = vadd.f32 1e-05, %v746_v7 }
 0x2ef   : > { %v11450_v62 = vpop.permute.xlu1 %1086 }
 0x2f0   : > { %10549 = vrsqrt.f32 %v754_v34  ;;  %v11454_v63 = vpack.i.bf16 %v11450_v62, %v11382_v29 }
 0x2f2   : > { %10185 = vrot.lane.b32.xlu1 %v11454_v63, %s10899_s17 }
 0x2f3   : > { %v11458_v28 = vpop.permute.xlu1 %1090 }
 0x2f4   : > { %v11462_v8 = vpack.i.bf16 %v11458_v28, %v11392_v26 }
 0x2f6   : > { %10190 = vrot.lane.b32.xlu0 %v11462_v8, %s10899_s17 }
 0x2f7   : > { %v11466_v39 = vpop.permute.xlu1 %1094 }
 0x2f8   : > { %v11470_v36 = vpack.i.bf16 %v11466_v39, %v11408_v32 }
 0x2fa   : > { %13814 = vst [vmem:[#allocation6_spill] sm:$0xff] %v11470_v36  ;;  %v10550_v37 = vpop.eup %10549  ;;  %10195 = vrot.lane.b32.xlu1 %v11470_v36, %s10899_s17 }
 0x2fb   : > { %v11474_v38 = vpop.permute.xlu1 %1098  ;;  %v770_v40 = vmul.f32 %v10550_v37, %v11313_v54 }
 0x2fc   : > { %v11479_v25 = vpack.i.bf16 %v11474_v38, %v11406_v31 }
 0x2fd   : > { %v778_v41 = vmul.f32 %v11128_v42, %v770_v40 }
 0x2fe   : > { %13815 = vst [vmem:[#allocation7_spill] sm:$0xff] %v11479_v25  ;;  %10200 = vrot.lane.b32.xlu0 %v11479_v25, %s10899_s17 }
 0x2ff   : > { %v11484_v43 = vpop.permute.xlu1 %1102  ;;  %v786_v45 = vadd.f32 %v11134_v47, %v778_v41 }
 0x300   : > { %v11489_v50 = vpack.i.bf16 %v11484_v43, %v11410_v33 }
 0x301   : > { %9203 = vmatmul.mubr.msk.f32.gmra.mrb[14].mxu1 %vm533_vm0, %v786_v45 }
 0x302   : > { %13816 = vst [vmem:[#allocation8_spill] sm:$0xff] %v11489_v50  ;;  %9216 = vmatprep.mubr.msk.f32.mxu1 %vm1204_vm1, %v11274_v57  ;;  %10205 = vrot.lane.b32.xlu1 %v11489_v50, %s10899_s17 }
 0x303   : > { %v11496_v42 = vpop.permute.xlu1 %1106 }
 0x304   : > { %v11500_v54 = vpack.i.bf16 %v11496_v42, %v11412_v55 }
 0x306   : > { %13817 = vst [vmem:[#allocation9_spill] sm:$0xff] %v11500_v54  ;;  %10210 = vrot.lane.b32.xlu0 %v11500_v54, %s10899_s17 }
 0x307   : > { %v11504_v47 = vpop.permute.xlu1 %1108 }
 0x308   : > { %v11508_v2 = vpack.i.bf16 %v11420_v35, %v11504_v47 }
 0x30a   : > { %13818 = vst [vmem:[#allocation10_spill] sm:$0xff] %v11508_v2  ;;  %10220 = vrot.lane.b32.xlu0 %v11428_v44, %s10896_s29  ;;  %10215 = vrot.lane.b32.xlu1 %v11508_v2, %s10899_s17 }
 0x30b   : > { %v10146_v11 = vpop.permute.xlu1 %10145 }
 0x30c   : > { %v10148_v3 = vunpack.i.h.bf16 %v10146_v11  ;;  %v10147_v20 = vunpack.i.l.bf16 %v10146_v11 }
 0x30e   : > { %v9759_v60 = vpack.c.bf16 %v10148_v3, %v10147_v20  ;;  %10230 = vrot.lane.b32.xlu0 %v11428_v44, %s10897_s30  ;;  %10225 = vrot.lane.b32.xlu1 %v11444_v5, %s10896_s29  ;;  %v10161_v56 = vpop.permute.xlu0 %10160 }
 0x30f   : > { %v10163_v7 = vunpack.i.h.bf16 %v10161_v56  ;;  %v10162_v34 = vunpack.i.l.bf16 %v10161_v56  ;;  %v10156_v37 = vpop.permute.xlu1 %10155 }
 0x310   : > { %v10158_v40 = vunpack.i.h.bf16 %v10156_v37  ;;  %v10157_v41 = vunpack.i.l.bf16 %v10156_v37  ;;  %9761 = vmatprep.subr.msk.bf16.mxu1 %vm11416_vm2, %v9759_v60 }
 0x311   : > { %v9777_v45 = vpack.c.bf16 %v10163_v7, %v10162_v34  ;;  %9764 = vmatpush3.bf16.xpose.msk.msra.mxu1 %vm11416_vm2, %v9759_v60 }
 0x312   : > { %v9771_v11 = vpack.c.bf16 %v10158_v40, %v10157_v41  ;;  %10240 = vrot.lane.b32.xlu0 %v11428_v44, %s10898_s16  ;;  %10235 = vrot.lane.b32.xlu1 %v11444_v5, %s10897_s30 }
 0x313   : > { %9779 = vmatprep.subr.msk.bf16.mxu0 %vm11416_vm2, %v9777_v45 }
 0x314   : > { %9773 = vmatprep.subr.msk.bf16.mxu1 %vm11416_vm2, %v9771_v11  ;;  %9782 = vmatpush3.bf16.xpose.msk.msra.mxu0 %vm11416_vm2, %v9777_v45 }
 0x316   : > { %10250 = vrot.lane.b32.xlu0 %v11428_v44, %s10899_s17  ;;  %10245 = vrot.lane.b32.xlu1 %v11444_v5, %s10898_s16 }
 0x318   : > { %9217 = vmatmul.mubr.msk.f32.vlgmr.msra.gmra.mrb[16].mxu1 %vm1204_vm1, %v11264_v49 }
 0x319   : > { %v10166_v3 = vpop.permute.xlu1 %10165  ;;  %9776 = vmatpush3.bf16.xpose.msk.msra.mxu1 %vm11416_vm2, %v9771_v11  ;;  %9230 = vmatprep.mubr.msk.f32.mxu1 %vm1204_vm1, %v11277_v61 }
 0x31a   : > { %v10168_v20 = vunpack.i.h.bf16 %v10166_v3  ;;  %v10167_v60 = vunpack.i.l.bf16 %v10166_v3  ;;  %10260 = vrot.lane.b32.xlu0 %v11440_v52, %s10896_s29  ;;  %10255 = vrot.lane.b32.xlu1 %v11444_v5, %s10899_s17 }
 0x31b   : > { %9238 = vmatmul.mubr.msk.f32.vlgmr.msra.gmra.mrb[4].mxu0 %vm1204_vm1, %v11352_v21 }
 0x31c   : > { %v9783_v56 = vpack.c.bf16 %v10168_v20, %v10167_v60  ;;  %9251 = vmatprep.mubr.msk.f32.mxu0 %vm1204_vm1, %v11368_v18 }
 0x31d   : > { %v10171_v7 = vpop.permute.xlu0 %10170 }
 0x31e   : > { %v10173_v34 = vunpack.i.h.bf16 %v10171_v7  ;;  %v10172_v37 = vunpack.i.l.bf16 %v10171_v7  ;;  %9785 = vmatprep.subr.msk.bf16.mxu1 %vm11416_vm2, %v9783_v56  ;;  %10270 = vrot.lane.b32.xlu0 %v11440_v52, %s10897_s30 }
 0x320   : > { %v9789_v40 = vpack.c.bf16 %v10173_v34, %v10172_v37  ;;  %9231 = vmatmul.mubr.msk.f32.vlgmr.msra.gmra.mrb[18].mxu1 %vm1204_vm1, %v11291_v1 }
 0x321   : > { %9788 = vmatpush3.bf16.xpose.msk.msra.mxu1 %vm11416_vm2, %v9783_v56  ;;  %9244 = vmatprep.mubr.msk.f32.mxu1 %vm1204_vm1, %v11370_v19  ;;  %v10176_v41 = vpop.permute.xlu1 %10175  ;;  %v10181_v45 = vpop.permute.xlu0 %10180 }
 0x322   : > { %v10178_v11 = vunpack.i.h.bf16 %v10176_v41  ;;  %v10177_v3 = vunpack.i.l.bf16 %v10176_v41  ;;  %v10183_v20 = vunpack.i.h.bf16 %v10181_v45  ;;  %v10182_v60 = vunpack.i.l.bf16 %v10181_v45  ;;  %10280 = vrot.lane.b32.xlu0 %v11440_v52, %s10898_s16  ;;  %9791 = vmatprep.subr.msk.bf16.mxu0 %vm11416_vm2, %v9789_v40 }
 0x323   : > { %9794 = vmatpush3.bf16.xpose.msk.msra.mxu0 %vm11416_vm2, %v9789_v40 }
 0x324   : > { %v9795_v7 = vpack.c.bf16 %v10178_v11, %v10177_v3  ;;  %v9801_v56 = vpack.c.bf16 %v10183_v20, %v10182_v60 }
 0x326   : > { %9797 = vmatprep.subr.msk.bf16.mxu1 %vm11416_vm2, %v9795_v7  ;;  %9803 = vmatprep.subr.msk.bf16.mxu0 %vm11416_vm2, %v9801_v56 }
 0x328   : > { %9245 = vmatmul.mubr.msk.f32.vlgmr.msra.gmra.mrb[20].mxu1 %vm1204_vm1, %v11366_v17 }
 0x329   : > { %9800 = vmatpush3.bf16.xpose.msk.msra.mxu1 %vm11416_vm2, %v9795_v7  ;;  %9258 = vmatprep.mubr.msk.f32.mxu1 %vm1204_vm1, %v11372_v58 }
 0x32a   : > { %9252 = vmatmul.mubr.msk.f32.vlgmr.msra.gmra.mrb[6].mxu0 %vm1204_vm1, %v11380_v22 }
 0x32b   : > { %9806 = vmatpush3.bf16.xpose.msk.msra.mxu0 %vm11416_vm2, %v9801_v56  ;;  %9265 = vmatprep.mubr.msk.f32.mxu0 %vm1204_vm1, %v11364_v16 }
 0x330   : > { %9259 = vmatmul.mubr.msk.f32.vlgmr.msra.gmra.mrb[22].mxu1 %vm1204_vm1, %v11390_v24 }
 0x331   : > { %9272 = vmatprep.mubr.msk.f32.mxu1 %vm1204_vm1, %v11382_v29 }
 0x332   : > { %9266 = vmatmul.mubr.msk.f32.vlgmr.msra.gmra.mrb[8].mxu0 %vm1204_vm1, %v11360_v15 }
 0x333   : > { %9279 = vmatprep.mubr.msk.f32.mxu0 %vm1204_vm1, %v11392_v26 }
 0x364   : > { %v10186_v34 = vpop.permute.xlu1 %10185 }
 0x365   : > { %v10188_v37 = vunpack.i.h.bf16 %v10186_v34  ;;  %v10187_v40 = vunpack.i.l.bf16 %v10186_v34 }
 0x367   : > { %v9807_v41 = vpack.c.bf16 %v10188_v37, %v10187_v40 }
 0x368   : > { %v10191_v45 = vpop.permute.xlu0 %10190 }
 0x369   : > { %v10193_v11 = vunpack.i.h.bf16 %v10191_v45  ;;  %v10192_v3 = vunpack.i.l.bf16 %v10191_v45  ;;  %9809 = vmatprep.subr.msk.bf16.mxu1 %vm11416_vm2, %v9807_v41 }
 0x36a   : > { %9812 = vmatpush3.bf16.xpose.msk.msra.mxu1 %vm11416_vm2, %v9807_v41 }
 0x36b   : > { %v9813_v20 = vpack.c.bf16 %v10193_v11, %v10192_v3 }
 0x36c   : > { %v10196_v60 = vpop.permute.xlu1 %10195 }
 0x36d   : > { %v10198_v7 = vunpack.i.h.bf16 %v10196_v60  ;;  %v10197_v56 = vunpack.i.l.bf16 %v10196_v60  ;;  %9815 = vmatprep.subr.msk.bf16.mxu0 %vm11416_vm2, %v9813_v20 }
 0x36e   : > { %9818 = vmatpush3.bf16.xpose.msk.msra.mxu0 %vm11416_vm2, %v9813_v20 }
 0x36f   : > { %v9819_v34 = vpack.c.bf16 %v10198_v7, %v10197_v56 }
 0x370   : > { %v10201_v37 = vpop.permute.xlu0 %10200 }
 0x371   : > { %v10203_v40 = vunpack.i.h.bf16 %v10201_v37  ;;  %v10202_v45 = vunpack.i.l.bf16 %v10201_v37  ;;  %9273 = vmatmul.mubr.msk.f32.vlgmr.msra.gmra.mrb[24].mxu1 %vm1204_vm1, %v11450_v62  ;;  %9821 = vmatprep.subr.msk.bf16.mxu1 %vm11416_vm2, %v9819_v34 }
 0x372   : > { %9824 = vmatpush3.bf16.xpose.msk.msra.mxu1 %vm11416_vm2, %v9819_v34  ;;  %9286 = vmatprep.mubr.msk.f32.mxu1 %vm1204_vm1, %v11408_v32 }
 0x373   : > { %v9825_v41 = vpack.c.bf16 %v10203_v40, %v10202_v45 }
 0x374   : > { %v10206_v11 = vpop.permute.xlu1 %10205 }
 0x375   : > { %v10208_v3 = vunpack.i.h.bf16 %v10206_v11  ;;  %v10207_v20 = vunpack.i.l.bf16 %v10206_v11  ;;  %9280 = vmatmul.mubr.msk.f32.vlgmr.msra.gmra.mrb[10].mxu0 %vm1204_vm1, %v11458_v28  ;;  %9827 = vmatprep.subr.msk.bf16.mxu0 %vm11416_vm2, %v9825_v41 }
 0x376   : > { %9830 = vmatpush3.bf16.xpose.msk.msra.mxu0 %vm11416_vm2, %v9825_v41  ;;  %9293 = vmatprep.mubr.msk.f32.mxu0 %vm1204_vm1, %v11406_v31 }
 0x377   : > { %v9831_v60 = vpack.c.bf16 %v10208_v3, %v10207_v20 }
 0x378   : > { %v10211_v7 = vpop.permute.xlu0 %10210 }
 0x379   : > { %v10213_v56 = vunpack.i.h.bf16 %v10211_v7  ;;  %v10212_v34 = vunpack.i.l.bf16 %v10211_v7  ;;  %9287 = vmatmul.mubr.msk.f32.vlgmr.msra.gmra.mrb[26].mxu1 %vm1204_vm1, %v11466_v39  ;;  %9833 = vmatprep.subr.msk.bf16.mxu1 %vm11416_vm2, %v9831_v60 }
 0x37a   : > { %9836 = vmatpush3.bf16.xpose.msk.msra.mxu1 %vm11416_vm2, %v9831_v60  ;;  %9300 = vmatprep.mubr.msk.f32.mxu1 %vm1204_vm1, %v11410_v33 }
 0x37b   : > { %v9837_v37 = vpack.c.bf16 %v10213_v56, %v10212_v34 }
 0x37c   : > { %v10216_v40 = vpop.permute.xlu1 %10215  ;;  %v11622_v45 = vpop.permute.xlu0 %10220 }
 0x37d   : > { %13819 = vst [vmem:[#allocation11_spill] sm:$0xff] %v11622_v45  ;;  %v10218_v41 = vunpack.i.h.bf16 %v10216_v40  ;;  %v10217_v11 = vunpack.i.l.bf16 %v10216_v40  ;;  %9294 = vmatmul.mubr.msk.f32.vlgmr.msra.gmra.mrb[12].mxu0 %vm1204_vm1, %v11474_v38  ;;  %9839 = vmatprep.subr.msk.bf16.mxu0 %vm11416_vm2, %v9837_v37 }
 0x37e   : > { %9842 = vmatpush3.bf16.xpose.msk.msra.mxu0 %vm11416_vm2, %v9837_v37  ;;  %9307 = vmatprep.mubr.msk.f32.mxu0 %vm1204_vm1, %v11412_v55 }
 0x37f   : > { %v9843_v3 = vpack.c.bf16 %v10218_v41, %v10217_v11 }
 0x380   : > { %v11632_v20 = vpop.permute.xlu1 %10225  ;;  %v11634_v60 = vpop.permute.xlu0 %10230 }
 0x381   : > { %13820 = vst [vmem:[#allocation12_spill] sm:$0xff] %v11632_v20  ;;  %13821 = vst [vmem:[#allocation13_spill] sm:$0xff] %v11634_v60  ;;  %9301 = vmatmul.mubr.msk.f32.vlgmr.msra.gmra.mrb[28].mxu1 %vm1204_vm1, %v11484_v43  ;;  %9845 = vmatprep.subr.msk.bf16.mxu1 %vm11416_vm2, %v9843_v3 }
 0x382   : > { %9848 = vmatpush3.bf16.xpose.msk.msra.mxu1 %vm11416_vm2, %v9843_v3  ;;  %9314 = vmatprep.mubr.msk.f32.mxu1 %vm1204_vm1, %v11504_v47 }
 0x384   : > { %v11644_v7 = vpop.permute.xlu1 %10235  ;;  %v11646_v56 = vpop.permute.xlu0 %10240 }
 0x385   : > { %13822 = vst [vmem:[#allocation14_spill] sm:$0xff] %v11644_v7  ;;  %13823 = vst [vmem:[#allocation15_spill] sm:$0xff] %v11646_v56  ;;  %9308 = vmatmul.mubr.msk.f32.vlgmr.msra.gmra.mrb[14].mxu0 %vm1204_vm1, %v11496_v42 }
 0x386   : > { %9321 = vmatprep.mubr.msk.f32.mxu0 %vm1204_vm1, %v11251_v51 }
 0x388   : > { %v11652_v34 = vpop.permute.xlu1 %10245  ;;  %v10251_v37 = vpop.permute.xlu0 %10250 }
 0x389   : > { %13824 = vst [vmem:[#allocation16_spill] sm:$0xff] %v11652_v34  ;;  %v10253_v40 = vunpack.i.h.bf16 %v10251_v37  ;;  %v10252_v41 = vunpack.i.l.bf16 %v10251_v37  ;;  %9315 = vmatmul.mubr.msk.f32.vlgmr.msra.gmra.mrb[30].mxu1 %vm1204_vm1, %v11420_v35 }
 0x38a   : > { %9328 = vmatprep.mubr.msk.f32.mxu1 %vm1204_vm1, %v11274_v57 }
 0x38b   : > { %v9849_v11 = vpack.c.bf16 %v10253_v40, %v10252_v41 }
 0x38c   : > { %v10256_v3 = vpop.permute.xlu1 %10255  ;;  %v11658_v5 = vpop.permute.xlu0 %10260 }
 0x38d   : > { %13825 = vst [vmem:[#allocation17_spill] sm:$0xff] %v11658_v5  ;;  %v10258_v2 = vunpack.i.h.bf16 %v10256_v3  ;;  %v10257_v44 = vunpack.i.l.bf16 %v10256_v3  ;;  %9851 = vmatprep.subr.msk.bf16.mxu0 %vm11416_vm2, %v9849_v11 }
 0x38e   : > { %9854 = vmatpush3.bf16.xpose.msk.msra.mxu0 %vm11416_vm2, %v9849_v11 }
 0x38f   : > { %v9861_v51 = vpack.c.bf16 %v10258_v2, %v10257_v44 }
 0x390   : > { %v11664_v37 = vpop.permute.xlu0 %10270 }
 0x391   : > { %13826 = vst [vmem:[#allocation18_spill] sm:$0xff] %v11664_v37  ;;  %9863 = vmatprep.subr.msk.bf16.mxu0 %vm11416_vm2, %v9861_v51 }
 0x394   : > { %v11668_v36 = vpop.permute.xlu0 %10280 }
 0x395   : > { %13827 = vst [vmem:[#allocation19_spill] sm:$0xff] %v11668_v36  ;;  %9322 = vmatmul.mubr.msk.f32.vlgmr.msra.gmra.mrb[16].mxu0 %vm1204_vm1, %v11248_v46 }
 0x396   : > { %9866 = vmatpush3.bf16.xpose.msk.msra.mxu0 %vm11416_vm2, %v9861_v51  ;;  %9335 = vmatprep.mubr.msk.f32.mxu0 %vm1204_vm1, %v11267_v53  ;;  %v1168_v51 = vld [vmem:[%s13756_s8] sm:$0xff] }
 0x39d   : > { %9336 = vmatmul.mubr.msk.f32.vlgmr.msra.gmra.mrb[18].mxu0 %vm1204_vm1, %v11284_v0 }
 0x39e   : > { %9349 = vmatprep.mubr.msk.f32.mxu0 %vm1204_vm1, %v11354_v13 }
 0x3a1   : > { %v11680_v57 = vpop.f32.mrb[0].mxu0 }
 0x3a2   : > { %v1279_v44 = vpop.f32.mrb[1].mxu0 }
 0x3a9   : > { %v11682_v2 = vpop.f32.mrb[2].mxu0 }
 0x3aa   : > { %v11684_v40 = vpop.f32.mrb[3].mxu0 }
 0x3d4   : > { %v9204_v46 = vpop.f32.mrb[14].mxu1 }
 0x3d5   : > { %v1053_v41 = vadd.f32 %v9204_v46, %v11245_v48  ;;  %v1047_v11 = vpop.f32.mrb[15].mxu1  ;;  %v11761_v46 = vadd.f32 %v1279_v44, %v1168_v51  ;;  %v1174_v51 = vld [vmem:[%s13756_s8 + $0x30] sm:$0xff] }
 0x3d6   : > { %v1048_v3 = vadd.f32 %v11245_v48, %v1047_v11 }
 0x3d8   : > { %v11688_v53 = vpack.i.bf16 %v1053_v41, %v1048_v3  ;;  %v1171_v41 = vld [vmem:[%s13756_s8 + $0x18] sm:$0xff]  ;;  %v3922_v3 = vsel %vm3921_vm3, %v11761_v46, -inf }
 0x3da   : > { %13828 = vst [vmem:[#allocation20_spill] sm:$0xff] %v11688_v53  ;;  %10285 = vrot.lane.b32.xlu0 %v11688_v53, %s10898_s16  ;;  %10265 = vrot.lane.b32.xlu1 %v11688_v53, %s10896_s29  ;;  %s10902_s29 = smov 16  }
 0x3de   : > { %10290 = vrot.lane.b32.xlu0 %v11440_v52, %s10899_s17  ;;  %10275 = vrot.lane.b32.xlu1 %v11688_v53, %s10897_s30  ;;  %s10903_s30 = smov 24  }
 0x3e2   : > { %10300 = vrot.lane.b32.xlu0 %v11307_v4, %s10900_s19  ;;  %10295 = vrot.lane.b32.xlu1 %v11688_v53, %s10899_s17 }
 0x3e6   : > { %10315 = vrot.lane.b32.xlu0 %v11348_v10, %s10900_s19  ;;  %10305 = vrot.lane.b32.xlu1 %v11342_v12, %s10900_s19 }
 0x3ea   : > { %10320 = vrot.lane.b32.xlu0 %v11358_v14, %s10900_s19  ;;  %10310 = vrot.lane.b32.xlu1 %v11319_v6, %s10900_s19 }
 0x3eb   : > { %v9218_v48 = vpop.f32.mrb[16].mxu1 }
 0x3ec   : > { %v11710_v0 = vpop.f32.mrb[17].mxu1  ;;  %v11766_v11 = vadd.f32 %v9218_v48, %v1171_v41 }
 0x3ee   : > { %10335 = vrot.lane.b32.xlu0 %v11396_v27, %s10900_s19  ;;  %10325 = vrot.lane.b32.xlu1 %v11376_v59, %s10900_s19  ;;  %v11716_v4 = vpop.f32.mrb[4].mxu0  ;;  %13829 = vst [vmem:[#allocation21_spill] sm:$0xff] %v11766_v11  ;;  %v3931_v44 = vsel %vm3921_vm3, %v11766_v11, -inf }
 0x3ef   : > { %v11718_v10 = vpop.f32.mrb[5].mxu0 }
 0x3f2   : > { %10340 = vrot.lane.b32.xlu0 %v11454_v63, %s10900_s19  ;;  %10330 = vrot.lane.b32.xlu1 %v11386_v23, %s10900_s19 }
 0x3f3   : > { %v9232_v6 = vpop.f32.mrb[18].mxu1 }
 0x3f4   : > { %v1540_v12 = vpop.f32.mrb[19].mxu1 }
 0x3f5   : > { %v11780_v48 = vadd.f32 %v1540_v12, %v1174_v51 }
 0x3f6   : > { %10345 = vrot.lane.b32.xlu0 %v11462_v8, %s10900_s19  ;;  %10380 = vrot.lane.b32.xlu1 %v11668_v36, %s10899_s17  ;;  %v1175_v36 = vld [vmem:[%s13756_s8 + $0x38] sm:$0xff] }
 0x3fa   : > { %10350 = vrot.lane.b32.xlu0 %v11400_v30, %s10900_s19  ;;  %10385 = vrot.lane.b32.xlu1 %v11632_v20, %s10899_s17 }
 0x3fb   : > { %v9246_v13 = vpop.f32.mrb[20].mxu1 }
 0x3fc   : > { %v1714_v14 = vpop.f32.mrb[21].mxu1 }
 0x3fd   : > { %v11732_v59 = vpop.f32.mrb[6].mxu0 }
 0x3fe   : > { %10390 = vrot.lane.b32.xlu1 %v11644_v7, %s10899_s17  ;;  %10355 = vrot.lane.b32.xlu0 %v11622_v45, %s10899_s17  ;;  %v11738_v23 = vpop.f32.mrb[7].mxu0 }
 0x402   : > { %10395 = vrot.lane.b32.xlu1 %v11652_v34, %s10899_s17  ;;  %10360 = vrot.lane.b32.xlu0 %v11634_v60, %s10899_s17  ;;  %v1193_v60 = vld [vmem:[%s13756_s8 + $0xc8] sm:$0xff] }
 0x403   : > { %v11744_v27 = vpop.f32.mrb[22].mxu1 }
 0x404   : > { %v11746_v30 = vpop.f32.mrb[23].mxu1 }
 0x405   : > { %v11748_v63 = vpop.f32.mrb[8].mxu0 }
 0x406   : > { %10365 = vrot.lane.b32.xlu0 %v11646_v56, %s10899_s17  ;;  %v11752_v8 = vpop.f32.mrb[9].mxu0 }
 0x40a   : > { %10370 = vrot.lane.b32.xlu0 %v11658_v5, %s10899_s17  ;;  %v1179_v5 = vld [vmem:[%s13756_s8 + $0x58] sm:$0xff] }
 0x40e   : > { %10375 = vrot.lane.b32.xlu0 %v11664_v37, %s10899_s17  ;;  %v11773_v37 = vadd.f32 %v9232_v6, %v1175_v36  ;;  %v11787_v36 = vadd.f32 %v9246_v13, %v1179_v5  ;;  %v3940_v6 = vsel %vm3921_vm3, %v11780_v48, -inf  ;;  %v1186_v5 = vld [vmem:[%s13756_s8 + $0x90] sm:$0xff] }
 0x410   : > { %13830 = vst [vmem:[#allocation22_spill] sm:$0xff] %v11773_v37  ;;  %v3943_v41 = vsel %vm3921_vm3, %v11773_v37, -inf }
 0x426   : > { %3923 = vmax.xlane.f32.xlu1 %v3922_v3  ;;  %v1178_v3 = vld [vmem:[%s13756_s8 + $0x50] sm:$0xff] }
 0x427   : > { %v11794_v12 = vadd.f32 %v1714_v14, %v1178_v3 }
 0x429   : > { %v3952_v51 = vsel %vm3921_vm3, %v11794_v12, -inf }
 0x42a   : > { %3932 = vmax.xlane.f32.xlu1 %v3931_v44  ;;  %v3955_v44 = vsel %vm3921_vm3, %v11787_v36, -inf }
 0x42e   : > { %3944 = vmax.xlane.f32.xlu1 %v3943_v41 }
 0x432   : > { %3941 = vmax.xlane.f32.xlu1 %v3940_v6 }
 0x436   : > { %3956 = vmax.xlane.f32.xlu1 %v3955_v44  ;;  %v1191_v44 = vld [vmem:[%s13756_s8 + $0xb8] sm:$0xff] }
 0x43a   : > { %3953 = vmax.xlane.f32.xlu1 %v3952_v51 }
 0x444   : > { %v11803_v13 = vpop.f32.mrb[24].mxu1 }
 0x445   : > { %v2062_v41 = vpop.f32.mrb[25].mxu1 }
 0x446   : > { %v11805_v53 = vadd.f32 %v2062_v41, %v1186_v5  ;;  %v1190_v5 = vld [vmem:[%s13756_s8 + $0xb0] sm:$0xff] }
 0x448   : > { %13831 = vst [vmem:[#allocation23_spill] sm:$0xff] %v11805_v53  ;;  %v11807_v6 = vpop.f32.mrb[10].mxu0  ;;  %v3976_v14 = vsel %vm3921_vm3, %v11805_v53, -inf }
 0x449   : > { %v11811_v3 = vpop.f32.mrb[11].mxu0  ;;  %3977 = vmax.xlane.f32.xlu1 %v3976_v14 }
 0x44c   : > { %v9288_v51 = vpop.f32.mrb[26].mxu1  ;;  %v11816_v52 = vpop.permute.xlu1 %10265 }
 0x44d   : > { %13832 = vst [vmem:[#allocation24_spill] sm:$0xff] %v11816_v52  ;;  %v11821_v41 = vadd.f32 %v9288_v51, %v1191_v44  ;;  %v11823_v20 = vpop.permute.xlu0 %10285  ;;  %v2236_v34 = vpop.f32.mrb[27].mxu1  ;;  %10400 = vrot.lane.b32.xlu0 %v11816_v52, %s10899_s17 }
 0x44e   : > { %13834 = vst [vmem:[#allocation26_spill] sm:$0xff] %v11823_v20  ;;  %v11825_v56 = vadd.f32 %v2236_v34, %v1190_v5 }
 0x44f   : > { %13833 = vst [vmem:[#allocation25_spill] sm:$0xff] %v11821_v41  ;;  %v3991_v14 = vsel %vm3921_vm3, %v11821_v41, -inf  ;;  %v1195_v41 = vld [vmem:[%s13756_s8 + $0xd8] sm:$0xff] }
 0x450   : > { %13835 = vst [vmem:[#allocation27_spill] sm:$0xff] %v11825_v56  ;;  %v11829_v7 = vpop.permute.xlu1 %10275  ;;  %v9295_v45 = vpop.f32.mrb[12].mxu0  ;;  %3992 = vmax.xlane.f32.xlu1 %v3991_v14  ;;  %v3988_v50 = vsel %vm3921_vm3, %v11825_v56, -inf }
 0x451   : > { %13836 = vst [vmem:[#allocation28_spill] sm:$0xff] %v11829_v7  ;;  %v10291_v54 = vpop.permute.xlu0 %10290  ;;  %v11836_v44 = vpop.f32.mrb[13].mxu0  ;;  %v11838_v5 = vadd.f32 %v9295_v45, %v1193_v60  ;;  %10405 = vrot.lane.b32.xlu0 %v11829_v7, %s10899_s17  ;;  %v1194_v60 = vld [vmem:[%s13756_s8 + $0xd0] sm:$0xff] }
 0x452   : > { %v10293_v51 = vunpack.i.h.bf16 %v10291_v54  ;;  %v10292_v34 = vunpack.i.l.bf16 %v10291_v54 }
 0x453   : > { %13837 = vst [vmem:[#allocation29_spill] sm:$0xff] %v11838_v5 }
 0x454   : > { %v9855_v25 = vpack.c.bf16 %v10293_v51, %v10292_v34  ;;  %v9302_v53 = vpop.f32.mrb[28].mxu1  ;;  %v10296_v14 = vpop.permute.xlu1 %10295  ;;  %3989 = vmax.xlane.f32.xlu1 %v3988_v50  ;;  %v3997_v50 = vsel %vm3921_vm3, %v11838_v5, -inf }
 0x455   : > { %v10298_v37 = vunpack.i.h.bf16 %v10296_v14  ;;  %v10297_v11 = vunpack.i.l.bf16 %v10296_v14  ;;  %v11845_v52 = vpop.permute.xlu0 %10300  ;;  %v2410_v35 = vpop.f32.mrb[29].mxu1  ;;  %v11851_v54 = vadd.f32 %v9302_v53, %v1195_v41  ;;  %10410 = vrot.lane.b32.xlu0 %v11823_v20, %s10899_s17 }
 0x456   : > { %9857 = vmatprep.subr.msk.bf16.mxu1 %vm11416_vm2, %v9855_v25 }
 0x457   : > { %13838 = vst [vmem:[#allocation30_spill] sm:$0xff] %v11851_v54  ;;  %v9867_v45 = vpack.c.bf16 %v10298_v37, %v10297_v11  ;;  %9860 = vmatpush3.bf16.xpose.msk.msra.mxu1 %vm11416_vm2, %v9855_v25  ;;  %v11872_v37 = vadd.f32 %v2410_v35, %v1194_v60  ;;  %v4003_v53 = vsel %vm3921_vm3, %v11851_v54, -inf }
 0x458   : > { %v11860_v51 = vpop.permute.xlu1 %10305  ;;  %v11862_v34 = vpop.f32.mrb[14].mxu0  ;;  %3998 = vmax.xlane.f32.xlu1 %v3997_v50 }
 0x459   : > { %v11864_v14 = vpop.permute.xlu0 %10315  ;;  %9869 = vmatprep.subr.msk.bf16.mxu1 %vm11416_vm2, %v9867_v45  ;;  %v11870_v25 = vpop.f32.mrb[15].mxu0  ;;  %13839 = vst [vmem:[#allocation31_spill] sm:$0xff] %v11872_v37  ;;  %v4000_v35 = vsel %vm3921_vm3, %v11872_v37, -inf }
 0x45c   : > { %v11876_v11 = vpop.permute.xlu1 %10310  ;;  %v11878_v41 = vpop.f32.mrb[30].mxu1  ;;  %4004 = vmax.xlane.f32.xlu1 %v4003_v53 }
 0x45d   : > { %v11880_v50 = vpop.permute.xlu0 %10320  ;;  %v11882_v7 = vpop.f32.mrb[31].mxu1 }
 0x45e   : > { %13840 = vst [vmem:[#allocation32_spill] sm:$0xff] %v11880_v50  ;;  %13841 = vst [vmem:[#allocation33_spill] sm:$0xff] %v11882_v7  ;;  %9329 = vmatmul.mubr.msk.f32.vlgmr.msra.gmra.mrb[32].mxu1 %vm1204_vm1, %v11264_v49 }
 0x45f   : > { %9872 = vmatpush3.bf16.xpose.msk.msra.mxu1 %vm11416_vm2, %v9867_v45  ;;  %9342 = vmatprep.mubr.msk.f32.mxu1 %vm1204_vm1, %v11277_v61 }
 0x460   : > { %v11892_v60 = vpop.permute.xlu1 %10325  ;;  %4001 = vmax.xlane.f32.xlu1 %v4000_v35 }
 0x461   : > { %13842 = vst [vmem:[#allocation34_spill] sm:$0xff] %v11892_v60  ;;  %v11894_v53 = vpop.permute.xlu0 %10335 }
 0x462   : > { %13843 = vst [vmem:[#allocation35_spill] sm:$0xff] %v11894_v53 }
 0x464   : > { %v11896_v20 = vpop.permute.xlu1 %10330 }
 0x465   : > { %13844 = vst [vmem:[#allocation36_spill] sm:$0xff] %v11896_v20  ;;  %v11898_v50 = vpop.permute.xlu0 %10340 }
 0x466   : > { %13845 = vst [vmem:[#allocation37_spill] sm:$0xff] %v11898_v50  ;;  %9343 = vmatmul.mubr.msk.f32.vlgmr.msra.gmra.mrb[34].mxu1 %vm1204_vm1, %v11291_v1  ;;  %v11917_v50 = vld [vmem:[%s13756_s8 + $0x8] sm:$0xff] }
 0x467   : > { %9356 = vmatprep.mubr.msk.f32.mxu1 %vm1204_vm1, %v11370_v19  ;;  %13850 = vst [vmem:[#allocation42_spill] sm:$0xff] %v11917_v50 }
 0x468   : > { %v11904_v49 = vpop.permute.xlu1 %10380  ;;  %v11906_v61 = vpop.f32.mrb[16].mxu0 }
 0x469   : > { %13846 = vst [vmem:[#allocation38_spill] sm:$0xff] %v11906_v61  ;;  %v11908_v45 = vpop.permute.xlu0 %10345  ;;  %v11910_v60 = vpop.f32.mrb[17].mxu0 }
 0x46a   : > { %13847 = vst [vmem:[#allocation39_spill] sm:$0xff] %v11908_v45  ;;  %13848 = vst [vmem:[#allocation40_spill] sm:$0xff] %v11910_v60  ;;  %v11925_v60 = vadd.f32 %v11680_v57, %v11917_v50  ;;  %v1170_v45 = vld [vmem:[%s13756_s8 + $0x10] sm:$0xff]  ;;  %v1173_v57 = vld [vmem:[%s13756_s8 + $0x28] sm:$0xff] }
 0x46c   : > { %v10386_v53 = vpop.permute.xlu1 %10385 }
 0x46d   : > { %v11912_v35 = vpop.permute.xlu0 %10350  ;;  %v10388_v54 = vunpack.i.h.bf16 %v10386_v53  ;;  %v10387_v5 = vunpack.i.l.bf16 %v10386_v53 }
 0x46e   : > { %13849 = vst [vmem:[#allocation41_spill] sm:$0xff] %v11912_v35 }
 0x46f   : > { %v9885_v7 = vpack.c.bf16 %v10388_v54, %v10387_v5 }
 0x470   : > { %v11919_v1 = vpop.f32.mrb[18].mxu0 }
 0x471   : > { %13851 = vst [vmem:[#allocation43_spill] sm:$0xff] %v11919_v1  ;;  %v10356_v20 = vpop.permute.xlu0 %10355  ;;  %v11921_v19 = vpop.f32.mrb[19].mxu0  ;;  %v11933_v1 = vadd.f32 %v11710_v0, %v1170_v45  ;;  %v11945_v0 = vadd.f32 %v11682_v2, %v1173_v57  ;;  %v1177_v57 = vld [vmem:[%s13756_s8 + $0x48] sm:$0xff] }
 0x472   : > { %13852 = vst [vmem:[#allocation44_spill] sm:$0xff] %v11921_v19  ;;  %v10358_v61 = vunpack.i.h.bf16 %v10356_v20  ;;  %v10357_v56 = vunpack.i.l.bf16 %v10356_v20  ;;  %v3925_v20 = vsel %vm3921_vm3, %v11925_v60, -inf  ;;  %v10391_v2 = vpop.permute.xlu1 %10390 }
 0x473   : > { %v3928_v53 = vsel %vm3921_vm3, %v11933_v1, -inf }
 0x474   : > { %v9873_v35 = vpack.c.bf16 %v10358_v61, %v10357_v56  ;;  %3926 = vmax.xlane.f32.xlu0 %v3925_v20  ;;  %v1172_v61 = vld [vmem:[%s13756_s8 + $0x20] sm:$0xff]  ;;  %v3937_v20 = vsel %vm3921_vm3, %v11945_v0, -inf }
 0x475   : > { %v10361_v37 = vpop.permute.xlu0 %10360 }
 0x476   : > { %9875 = vmatprep.subr.msk.bf16.mxu0 %vm11416_vm2, %v9873_v35  ;;  %v10363_v5 = vunpack.i.h.bf16 %v10361_v37  ;;  %v10362_v54 = vunpack.i.l.bf16 %v10361_v37  ;;  %v11955_v37 = vadd.f32 %v11684_v40, %v1172_v61  ;;  %v10392_v40 = vunpack.i.l.bf16 %v10391_v2 }
 0x477   : > { %9878 = vmatpush3.bf16.xpose.msk.msra.mxu0 %vm11416_vm2, %v9873_v35 }
 0x478   : > { %9887 = vmatprep.subr.msk.bf16.mxu0 %vm11416_vm2, %v9885_v7  ;;  %3929 = vmax.xlane.f32.xlu0 %v3928_v53  ;;  %v9897_v35 = vpack.c.bf16 %v10363_v5, %v10362_v54  ;;  %v1181_v53 = vld [vmem:[%s13756_s8 + $0x68] sm:$0xff] }
 0x479   : > { %v10366_v56 = vpop.permute.xlu0 %10365  ;;  %v12002_v61 = vadd.f32 %v11732_v59, %v1181_v53  ;;  %v10396_v59 = vpop.permute.xlu1 %10395 }
 0x47c   : > { %3938 = vmax.xlane.f32.xlu0 %v3937_v20 }
 0x47d   : > { %v10371_v45 = vpop.permute.xlu0 %10370 }
 0x47e   : > { %v10373_v19 = vunpack.i.h.bf16 %v10371_v45  ;;  %v10372_v50 = vunpack.i.l.bf16 %v10371_v45  ;;  %9350 = vmatmul.mubr.msk.f32.vlgmr.msra.gmra.mrb[20].mxu0 %vm1204_vm1, %v11352_v21  ;;  %v10393_v21 = vunpack.i.h.bf16 %v10391_v2  ;;  %v12011_v45 = vld [vmem:[%s13756_s8 + $0x60] sm:$0xff] }
 0x47f   : > { %9890 = vmatpush3.bf16.xpose.msk.msra.mxu0 %vm11416_vm2, %v9885_v7  ;;  %9363 = vmatprep.mubr.msk.f32.mxu0 %vm1204_vm1, %v11368_v18  ;;  %v11971_v7 = vadd.f32 %v11716_v4, %v1177_v57  ;;  %v3934_v18 = vsel %vm3921_vm3, %v11955_v37, -inf }
 0x480   : > { %v9879_v5 = vpack.c.bf16 %v10373_v19, %v10372_v50  ;;  %9899 = vmatprep.subr.msk.bf16.mxu0 %vm11416_vm2, %v9897_v35  ;;  %v11980_v50 = vld [vmem:[%s13756_s8 + $0x40] sm:$0xff]  ;;  %3935 = vmax.xlane.f32.xlu0 %v3934_v18  ;;  %v9909_v19 = vpack.c.bf16 %v10393_v21, %v10392_v40  ;;  %v1185_v21 = vld [vmem:[%s13756_s8 + $0x88] sm:$0xff] }
 0x481   : > { %v11986_v4 = vadd.f32 %v11718_v10, %v11980_v50  ;;  %v3949_v54 = vsel %vm3921_vm3, %v11971_v7, -inf  ;;  %v10367_v10 = vunpack.i.l.bf16 %v10366_v56  ;;  %v12057_v40 = vadd.f32 %v11748_v63, %v1185_v21  ;;  %v12064_v18 = vld [vmem:[%s13756_s8 + $0x80] sm:$0xff]  ;;  %v1187_v63 = vld [vmem:[%s13756_s8 + $0x98] sm:$0xff] }
 0x482   : > { %9881 = vmatprep.subr.msk.bf16.mxu1 %vm11416_vm2, %v9879_v5  ;;  %v12084_v53 = vadd.f32 %v11803_v13, %v1187_v63  ;;  %v1199_v21 = vld [vmem:[%s13756_s8 + $0xf8] sm:$0xff] }
 0x483   : > { %9884 = vmatpush3.bf16.xpose.msk.msra.mxu1 %vm11416_vm2, %v9879_v5 }
 0x484   : > { %3950 = vmax.xlane.f32.xlu0 %v3949_v54  ;;  %v12070_v54 = vadd.f32 %v11752_v8, %v12064_v18  ;;  %v10312_v8 = vunpack.i.l.bf16 %v11876_v11  ;;  %v3979_v13 = vsel %vm3921_vm3, %v12084_v53, -inf }
 0x486   : > { %9364 = vmatmul.mubr.msk.f32.vlgmr.msra.gmra.mrb[22].mxu0 %vm1204_vm1, %v11380_v22  ;;  %v10368_v22 = vunpack.i.h.bf16 %v10366_v56  ;;  %v1183_v56 = vld [vmem:[%s13756_s8 + $0x78] sm:$0xff] }
 0x487   : > { %9902 = vmatpush3.bf16.xpose.msk.msra.mxu0 %vm11416_vm2, %v9897_v35  ;;  %9377 = vmatprep.mubr.msk.f32.mxu0 %vm1204_vm1, %v11364_v16  ;;  %v3946_v16 = vsel %vm3921_vm3, %v11986_v4, -inf  ;;  %v12031_v2 = vadd.f32 %v11744_v27, %v1183_v56 }
 0x488   : > { %9911 = vmatprep.subr.msk.bf16.mxu0 %vm11416_vm2, %v9909_v19  ;;  %3947 = vmax.xlane.f32.xlu0 %v3946_v16  ;;  %v9921_v35 = vpack.c.bf16 %v10368_v22, %v10367_v10  ;;  %v3970_v22 = vsel %vm3921_vm3, %v12070_v54, -inf }
 0x489   : > { %v3967_v27 = vsel %vm3921_vm3, %v12031_v2, -inf }
 0x48a   : > { %9357 = vmatmul.mubr.msk.f32.vlgmr.msra.gmra.mrb[36].mxu1 %vm1204_vm1, %v11366_v17  ;;  %v12017_v17 = vadd.f32 %v11738_v23, %v12011_v45  ;;  %v10397_v23 = vunpack.i.l.bf16 %v10396_v59 }
 0x48b   : > { %9370 = vmatprep.mubr.msk.f32.mxu1 %vm1204_vm1, %v11372_v58  ;;  %v3961_v58 = vsel %vm3921_vm3, %v12002_v61, -inf }
 0x48c   : > { %3962 = vmax.xlane.f32.xlu0 %v3961_v58  ;;  %v3958_v20 = vsel %vm3921_vm3, %v12017_v17, -inf }
 0x48e   : > { %9378 = vmatmul.mubr.msk.f32.vlgmr.msra.gmra.mrb[24].mxu0 %vm1204_vm1, %v11360_v15  ;;  %v10398_v15 = vunpack.i.h.bf16 %v10396_v59 }
 0x48f   : > { %9914 = vmatpush3.bf16.xpose.msk.msra.mxu0 %vm11416_vm2, %v9909_v19  ;;  %9391 = vmatprep.mubr.msk.f32.mxu0 %vm1204_vm1, %v11392_v26  ;;  %v1182_v26 = vld [vmem:[%s13756_s8 + $0x70] sm:$0xff] }
 0x490   : > { %9923 = vmatprep.subr.msk.bf16.mxu0 %vm11416_vm2, %v9921_v35  ;;  %3959 = vmax.xlane.f32.xlu0 %v3958_v20  ;;  %v9933_v57 = vpack.c.bf16 %v10398_v15, %v10397_v23  ;;  %v12041_v5 = vadd.f32 %v11746_v30, %v1182_v26  ;;  %v10302_v30 = vunpack.i.l.bf16 %v11845_v52 }
 0x494   : > { %3968 = vmax.xlane.f32.xlu0 %v3967_v27 }
 0x496   : > { %9392 = vmatmul.mubr.msk.f32.vlgmr.msra.gmra.mrb[26].mxu0 %vm1204_vm1, %v11458_v28  ;;  %v10303_v28 = vunpack.i.h.bf16 %v11845_v52  ;;  %v3973_v52 = vsel %vm3921_vm3, %v12057_v40, -inf }
 0x497   : > { %9926 = vmatpush3.bf16.xpose.msk.msra.mxu0 %vm11416_vm2, %v9921_v35  ;;  %9405 = vmatprep.mubr.msk.f32.mxu0 %vm1204_vm1, %v11406_v31  ;;  %v3964_v31 = vsel %vm3921_vm3, %v12041_v5, -inf  ;;  %v12115_v35 = vld [vmem:[%s13756_s8 + $0xc0] sm:$0xff] }
 0x498   : > { %9935 = vmatprep.subr.msk.bf16.mxu0 %vm11416_vm2, %v9933_v57  ;;  %3965 = vmax.xlane.f32.xlu0 %v3964_v31  ;;  %v9945_v19 = vpack.c.bf16 %v10303_v28, %v10302_v30  ;;  %v12119_v59 = vadd.f32 %v11836_v44, %v12115_v35  ;;  %v12134_v44 = vld [vmem:[%s13756_s8 + $0xe0] sm:$0xff]  ;;  %v12149_v28 = vadd.f32 %v11878_v41, %v1199_v21  ;;  %v10376_v30 = vpop.permute.xlu0 %10375 }
 0x499   : > { %v10377_v41 = vunpack.i.l.bf16 %v10376_v30 }
 0x49a   : > { %v3994_v23 = vsel %vm3921_vm3, %v12119_v59, -inf }
 0x49c   : > { %3974 = vmax.xlane.f32.xlu0 %v3973_v52 }
 0x49e   : > { %9406 = vmatmul.mubr.msk.f32.vlgmr.msra.gmra.mrb[28].mxu0 %vm1204_vm1, %v11474_v38  ;;  %v10313_v38 = vunpack.i.h.bf16 %v11876_v11  ;;  %v12103_v11 = vld [vmem:[%s13756_s8 + $0xa0] sm:$0xff] }
 0x49f   : > { %9938 = vmatpush3.bf16.xpose.msk.msra.mxu0 %vm11416_vm2, %v9933_v57  ;;  %9419 = vmatprep.mubr.msk.f32.mxu0 %vm1204_vm1, %v11412_v55  ;;  %v1189_v55 = vld [vmem:[%s13756_s8 + $0xa8] sm:$0xff]  ;;  %v12139_v57 = vadd.f32 %v11870_v25, %v12134_v44 }
 0x4a0   : > { %9946 = vmatprep.subr.bf16.mxu0 %v9945_v19  ;;  %3971 = vmax.xlane.f32.xlu0 %v3970_v22  ;;  %v12093_v10 = vpack.c.bf16 %v10313_v38, %v10312_v8  ;;  %v12096_v16 = vadd.f32 %v11807_v6, %v1189_v55  ;;  %v10378_v8 = vunpack.i.h.bf16 %v10376_v30 }
 0x4a1   : > { %v4006_v25 = vsel %vm3921_vm3, %v12139_v57, -inf }
 0x4a2   : > { %v3985_v6 = vsel %vm3921_vm3, %v12096_v16, -inf }
 0x4a4   : > { %3980 = vmax.xlane.f32.xlu0 %v3979_v13 }
 0x4a6   : > { %9420 = vmatmul.mubr.msk.f32.vlgmr.msra.gmra.mrb[30].mxu0 %vm1204_vm1, %v11496_v42  ;;  %v12108_v42 = vadd.f32 %v11811_v3, %v12103_v11  ;;  %v1197_v3 = vld [vmem:[%s13756_s8 + $0xe8] sm:$0xff] }
 0x4a7   : > { %9948 = vmatpush3.bf16.msra.mxu0 %v9945_v19  ;;  %v12127_v56 = vadd.f32 %v11862_v34, %v1197_v3  ;;  %v4015_v19 = vsel %vm3921_vm3, %v12149_v28, -inf }
 0x4a8   : > { %9954 = vmatprep.subr.bf16.mxu0 %v12093_v10  ;;  %3986 = vmax.xlane.f32.xlu0 %v3985_v6  ;;  %v3982_v58 = vsel %vm3921_vm3, %v12108_v42, -inf }
 0x4a9   : > { %v4009_v34 = vsel %vm3921_vm3, %v12127_v56, -inf }
 0x4ac   : > { %3983 = vmax.xlane.f32.xlu0 %v3982_v58 }
 0x4b0   : > { %3995 = vmax.xlane.f32.xlu0 %v3994_v23 }
 0x4b3   : > { %v3924_v15 = vpop.xlane.xlu1 %3923 }
 0x4b4   : > { %v4114_v20 = vsub.f32 %v11761_v46, %v3924_v15  ;;  %4010 = vmax.xlane.f32.xlu0 %v4009_v34 }
 0x4b6   : > { %v4178_v26 = vmul.f32 1.442695, %v4114_v20  ;;  %v9903_v20 = vpack.c.bf16 %v10378_v8, %v10377_v41  ;;  %v10382_v8 = vunpack.i.l.bf16 %v11904_v49 }
 0x4b7   : > { %v12141_v27 = vpop.xlane.xlu1 %3932 }
 0x4b8   : > { %10551 = vpow2.f32 %v4178_v26  ;;  %4007 = vmax.xlane.f32.xlu0 %v4006_v25 }
 0x4bb   : > { %v12151_v46 = vpop.xlane.xlu1 %3944 }
 0x4bc   : > { %4016 = vmax.xlane.f32.xlu0 %v4015_v19 }
 0x4bf   : > { %v3942_v31 = vpop.xlane.xlu1 %3941  ;;  %v10401_v22 = vpop.permute.xlu0 %10400 }
 0x4c0   : > { %v4120_v52 = vsub.f32 %v11780_v48, %v3942_v31  ;;  %v10403_v6 = vunpack.i.h.bf16 %v10401_v22  ;;  %v10402_v58 = vunpack.i.l.bf16 %v10401_v22 }
 0x4c2   : > { %v12158_v63 = vpop.eup %10551  ;;  %v4190_v38 = vmul.f32 1.442695, %v4120_v52  ;;  %v9891_v15 = vpack.c.bf16 %v10403_v6, %v10402_v58  ;;  %v13853_v58 = vld [vmem:[#allocation2_spill] sm:$0xff] }
 0x4c3   : > { %v3957_v55 = vpop.xlane.xlu1 %3956  ;;  %v4306_v13 = vsel %vm3921_vm3, %v12158_v63, 0.0  ;;  %v10406_v34 = vpop.permute.xlu0 %10405 }
 0x4c4   : > { %10553 = vpow2.f32 %v4190_v38  ;;  %v4125_v3 = vsub.f32 %v11787_v36, %v3957_v55  ;;  %4307 = vadd.xlane.f32.xlu0 %v4306_v13  ;;  %9893 = vmatprep.subr.msk.bf16.mxu1 %vm11416_vm2, %v9891_v15  ;;  %v10408_v36 = vunpack.i.h.bf16 %v10406_v34  ;;  %v10407_v25 = vunpack.i.l.bf16 %v10406_v34 }
 0x4c5   : > { %9896 = vmatpush3.bf16.xpose.msk.msra.mxu1 %vm11416_vm2, %v9891_v15  ;;  %v10383_v38 = vunpack.i.h.bf16 %v11904_v49 }
 0x4c6   : > { %v4200_v23 = vmul.f32 1.442695, %v4125_v3  ;;  %9905 = vmatprep.subr.msk.bf16.mxu1 %vm11416_vm2, %v9903_v20 }
 0x4c7   : > { %v3954_v48 = vpop.xlane.xlu1 %3953  ;;  %v9927_v22 = vpack.c.bf16 %v10383_v38, %v10382_v8 }
 0x4c8   : > { %10555 = vpow2.f32 %v4200_v23  ;;  %v4124_v26 = vsub.f32 %v11794_v12, %v3954_v48  ;;  %v9915_v12 = vpack.c.bf16 %v10408_v36, %v10407_v25  ;;  %v1198_v36 = vld [vmem:[%s13756_s8 + $0xf0] sm:$0xff] }
 0x4ca   : > { %v4198_v21 = vmul.f32 1.442695, %v4124_v26 }
 0x4cc   : > { %10557 = vpow2.f32 %v4198_v21  ;;  %9371 = vmatmul.mubr.msk.f32.vlgmr.msra.gmra.mrb[38].mxu1 %vm1204_vm1, %v11390_v24 }
 0x4cd   : > { %9908 = vmatpush3.bf16.xpose.msk.msra.mxu1 %vm11416_vm2, %v9903_v20  ;;  %9384 = vmatprep.mubr.msk.f32.mxu1 %vm1204_vm1, %v11382_v29  ;;  %v10411_v29 = vpop.permute.xlu0 %10410 }
 0x4ce   : > { %v12170_v30 = vpop.eup %10553  ;;  %9917 = vmatprep.subr.msk.bf16.mxu1 %vm11416_vm2, %v9915_v12  ;;  %v10413_v49 = vunpack.i.h.bf16 %v10411_v29  ;;  %v10412_v55 = vunpack.i.l.bf16 %v10411_v29 }
 0x4cf   : > { %v4324_v31 = vsel %vm3921_vm3, %v12170_v30, 0.0 }
 0x4d0   : > { %4325 = vadd.xlane.f32.xlu0 %v4324_v31  ;;  %v9939_v13 = vpack.c.bf16 %v10413_v49, %v10412_v55  ;;  %v13855_v31 = vld [vmem:[#allocation33_spill] sm:$0xff] }
 0x4d2   : > { %v12180_v19 = vpop.eup %10555 }
 0x4d3   : > { %v4339_v52 = vsel %vm3921_vm3, %v12180_v19, 0.0 }
 0x4d4   : > { %4340 = vadd.xlane.f32.xlu0 %v4339_v52  ;;  %9385 = vmatmul.mubr.msk.f32.vlgmr.msra.gmra.mrb[40].mxu1 %vm1204_vm1, %v11450_v62  ;;  %v10307_v62 = vunpack.i.l.bf16 %v11860_v51 }
 0x4d5   : > { %9920 = vmatpush3.bf16.xpose.msk.msra.mxu1 %vm11416_vm2, %v9915_v12  ;;  %9398 = vmatprep.mubr.msk.f32.mxu1 %vm1204_vm1, %v11408_v32  ;;  %v10308_v32 = vunpack.i.h.bf16 %v11860_v51  ;;  %v13854_v51 = vld [vmem:[#allocation21_spill] sm:$0xff]  ;;  %v12235_v12 = vadd.f32 %v13855_v31, %v1198_v36 }
 0x4d6   : > { %v12188_v24 = vpop.eup %10557  ;;  %9929 = vmatprep.subr.msk.bf16.mxu1 %vm11416_vm2, %v9927_v22  ;;  %v4117_v15 = vsub.f32 %v13854_v51, %v12141_v27 }
 0x4d7   : > { %v4336_v41 = vsel %vm3921_vm3, %v12188_v24, 0.0  ;;  %v9949_v6 = vpack.c.bf16 %v10308_v32, %v10307_v62  ;;  %v3978_v62 = vpop.xlane.xlu1 %3977 }
 0x4d8   : > { %4337 = vadd.xlane.f32.xlu0 %v4336_v41  ;;  %v4184_v48 = vmul.f32 1.442695, %v4117_v15 }
 0x4dc   : > { %9399 = vmatmul.mubr.msk.f32.vlgmr.msra.gmra.mrb[42].mxu1 %vm1204_vm1, %v11466_v39  ;;  %v10317_v39 = vunpack.i.l.bf16 %v11864_v14 }
 0x4dd   : > { %9932 = vmatpush3.bf16.xpose.msk.msra.mxu1 %vm11416_vm2, %v9927_v22  ;;  %9412 = vmatprep.mubr.msk.f32.mxu1 %vm1204_vm1, %v11410_v33  ;;  %v10318_v33 = vunpack.i.h.bf16 %v11864_v14  ;;  %v4012_v22 = vsel %vm3921_vm3, %v12235_v12, -inf }
 0x4de   : > { %9941 = vmatprep.subr.msk.bf16.mxu1 %vm11416_vm2, %v9939_v13 }
 0x4df   : > { %v12220_v3 = vpack.c.bf16 %v10318_v33, %v10317_v39 }
 0x4e4   : > { %9413 = vmatmul.mubr.msk.f32.vlgmr.msra.gmra.mrb[44].mxu1 %vm1204_vm1, %v11484_v43 }
 0x4e5   : > { %9944 = vmatpush3.bf16.xpose.msk.msra.mxu1 %vm11416_vm2, %v9939_v13  ;;  %9426 = vmatprep.mubr.msk.f32.mxu1 %vm1204_vm1, %v11504_v47 }
 0x4e6   : > { %9950 = vmatprep.subr.bf16.mxu1 %v9949_v6 }
 0x4ec   : > { %9427 = vmatmul.mubr.msk.f32.vlgmr.msra.gmra.mrb[46].mxu1 %vm1204_vm1, %v13853_v58 }
 0x4ed   : > { %9952 = vmatpush3.bf16.msra.mxu1 %v9949_v6 }
 0x4ee   : > { %9958 = vmatprep.subr.bf16.mxu1 %v12220_v3 }
 0x501   : > { %v3927_v43 = vpop.xlane.xlu0 %3926 }
 0x502   : > { %v4115_v9 = vsub.f32 %v11925_v60, %v3927_v43 }
 0x504   : > { %v4180_v47 = vmul.f32 1.442695, %v4115_v9  ;;  %v12256_v9 = vpop.xlane.xlu1 %3992 }
 0x505   : > { %v3930_v23 = vpop.xlane.xlu0 %3929 }
 0x506   : > { %10559 = vpow2.f32 %v4180_v47  ;;  %v4116_v14 = vsub.f32 %v11933_v1, %v3930_v23 }
 0x507   : > { %10561 = vpow2.f32 %v4184_v48 }
 0x508   : > { %v4182_v26 = vmul.f32 1.442695, %v4116_v14 }
 0x509   : > { %v3939_v20 = vpop.xlane.xlu0 %3938 }
 0x50a   : > { %v4119_v34 = vsub.f32 %v11945_v0, %v3939_v20  ;;  %10563 = vpow2.f32 %v4182_v26  ;;  %v13856_v0 = vld [vmem:[#allocation22_spill] sm:$0xff] }
 0x50b   : > { %v4121_v38 = vsub.f32 %v13856_v0, %v12151_v46 }
 0x50c   : > { %v4188_v27 = vmul.f32 1.442695, %v4119_v34 }
 0x50d   : > { %v3936_v21 = vpop.xlane.xlu0 %3935 }
 0x50e   : > { %v4118_v25 = vsub.f32 %v11955_v37, %v3936_v21  ;;  %10565 = vpow2.f32 %v4188_v27  ;;  %v4192_v37 = vmul.f32 1.442695, %v4121_v38  ;;  %v12268_v21 = vpop.xlane.xlu1 %3989 }
 0x510   : > { %v12231_v60 = vpop.eup %10559  ;;  %v4186_v8 = vmul.f32 1.442695, %v4118_v25 }
 0x511   : > { %v3951_v1 = vpop.xlane.xlu0 %3950  ;;  %v4309_v52 = vsel %vm3921_vm3, %v12231_v60, 0.0  ;;  %v12243_v29 = vpop.eup %10561 }
 0x512   : > { %4310 = vadd.xlane.f32.xlu1 %v4309_v52  ;;  %10567 = vpow2.f32 %v4186_v8  ;;  %v4123_v49 = vsub.f32 %v11971_v7, %v3951_v1  ;;  %v4315_v13 = vsel %vm3921_vm3, %v12243_v29, 0.0 }
 0x513   : > { %10569 = vpow2.f32 %v4192_v37 }
 0x514   : > { %v12248_v32 = vpop.eup %10563  ;;  %v4196_v6 = vmul.f32 1.442695, %v4123_v49 }
 0x515   : > { %v3948_v41 = vpop.xlane.xlu0 %3947  ;;  %v4312_v43 = vsel %vm3921_vm3, %v12248_v32, 0.0 }
 0x516   : > { %4013 = vmax.xlane.f32.xlu1 %v4012_v22  ;;  %v4122_v33 = vsub.f32 %v11986_v4, %v3948_v41 }
 0x518   : > { %v12254_v7 = vpop.eup %10565  ;;  %v4194_v51 = vmul.f32 1.442695, %v4122_v33 }
 0x519   : > { %v3963_v55 = vpop.xlane.xlu0 %3962  ;;  %v4321_v47 = vsel %vm3921_vm3, %v12254_v7, 0.0 }
 0x51a   : > { %v4127_v46 = vsub.f32 %v12002_v61, %v3963_v55  ;;  %4316 = vadd.xlane.f32.xlu1 %v4315_v13  ;;  %v13857_v55 = vld [vmem:[#allocation23_spill] sm:$0xff] }
 0x51b   : > { %v4132_v13 = vsub.f32 %v13857_v55, %v3978_v62 }
 0x51c   : > { %v4204_v39 = vmul.f32 1.442695, %v4127_v46  ;;  %v12261_v4 = vpop.eup %10567 }
 0x51d   : > { %v3960_v58 = vpop.xlane.xlu0 %3959  ;;  %v4318_v26 = vsel %vm3921_vm3, %v12261_v4, 0.0  ;;  %v12266_v34 = vpop.eup %10569 }
 0x51e   : > { %10571 = vpow2.f32 %v4204_v39  ;;  %4313 = vadd.xlane.f32.xlu1 %v4312_v43  ;;  %v4126_v61 = vsub.f32 %v12017_v17, %v3960_v58  ;;  %v4327_v25 = vsel %vm3921_vm3, %v12266_v34, 0.0 }
 0x51f   : > { %10573 = vpow2.f32 %v4196_v6 }
 0x520   : > { %10575 = vpow2.f32 %v4194_v51  ;;  %v4202_v48 = vmul.f32 1.442695, %v4126_v61  ;;  %v4214_v61 = vmul.f32 1.442695, %v4132_v13 }
 0x521   : > { %v3969_v15 = vpop.xlane.xlu0 %3968 }
 0x522   : > { %v4129_v23 = vsub.f32 %v12031_v2, %v3969_v15  ;;  %4322 = vadd.xlane.f32.xlu1 %v4321_v47 }
 0x524   : > { %v4208_v14 = vmul.f32 1.442695, %v4129_v23 }
 0x525   : > { %v3966_v20 = vpop.xlane.xlu0 %3965 }
 0x526   : > { %10577 = vpow2.f32 %v4208_v14  ;;  %v4128_v17 = vsub.f32 %v12041_v5, %v3966_v20  ;;  %4319 = vadd.xlane.f32.xlu1 %v4318_v26  ;;  %v12280_v5 = vpop.xlane.xlu1 %3998 }
 0x527   : > { %10579 = vpow2.f32 %v4202_v48 }
 0x528   : > { %v12271_v36 = vpop.eup %10571  ;;  %v4206_v2 = vmul.f32 1.442695, %v4128_v17 }
 0x529   : > { %v3975_v27 = vpop.xlane.xlu0 %3974  ;;  %v4345_v31 = vsel %vm3921_vm3, %v12271_v36, 0.0  ;;  %v12277_v1 = vpop.eup %10573 }
 0x52a   : > { %10581 = vpow2.f32 %v4206_v2  ;;  %v4131_v52 = vsub.f32 %v12057_v40, %v3975_v27  ;;  %4328 = vadd.xlane.f32.xlu1 %v4327_v25  ;;  %4346 = vadd.xlane.f32.xlu0 %v4345_v31  ;;  %v4333_v41 = vsel %vm3921_vm3, %v12277_v1, 0.0  ;;  %v12286_v22 = vpop.eup %10575  ;;  %v13859_v31 = vld [vmem:[#allocation25_spill] sm:$0xff] }
 0x52b   : > { %v4330_v33 = vsel %vm3921_vm3, %v12286_v22, 0.0 }
 0x52c   : > { %v4212_v0 = vmul.f32 1.442695, %v4131_v52  ;;  %v4137_v52 = vsub.f32 %v13859_v31, %v12256_v9 }
 0x52d   : > { %v3972_v8 = vpop.xlane.xlu0 %3971 }
 0x52e   : > { %10583 = vpow2.f32 %v4212_v0  ;;  %v4130_v49 = vsub.f32 %v12070_v54, %v3972_v8  ;;  %4334 = vadd.xlane.f32.xlu1 %v4333_v41  ;;  %v4005_v54 = vpop.xlane.xlu1 %4004 }
 0x530   : > { %v12291_v40 = vpop.eup %10577  ;;  %v4210_v46 = vmul.f32 1.442695, %v4130_v49 }
 0x531   : > { %v12282_v38 = vpop.f32.mrb[32].mxu1  ;;  %v3981_v6 = vpop.xlane.xlu0 %3980  ;;  %v4351_v39 = vsel %vm3921_vm3, %v12291_v40, 0.0 }
 0x532   : > { %v12288_v37 = vpop.f32.mrb[33].mxu1  ;;  %v12298_v58 = vpop.eup %10579  ;;  %10585 = vpow2.f32 %v4210_v46  ;;  %v4133_v43 = vsub.f32 %v12084_v53, %v3981_v6  ;;  %4331 = vadd.xlane.f32.xlu1 %v4330_v33  ;;  %4352 = vadd.xlane.f32.xlu0 %v4351_v39  ;;  %v4224_v46 = vmul.f32 1.442695, %v4137_v52 }
 0x533   : > { %v4342_v23 = vsel %vm3921_vm3, %v12298_v58, 0.0  ;;  %v4002_v17 = vpop.xlane.xlu1 %4001 }
 0x534   : > { %v12301_v51 = vpop.eup %10581  ;;  %v4216_v62 = vmul.f32 1.442695, %v4133_v43 }
 0x535   : > { %v3987_v47 = vpop.xlane.xlu0 %3986  ;;  %v4348_v48 = vsel %vm3921_vm3, %v12301_v51, 0.0 }
 0x536   : > { %10587 = vpow2.f32 %v4216_v62  ;;  %v4135_v53 = vsub.f32 %v12096_v16, %v3987_v47  ;;  %4343 = vadd.xlane.f32.xlu1 %v4342_v23  ;;  %4349 = vadd.xlane.f32.xlu0 %v4348_v48  ;;  %v13860_v16 = vld [vmem:[#allocation31_spill] sm:$0xff]  ;;  %v13862_v47 = vld [vmem:[#allocation29_spill] sm:$0xff] }
 0x537   : > { %10589 = vpow2.f32 %v4214_v61  ;;  %v4140_v8 = vsub.f32 %v13860_v16, %v4002_v17  ;;  %v4139_v23 = vsub.f32 %v13862_v47, %v12280_v5 }
 0x538   : > { %v12312_v20 = vpop.eup %10583  ;;  %v4220_v26 = vmul.f32 1.442695, %v4135_v53 }
 0x539   : > { %v12303_v15 = vpop.f32.mrb[34].mxu1  ;;  %v3984_v2 = vpop.xlane.xlu0 %3983  ;;  %v4357_v27 = vsel %vm3921_vm3, %v12312_v20, 0.0  ;;  %v4230_v9 = vmul.f32 1.442695, %v4140_v8  ;;  %v4228_v17 = vmul.f32 1.442695, %v4139_v23 }
 0x53a   : > { %13858 = vst [vmem:[#allocation2_spill] sm:$0xff] %v12303_v15  ;;  %v12309_v14 = vpop.f32.mrb[35].mxu1  ;;  %v4134_v25 = vsub.f32 %v12108_v42, %v3984_v2  ;;  %4358 = vadd.xlane.f32.xlu0 %v4357_v27  ;;  %10591 = vpow2.f32 %v4220_v26  ;;  %v13861_v42 = vld [vmem:[#allocation27_spill] sm:$0xff]  ;;  %v13863_v2 = vld [vmem:[#allocation30_spill] sm:$0xff] }
 0x53b   : > { %v4136_v33 = vsub.f32 %v13861_v42, %v12268_v21  ;;  %v4141_v27 = vsub.f32 %v13863_v2, %v4005_v54 }
 0x53c   : > { %v12319_v0 = vpop.eup %10585  ;;  %v4218_v41 = vmul.f32 1.442695, %v4134_v25 }
 0x53d   : > { %v3996_v49 = vpop.xlane.xlu0 %3995  ;;  %v4354_v55 = vsel %vm3921_vm3, %v12319_v0, 0.0  ;;  %v4232_v8 = vmul.f32 1.442695, %v4141_v27 }
 0x53e   : > { %v4138_v13 = vsub.f32 %v12119_v59, %v3996_v49  ;;  %4355 = vadd.xlane.f32.xlu0 %v4354_v55  ;;  %10593 = vpow2.f32 %v4218_v41  ;;  %v4222_v59 = vmul.f32 1.442695, %v4136_v33 }
 0x540   : > { %v12325_v6 = vpop.eup %10587  ;;  %v4226_v39 = vmul.f32 1.442695, %v4138_v13 }
 0x541   : > { %v4011_v43 = vpop.xlane.xlu0 %4010  ;;  %v4363_v61 = vsel %vm3921_vm3, %v12325_v6, 0.0  ;;  %v12331_v62 = vpop.eup %10589 }
 0x542   : > { %10595 = vpow2.f32 %v4226_v39  ;;  %4364 = vadd.xlane.f32.xlu1 %v4363_v61  ;;  %v4360_v21 = vsel %vm3921_vm3, %v12331_v62, 0.0 }
 0x543   : > { %10597 = vpow2.f32 %v4224_v46 }
 0x544   : > { %10599 = vpow2.f32 %v4230_v9  ;;  %v12337_v53 = vpop.eup %10591 }
 0x545   : > { %v4008_v48 = vpop.xlane.xlu0 %4007  ;;  %10601 = vpow2.f32 %v4222_v59  ;;  %v4369_v52 = vsel %vm3921_vm3, %v12337_v53, 0.0 }
 0x546   : > { %v4142_v26 = vsub.f32 %v12139_v57, %v4008_v48  ;;  %4361 = vadd.xlane.f32.xlu1 %v4360_v21  ;;  %v4143_v57 = vsub.f32 %v12127_v56, %v4011_v43 }
 0x548   : > { %v4234_v25 = vmul.f32 1.442695, %v4142_v26  ;;  %v12343_v5 = vpop.eup %10593  ;;  %v4236_v33 = vmul.f32 1.442695, %v4143_v57 }
 0x549   : > { %v4017_v31 = vpop.xlane.xlu0 %4016  ;;  %v4366_v13 = vsel %vm3921_vm3, %v12343_v5, 0.0 }
 0x54a   : > { %10603 = vpow2.f32 %v4234_v25  ;;  %4370 = vadd.xlane.f32.xlu1 %v4369_v52  ;;  %v4145_v56 = vsub.f32 %v12149_v28, %v4017_v31 }
 0x54b   : > { %10605 = vpow2.f32 %v4228_v17 }
 0x54c   : > { %v12345_v16 = vpop.eup %10595  ;;  %v4240_v59 = vmul.f32 1.442695, %v4145_v56 }
 0x54d   : > { %v12348_v41 = vpop.eup %10597  ;;  %v4378_v55 = vsel %vm3921_vm3, %v12345_v16, 0.0 }
 0x54e   : > { %v12356_v46 = vpop.eup %10599  ;;  %4379 = vadd.xlane.f32.xlu0 %v4378_v55  ;;  %4367 = vadd.xlane.f32.xlu1 %v4366_v13  ;;  %v4375_v9 = vsel %vm3921_vm3, %v12348_v41, 0.0 }
 0x54f   : > { %v4384_v39 = vsel %vm3921_vm3, %v12356_v46, 0.0  ;;  %v12363_v43 = vpop.eup %10601 }
 0x550   : > { %v4372_v23 = vsel %vm3921_vm3, %v12363_v43, 0.0 }
 0x551   : > { %v12350_v49 = vpop.f32.mrb[20].mxu0  ;;  %v4308_v54 = vpop.xlane.xlu0 %4307 }
 0x552   : > { %v2999_v42 = vpop.f32.mrb[21].mxu0  ;;  %10607 = vrcp.f32 %v4308_v54  ;;  %4376 = vadd.xlane.f32.xlu1 %v4375_v9  ;;  %4385 = vadd.xlane.f32.xlu0 %v4384_v39  ;;  %v13866_v9 = vld [vmem:[#allocation7_spill] sm:$0xff] }
 0x553   : > { %10609 = vpow2.f32 %v4232_v8 }
 0x554   : > { %v12365_v61 = vpop.eup %10603  ;;  %10611 = vpow2.f32 %v4236_v33 }
 0x555   : > { %v4390_v28 = vsel %vm3921_vm3, %v12365_v61, 0.0  ;;  %v12373_v48 = vpop.eup %10605  ;;  %10613 = vpow2.f32 %v4240_v59 }
 0x556   : > { %4373 = vadd.xlane.f32.xlu1 %v4372_v23  ;;  %4391 = vadd.xlane.f32.xlu0 %v4390_v28  ;;  %v4381_v2 = vsel %vm3921_vm3, %v12373_v48, 0.0  ;;  %v13867_v23 = vld [vmem:[#allocation8_spill] sm:$0xff]  ;;  %v13868_v28 = vld [vmem:[#allocation9_spill] sm:$0xff] }
 0x559   : > { %v12367_v47 = vpop.f32.mrb[22].mxu0 }
 0x55a   : > { %v3165_v21 = vpop.f32.mrb[23].mxu0  ;;  %4382 = vadd.xlane.f32.xlu1 %v4381_v2 }
 0x55c   : > { %v10608_v26 = vpop.eup %10607 }
 0x55d   : > { %v12375_v17 = vpop.f32.mrb[36].mxu1  ;;  %v12379_v27 = vpop.eup %10609  ;;  %v4562_v31 = vmul.f32 %v10608_v26, %v12158_v63 }
 0x55e   : > { %13864 = vst [vmem:[#allocation21_spill] sm:$0xff] %v12375_v17  ;;  %v12381_v25 = vpop.f32.mrb[37].mxu1  ;;  %v4387_v8 = vsel %vm3921_vm3, %v12379_v27, 0.0  ;;  %v12389_v57 = vpop.eup %10611 }
 0x55f   : > { %13865 = vst [vmem:[#allocation33_spill] sm:$0xff] %v12381_v25  ;;  %9433 = vmatprep.mubr.msk.f32.mxu0 %vm3921_vm3, %v4562_v31  ;;  %4388 = vadd.xlane.f32.xlu1 %v4387_v8  ;;  %v4393_v55 = vsel %vm3921_vm3, %v12389_v57, 0.0  ;;  %v12393_v13 = vpop.eup %10613  ;;  %v13869_v31 = vld [vmem:[#allocation6_spill] sm:$0xff] }
 0x560   : > { %v4399_v63 = vsel %vm3921_vm3, %v12393_v13, 0.0  ;;  %v13870_v8 = vld [vmem:[#allocation42_spill] sm:$0xff] }
 0x561   : > { %v12385_v52 = vpop.f32.mrb[24].mxu0 }
 0x562   : > { %v3331_v54 = vpop.f32.mrb[25].mxu0 }
 0x563   : > { %4394 = vadd.xlane.f32.xlu1 %v4393_v55  ;;  %v13871_v55 = vld [vmem:[#allocation38_spill] sm:$0xff] }
 0x567   : > { %4400 = vadd.xlane.f32.xlu1 %v4399_v63  ;;  %v12413_v63 = vadd.f32 %v13871_v55, %v13870_v8 }
 0x569   : > { %v12395_v33 = vpop.f32.mrb[26].mxu0  ;;  %v4021_v17 = vsel %vm3921_vm3, %v12413_v63, -inf }
 0x56a   : > { %v3497_v56 = vpop.f32.mrb[27].mxu0 }
 0x56b   : > { %v12436_v55 = vadd.f32 %v3497_v56, %v12103_v11 }
 0x56c   : > { %10420 = vrot.lane.b32.xlu0 %v13866_v9, %s10900_s19  ;;  %v12416_v9 = vadd.f32 %v2999_v42, %v11980_v50  ;;  %v12430_v50 = vadd.f32 %v3331_v54, %v12064_v18 }
 0x56d   : > { %v4078_v56 = vsel %vm3921_vm3, %v12436_v55, -inf }
 0x570   : > { %10425 = vrot.lane.b32.xlu0 %v13867_v23, %s10900_s19  ;;  %v12421_v23 = vadd.f32 %v3165_v21, %v12011_v45  ;;  %v4326_v21 = vpop.xlane.xlu0 %4325 }
 0x571   : > { %v12401_v39 = vpop.f32.mrb[28].mxu0 }
 0x572   : > { %v3663_v59 = vpop.f32.mrb[29].mxu0  ;;  %v4054_v42 = vsel %vm3921_vm3, %v12421_v23, -inf }
 0x573   : > { %v12447_v11 = vadd.f32 %v3663_v59, %v12115_v35 }
 0x574   : > { %10430 = vrot.lane.b32.xlu0 %v13868_v28, %s10900_s19  ;;  %v4042_v28 = vsel %vm3921_vm3, %v12416_v9, -inf }
 0x575   : > { %v4090_v35 = vsel %vm3921_vm3, %v12447_v11, -inf }
 0x578   : > { %10415 = vrot.lane.b32.xlu1 %v13869_v31, %s10900_s19 }
 0x579   : > { %v12407_v26 = vpop.f32.mrb[30].mxu0 }
 0x57a   : > { %v3829_v2 = vpop.f32.mrb[31].mxu0 }
 0x59c   : > { %4022 = vmax.xlane.f32.xlu1 %v4021_v17 }
 0x59f   : > { %v12425_v15 = vpop.f32.mrb[38].mxu1  ;;  %v4311_v31 = vpop.xlane.xlu1 %4310 }
 0x5a0   : > { %13872 = vst [vmem:[#allocation22_spill] sm:$0xff] %v12425_v15  ;;  %4043 = vmax.xlane.f32.xlu1 %v4042_v28  ;;  %10615 = vrcp.f32 %v4311_v31  ;;  %v12427_v8 = vpop.f32.mrb[39].mxu1  ;;  %v4066_v28 = vsel %vm3921_vm3, %v12430_v50, -inf }
 0x5a1   : > { %13873 = vst [vmem:[#allocation23_spill] sm:$0xff] %v12427_v8  ;;  %v13875_v8 = vld [vmem:[#allocation32_spill] sm:$0xff] }
 0x5a2   : > { %v10322_v25 = vunpack.i.l.bf16 %v13875_v8 }
 0x5a3   : > { %v4014_v17 = vpop.xlane.xlu1 %4013 }
 0x5a4   : > { %4055 = vmax.xlane.f32.xlu1 %v4054_v42  ;;  %v4144_v45 = vsub.f32 %v12235_v12, %v4014_v17  ;;  %v10323_v42 = vunpack.i.h.bf16 %v13875_v8  ;;  %v12454_v8 = vadd.f32 %v3829_v2, %v12134_v44 }
 0x5a6   : > { %v4238_v15 = vmul.f32 1.442695, %v4144_v45 }
 0x5a7   : > { %v12440_v31 = vpop.f32.mrb[40].mxu1  ;;  %v4317_v18 = vpop.xlane.xlu1 %4316 }
 0x5a8   : > { %13874 = vst [vmem:[#allocation25_spill] sm:$0xff] %v12440_v31  ;;  %4067 = vmax.xlane.f32.xlu1 %v4066_v28  ;;  %10617 = vpow2.f32 %v4238_v15  ;;  %v12442_v54 = vpop.f32.mrb[41].mxu1  ;;  %v9961_v15 = vpack.c.bf16 %v10323_v42, %v10322_v25  ;;  %v4341_v28 = vpop.xlane.xlu0 %4340  ;;  %v4102_v25 = vsel %vm3921_vm3, %v12454_v8, -inf }
 0x5a9   : > { %10619 = vrcp.f32 %v4326_v21 }
 0x5aa   : > { %v10616_v12 = vpop.eup %10615  ;;  %10621 = vrcp.f32 %v4317_v18 }
 0x5ab   : > { %v4314_v17 = vpop.xlane.xlu1 %4313  ;;  %v4563_v45 = vmul.f32 %v10616_v12, %v12231_v60 }
 0x5ac   : > { %4079 = vmax.xlane.f32.xlu1 %v4078_v56  ;;  %10623 = vrcp.f32 %v4314_v17  ;;  %v4338_v12 = vpop.xlane.xlu0 %4337  ;;  %v13878_v17 = vld [vmem:[#allocation34_spill] sm:$0xff] }
 0x5ad   : > { %9434 = vmatmul.mubr.msk.f32.vlgmr.msra.gmra.mrb[32].mxu0 %vm3921_vm3, %v4563_v45  ;;  %v10328_v45 = vunpack.i.h.bf16 %v13878_v17 }
 0x5ae   : > { %9956 = vmatpush3.bf16.msra.mxu0 %v12093_v10 }
 0x5af   : > { %9962 = vmatprep.subr.bf16.mxu0 %v9961_v15  ;;  %v12459_v59 = vpop.f32.mrb[42].mxu1  ;;  %v4323_v21 = vpop.xlane.xlu1 %4322 }
 0x5b0   : > { %13876 = vst [vmem:[#allocation31_spill] sm:$0xff] %v12459_v59  ;;  %4091 = vmax.xlane.f32.xlu1 %v4090_v35  ;;  %v12461_v18 = vpop.f32.mrb[43].mxu1  ;;  %10625 = vrcp.f32 %v4323_v21  ;;  %v10327_v35 = vunpack.i.l.bf16 %v13878_v17 }
 0x5b1   : > { %13877 = vst [vmem:[#allocation27_spill] sm:$0xff] %v12461_v18 }
 0x5b2   : > { %v12463_v60 = vpop.eup %10617 }
 0x5b3   : > { %v4320_v44 = vpop.xlane.xlu1 %4319  ;;  %v4396_v10 = vsel %vm3921_vm3, %v12463_v60, 0.0  ;;  %v10620_v2 = vpop.eup %10619 }
 0x5b4   : > { %4103 = vmax.xlane.f32.xlu1 %v4102_v25  ;;  %10627 = vrcp.f32 %v4320_v44  ;;  %4397 = vadd.xlane.f32.xlu0 %v4396_v10  ;;  %v10622_v42 = vpop.eup %10621  ;;  %v4568_v44 = vmul.f32 %v10620_v2, %v12170_v30  ;;  %v9965_v10 = vpack.c.bf16 %v10328_v45, %v10327_v35  ;;  %v13882_v35 = vld [vmem:[#allocation41_spill] sm:$0xff] }
 0x5b5   : > { %10629 = vrcp.f32 %v4338_v12  ;;  %v4565_v18 = vmul.f32 %v10622_v42, %v12243_v29 }
 0x5b6   : > { %v10624_v56 = vpop.eup %10623 }
 0x5b7   : > { %v12471_v59 = vpop.f32.mrb[44].mxu1  ;;  %v4564_v31 = vmul.f32 %v10624_v56, %v12248_v32  ;;  %v4329_v21 = vpop.xlane.xlu1 %4328 }
 0x5b8   : > { %13879 = vst [vmem:[#allocation29_spill] sm:$0xff] %v12471_v59  ;;  %v12474_v25 = vpop.f32.mrb[45].mxu1  ;;  %10631 = vrcp.f32 %v4329_v21  ;;  %v4347_v17 = vpop.xlane.xlu0 %4346  ;;  %v13880_v59 = vld [vmem:[#allocation36_spill] sm:$0xff]  ;;  %v10353_v21 = vunpack.i.h.bf16 %v13882_v35 }
 0x5b9   : > { %9440 = vmatprep.mubr.msk.f32.mxu1 %vm3921_vm3, %v4564_v31  ;;  %10633 = vrcp.f32 %v4341_v28  ;;  %v10333_v29 = vunpack.i.h.bf16 %v13880_v59  ;;  %v10332_v42 = vunpack.i.l.bf16 %v13880_v59 }
 0x5ba   : > { %9441 = vmatmul.mubr.msk.f32.vlgmr.msra.gmra.mrb[48].mxu1 %vm3921_vm3, %v4565_v18  ;;  %v10626_v12 = vpop.eup %10625 }
 0x5bb   : > { %9960 = vmatpush3.bf16.msra.mxu1 %v12220_v3  ;;  %9454 = vmatprep.mubr.msk.f32.mxu1 %vm3921_vm3, %v4568_v44  ;;  %v4335_v32 = vpop.xlane.xlu1 %4334  ;;  %v4567_v3 = vmul.f32 %v10626_v12, %v12254_v7  ;;  %v10352_v44 = vunpack.i.l.bf16 %v13882_v35  ;;  %v9969_v59 = vpack.c.bf16 %v10333_v29, %v10332_v42  ;;  %v13883_v7 = vld [vmem:[#allocation3_spill] sm:$0xff] }
 0x5bc   : > { %9966 = vmatprep.subr.bf16.mxu1 %v9965_v10  ;;  %10635 = vrcp.f32 %v4335_v32  ;;  %v13887_v35 = vld [vmem:[#allocation35_spill] sm:$0xff] }
 0x5be   : > { %v10628_v56 = vpop.eup %10627 }
 0x5bf   : > { %v12484_v31 = vpop.f32.mrb[46].mxu1  ;;  %v4353_v30 = vpop.xlane.xlu0 %4352  ;;  %v4566_v18 = vmul.f32 %v10628_v56, %v12261_v4 }
 0x5c0   : > { %13881 = vst [vmem:[#allocation30_spill] sm:$0xff] %v12484_v31  ;;  %v4332_v28 = vpop.xlane.xlu1 %4331  ;;  %v12487_v2 = vpop.f32.mrb[47].mxu1 }
 0x5c1   : > { %10637 = vrcp.f32 %v4332_v28  ;;  %9447 = vmatprep.mubr.msk.f32.mxu0 %vm3921_vm3, %v4566_v18  ;;  %v10630_v45 = vpop.eup %10629 }
 0x5c2   : > { %10639 = vrcp.f32 %v4347_v17  ;;  %9448 = vmatmul.mubr.msk.f32.vlgmr.msra.gmra.mrb[34].mxu0 %vm3921_vm3, %v4567_v3  ;;  %v10632_v31 = vpop.eup %10631  ;;  %v4572_v18 = vmul.f32 %v10630_v45, %v12188_v24  ;;  %v13884_v17 = vld [vmem:[#allocation37_spill] sm:$0xff]  ;;  %v13886_v24 = vld [vmem:[#allocation10_spill] sm:$0xff] }
 0x5c3   : > { %10641 = vrcp.f32 %v4353_v30  ;;  %9964 = vmatpush3.bf16.msra.mxu0 %v9961_v15  ;;  %v4350_v4 = vpop.xlane.xlu0 %4349  ;;  %v4569_v12 = vmul.f32 %v10632_v31, %v12266_v34  ;;  %v10634_v56 = vpop.eup %10633  ;;  %v10343_v28 = vunpack.i.h.bf16 %v13884_v17  ;;  %v10342_v29 = vunpack.i.l.bf16 %v13884_v17  ;;  %v13885_v30 = vld [vmem:[#allocation11_spill] sm:$0xff] }
 0x5c4   : > { %10643 = vrcp.f32 %v4350_v4  ;;  %9970 = vmatprep.subr.bf16.mxu0 %v9969_v59  ;;  %v4344_v32 = vpop.xlane.xlu1 %4343  ;;  %v9973_v15 = vpack.c.bf16 %v10353_v21, %v10352_v44  ;;  %v4573_v34 = vmul.f32 %v10634_v56, %v12180_v19  ;;  %v10338_v21 = vunpack.i.h.bf16 %v13887_v35  ;;  %v13888_v19 = vld [vmem:[#allocation13_spill] sm:$0xff]  ;;  %v13889_v17 = vld [vmem:[#allocation39_spill] sm:$0xff] }
 0x5c5   : > { %10440 = vrot.lane.b32.xlu1 %v13883_v7, %s10900_s19  ;;  %10645 = vrcp.f32 %v4344_v32  ;;  %9455 = vmatmul.mubr.msk.f32.vlgmr.msra.gmra.mrb[50].mxu1 %vm3921_vm3, %v4569_v12  ;;  %v9981_v3 = vpack.c.bf16 %v10343_v28, %v10342_v29  ;;  %v10348_v28 = vunpack.i.h.bf16 %v13889_v17  ;;  %v10347_v29 = vunpack.i.l.bf16 %v13889_v17 }
 0x5c6   : > { %9968 = vmatpush3.bf16.msra.mxu1 %v9965_v10  ;;  %9468 = vmatprep.mubr.msk.f32.mxu1 %vm3921_vm3, %v4572_v18  ;;  %v10636_v31 = vpop.eup %10635  ;;  %v10337_v10 = vunpack.i.l.bf16 %v13887_v35  ;;  %v13892_v35 = vld [vmem:[#allocation16_spill] sm:$0xff] }
 0x5c7   : > { %v4359_v42 = vpop.xlane.xlu0 %4358  ;;  %9974 = vmatprep.subr.bf16.mxu1 %v9973_v15  ;;  %v4571_v12 = vmul.f32 %v10636_v31, %v12277_v1 }
 0x5c8   : > { %10647 = vrcp.f32 %v4359_v42 }
 0x5c9   : > { %10450 = vrot.lane.b32.xlu1 %v13885_v30, %s10900_s19  ;;  %9469 = vmatmul.mubr.msk.f32.vlgmr.msra.gmra.mrb[52].mxu1 %vm3921_vm3, %v4573_v34 }
 0x5ca   : > { %10435 = vrot.lane.b32.xlu0 %v13886_v24, %s10900_s19  ;;  %9976 = vmatpush3.bf16.msra.mxu1 %v9973_v15  ;;  %v9977_v15 = vpack.c.bf16 %v10338_v21, %v10337_v10 }
 0x5cb   : > { %v10638_v45 = vpop.eup %10637  ;;  %v4356_v44 = vpop.xlane.xlu0 %4355  ;;  %9982 = vmatprep.subr.bf16.mxu1 %v9981_v3 }
 0x5cc   : > { %v10640_v4 = vpop.eup %10639  ;;  %10649 = vrcp.f32 %v4356_v44  ;;  %v4570_v32 = vmul.f32 %v10638_v45, %v12286_v22  ;;  %v13890_v22 = vld [vmem:[#allocation14_spill] sm:$0xff] }
 0x5cd   : > { %10460 = vrot.lane.b32.xlu1 %v13888_v19, %s10900_s19  ;;  %v10642_v7 = vpop.eup %10641  ;;  %v4575_v31 = vmul.f32 %v10640_v4, %v12271_v36 }
 0x5ce   : > { %v10644_v56 = vpop.eup %10643  ;;  %9461 = vmatprep.mubr.msk.f32.mxu0 %vm3921_vm3, %v4570_v32  ;;  %v4577_v34 = vmul.f32 %v10642_v7, %v12291_v40 }
 0x5cf   : > { %v10646_v18 = vpop.eup %10645  ;;  %9462 = vmatmul.mubr.msk.f32.vlgmr.msra.gmra.mrb[36].mxu0 %vm3921_vm3, %v4571_v12  ;;  %v4365_v42 = vpop.xlane.xlu1 %4364  ;;  %v4576_v30 = vmul.f32 %v10644_v56, %v12301_v51  ;;  %v9985_v51 = vpack.c.bf16 %v10348_v28, %v10347_v29  ;;  %v13893_v12 = vld [vmem:[#allocation40_spill] sm:$0xff] }
 0x5d0   : > { %9972 = vmatpush3.bf16.msra.mxu0 %v9969_v59  ;;  %v4574_v1 = vmul.f32 %v10646_v18, %v12298_v58  ;;  %10651 = vrcp.f32 %v4365_v42  ;;  %v13891_v58 = vld [vmem:[#allocation15_spill] sm:$0xff] }
 0x5d1   : > { %10465 = vrot.lane.b32.xlu1 %v13890_v22, %s10900_s19  ;;  %9978 = vmatprep.subr.bf16.mxu0 %v9977_v15 }
 0x5d2   : > { %9482 = vmatprep.mubr.msk.f32.mxu1 %vm3921_vm3, %v4576_v30  ;;  %9475 = vmatprep.mubr.msk.f32.mxu0 %vm3921_vm3, %v4574_v1  ;;  %v10648_v40 = vpop.eup %10647 }
 0x5d3   : > { %9483 = vmatmul.mubr.msk.f32.vlgmr.msra.gmra.mrb[54].mxu1 %vm3921_vm3, %v4577_v34  ;;  %9476 = vmatmul.mubr.msk.f32.vlgmr.msra.gmra.mrb[38].mxu0 %vm3921_vm3, %v4575_v31  ;;  %v4362_v59 = vpop.xlane.xlu1 %4361  ;;  %v4579_v21 = vmul.f32 %v10648_v40, %v12312_v20  ;;  %v10855_v20 = vld [vmem:[%s13756_s8] sm:$0xff] }
 0x5d4   : > { %9984 = vmatpush3.bf16.msra.mxu1 %v9981_v3  ;;  %9980 = vmatpush3.bf16.msra.mxu0 %v9977_v15  ;;  %10653 = vrcp.f32 %v4362_v59  ;;  %v12544_v56 = vadd.f32 %v10855_v20, %v13893_v12 }
 0x5d5   : > { %10470 = vrot.lane.b32.xlu1 %v13891_v58, %s10900_s19  ;;  %9986 = vmatprep.subr.bf16.mxu0 %v9985_v51 }
 0x5d6   : > { %v10650_v24 = vpop.eup %10649  ;;  %v4018_v1 = vsel %vm3921_vm3, %v12544_v56, -inf }
 0x5d7   : > { %v4371_v45 = vpop.xlane.xlu1 %4370  ;;  %v4578_v36 = vmul.f32 %v10650_v24, %v12319_v0  ;;  %v10857_v24 = vld [vmem:[%s13756_s8 + $0x28] sm:$0xff] }
 0x5d8   : > { %10655 = vrcp.f32 %v4371_v45  ;;  %v13895_v45 = vld [vmem:[#allocation43_spill] sm:$0xff] }
 0x5d9   : > { %10475 = vrot.lane.b32.xlu1 %v13892_v35, %s10900_s19  ;;  %9489 = vmatprep.mubr.msk.f32.mxu0 %vm3921_vm3, %v4578_v36  ;;  %v12562_v36 = vadd.f32 %v10857_v24, %v13895_v45 }
 0x5da   : > { %9490 = vmatmul.mubr.msk.f32.vlgmr.msra.gmra.mrb[40].mxu0 %vm3921_vm3, %v4579_v21  ;;  %v10652_v44 = vpop.eup %10651 }
 0x5db   : > { %9988 = vmatpush3.bf16.msra.mxu0 %v9985_v51  ;;  %v4380_v3 = vpop.xlane.xlu0 %4379  ;;  %v4368_v10 = vpop.xlane.xlu1 %4367  ;;  %v4581_v7 = vmul.f32 %v10652_v44, %v12325_v6  ;;  %v10856_v6 = vld [vmem:[%s13756_s8 + $0x20] sm:$0xff] }
 0x5dc   : > { %10657 = vrcp.f32 %v4380_v3 }
 0x5dd   : > { %10659 = vrcp.f32 %v4368_v10 }
 0x5de   : > { %v10654_v4 = vpop.eup %10653 }
 0x5df   : > { %v4386_v19 = vpop.xlane.xlu0 %4385  ;;  %v4377_v32 = vpop.xlane.xlu1 %4376  ;;  %v4580_v0 = vmul.f32 %v10654_v4, %v12331_v62  ;;  %v13894_v62 = vld [vmem:[#allocation44_spill] sm:$0xff]  ;;  %v4033_v4 = vsel %vm3921_vm3, %v12562_v36, -inf }
 0x5e0   : > { %v12550_v42 = vadd.f32 %v10856_v6, %v13894_v62 }
 0x5e1   : > { %9496 = vmatprep.mubr.msk.f32.mxu1 %vm3921_vm3, %v4580_v0 }
 0x5e2   : > { %9497 = vmatmul.mubr.msk.f32.vlgmr.msra.gmra.mrb[56].mxu1 %vm3921_vm3, %v4581_v7  ;;  %v10656_v28 = vpop.eup %10655 }
 0x5e3   : > { %v4392_v18 = vpop.xlane.xlu0 %4391  ;;  %v4374_v17 = vpop.xlane.xlu1 %4373  ;;  %v4583_v59 = vmul.f32 %v10656_v28, %v12337_v53  ;;  %v4030_v53 = vsel %vm3921_vm3, %v12550_v42, -inf }
 0x5e4   : > { %10661 = vrcp.f32 %v4374_v17 }
 0x5e5   : > { %10663 = vrcp.f32 %v4392_v18 }
 0x5e6   : > { %v10658_v29 = vpop.eup %10657 }
 0x5e7   : > { %v10660_v15 = vpop.eup %10659  ;;  %v10421_v30 = vpop.permute.xlu0 %10420  ;;  %v4586_v58 = vmul.f32 %v10658_v29, %v12345_v16  ;;  %v10858_v16 = vld [vmem:[%s13756_s8 + $0x48] sm:$0xff] }
 0x5e8   : > { %v4383_v22 = vpop.xlane.xlu1 %4382  ;;  %v10423_v34 = vunpack.i.h.bf16 %v10421_v30  ;;  %v10422_v31 = vunpack.i.l.bf16 %v10421_v30  ;;  %v4582_v51 = vmul.f32 %v10660_v15, %v12343_v5  ;;  %v12572_v3 = vadd.f32 %v10858_v16, %v12350_v49  ;;  %v10859_v49 = vld [vmem:[%s13756_s8 + $0x68] sm:$0xff] }
 0x5e9   : > { %10665 = vrcp.f32 %v4383_v22  ;;  %4019 = vmax.xlane.f32.xlu0 %v4018_v1  ;;  %v12582_v28 = vadd.f32 %v10859_v49, %v12367_v47  ;;  %v10860_v47 = vld [vmem:[%s13756_s8 + $0x88] sm:$0xff] }
 0x5ea   : > { %9503 = vmatprep.mubr.msk.f32.mxu0 %vm3921_vm3, %v4582_v51  ;;  %v9993_v40 = vpack.c.bf16 %v10423_v34, %v10422_v31 }
 0x5eb   : > { %9504 = vmatmul.mubr.msk.f32.vlgmr.msra.gmra.mrb[42].mxu0 %vm3921_vm3, %v4583_v59  ;;  %v10426_v35 = vpop.permute.xlu0 %10425  ;;  %v4057_v6 = vsel %vm3921_vm3, %v12582_v28, -inf  ;;  %v10861_v59 = vld [vmem:[%s13756_s8 + $0xa8] sm:$0xff] }
 0x5ec   : > { %v4389_v21 = vpop.xlane.xlu1 %4388  ;;  %9517 = vmatprep.mubr.msk.f32.mxu0 %vm3921_vm3, %v4586_v58  ;;  %9994 = vmatprep.subr.bf16.mxu0 %v9993_v40  ;;  %v10428_v62 = vunpack.i.h.bf16 %v10426_v35 }
 0x5ed   : > { %4031 = vmax.xlane.f32.xlu0 %v4030_v53  ;;  %9996 = vmatpush3.bf16.msra.mxu0 %v9993_v40 }
 0x5ee   : > { %v10662_v5 = vpop.eup %10661 }
 0x5ef   : > { %v10431_v10 = vpop.permute.xlu0 %10430  ;;  %v4584_v20 = vmul.f32 %v10662_v5, %v12363_v43  ;;  %v10664_v12 = vpop.eup %10663  ;;  %v4045_v43 = vsel %vm3921_vm3, %v12572_v3, -inf  ;;  %v10863_v5 = vld [vmem:[%s13756_s8 + $0xe8] sm:$0xff] }
 0x5f0   : > { %v4395_v44 = vpop.xlane.xlu1 %4394  ;;  %v10433_v0 = vunpack.i.h.bf16 %v10431_v10  ;;  %v10432_v7 = vunpack.i.l.bf16 %v10431_v10  ;;  %v13896_v10 = vld [vmem:[#allocation5_spill] sm:$0xff] }
 0x5f1   : > { %10667 = vrcp.f32 %v4395_v44  ;;  %4034 = vmax.xlane.f32.xlu0 %v4033_v4  ;;  %9510 = vmatprep.mubr.msk.f32.mxu1 %vm3921_vm3, %v4584_v20 }
 0x5f2   : > { %10669 = vrcp.f32 %v4377_v32  ;;  %v10001_v17 = vpack.c.bf16 %v10433_v0, %v10432_v7  ;;  %v4590_v32 = vmul.f32 %v10664_v12, %v12365_v61  ;;  %v10427_v61 = vunpack.i.l.bf16 %v10426_v35  ;;  %v10862_v35 = vld [vmem:[%s13756_s8 + $0xc8] sm:$0xff] }
 0x5f3   : > { %v10666_v18 = vpop.eup %10665  ;;  %10671 = vrcp.f32 %v4386_v19  ;;  %v12596_v19 = vadd.f32 %v10860_v47, %v12385_v52  ;;  %v12605_v52 = vadd.f32 %v10861_v59, %v12395_v33  ;;  %v12615_v33 = vadd.f32 %v10862_v35, %v12401_v39 }
 0x5f4   : > { %v12584_v29 = vpop.xlane.xlu1 %4400  ;;  %v4587_v15 = vmul.f32 %v10666_v18, %v12373_v48  ;;  %10002 = vmatprep.subr.bf16.mxu0 %v10001_v17  ;;  %10673 = vrcp.f32 %v4389_v21  ;;  %v9997_v40 = vpack.c.bf16 %v10428_v62, %v10427_v61  ;;  %v12627_v39 = vadd.f32 %v10863_v5, %v12407_v26 }
 0x5f5   : > { %4046 = vmax.xlane.f32.xlu0 %v4045_v43  ;;  %v4069_v58 = vsel %vm3921_vm3, %v12596_v19, -inf  ;;  %v4081_v21 = vsel %vm3921_vm3, %v12605_v52, -inf  ;;  %v4093_v16 = vsel %vm3921_vm3, %v12615_v33, -inf }
 0x5f6   : > { %9518 = vmatmul.mubr.msk.f32.vlgmr.msra.gmra.mrb[44].mxu0 %vm3921_vm3, %v4587_v15 }
 0x5f7   : > { %10004 = vmatpush3.bf16.msra.mxu0 %v10001_v17  ;;  %9531 = vmatprep.mubr.msk.f32.mxu0 %vm3921_vm3, %v4590_v32 }
 0x5f8   : > { %v10416_v48 = vpop.permute.xlu1 %10415 }
 0x5f9   : > { %v10418_v30 = vunpack.i.h.bf16 %v10416_v48  ;;  %v10417_v22 = vunpack.i.l.bf16 %v10416_v48  ;;  %4058 = vmax.xlane.f32.xlu0 %v4057_v6 }
 0x5fb   : > { %v10668_v1 = vpop.eup %10667  ;;  %v9989_v34 = vpack.c.bf16 %v10418_v30, %v10417_v22 }
 0x5fc   : > { %v10670_v31 = vpop.eup %10669  ;;  %v4591_v51 = vmul.f32 %v10668_v1, %v12389_v57 }
 0x5fd   : > { %9990 = vmatprep.subr.bf16.mxu1 %v9989_v34  ;;  %v10672_v24 = vpop.eup %10671  ;;  %4070 = vmax.xlane.f32.xlu0 %v4069_v58  ;;  %v4585_v57 = vmul.f32 %v10670_v31, %v12348_v41 }
 0x5fe   : > { %9992 = vmatpush3.bf16.msra.mxu1 %v9989_v34  ;;  %9532 = vmatmul.mubr.msk.f32.vlgmr.msra.gmra.mrb[46].mxu0 %vm3921_vm3, %v4591_v51  ;;  %v10674_v45 = vpop.eup %10673  ;;  %v4588_v53 = vmul.f32 %v10672_v24, %v12356_v46  ;;  %v4105_v46 = vsel %vm3921_vm3, %v12627_v39, -inf }
 0x5ff   : > { %9998 = vmatprep.subr.bf16.mxu1 %v9997_v40  ;;  %v4589_v41 = vmul.f32 %v10674_v45, %v12379_v27  ;;  %v13897_v27 = vld [vmem:[#allocation12_spill] sm:$0xff] }
 0x601   : > { %9511 = vmatmul.mubr.msk.f32.vlgmr.msra.gmra.mrb[58].mxu1 %vm3921_vm3, %v4585_v57  ;;  %4082 = vmax.xlane.f32.xlu0 %v4081_v21 }
 0x602   : > { %10000 = vmatpush3.bf16.msra.mxu1 %v9997_v40  ;;  %9524 = vmatprep.mubr.msk.f32.mxu1 %vm3921_vm3, %v4588_v53 }
 0x605   : > { %9525 = vmatmul.mubr.msk.f32.vlgmr.msra.gmra.mrb[60].mxu1 %vm3921_vm3, %v4589_v41  ;;  %4094 = vmax.xlane.f32.xlu0 %v4093_v16 }
 0x609   : > { %4106 = vmax.xlane.f32.xlu0 %v4105_v46 }
 0x61f   : > { %10445 = vrot.lane.b32.xlu0 %v13896_v10, %s10900_s19 }
 0x623   : > { %10455 = vrot.lane.b32.xlu0 %v13897_v27, %s10900_s19 }
 0x629   : > { %v4023_v44 = vpop.xlane.xlu1 %4022 }
 0x62a   : > { %v4147_v26 = vsub.f32 %v12413_v63, %v4023_v44 }
 0x62c   : > { %v4244_v0 = vmul.f32 1.442695, %v4147_v26 }
 0x62d   : > { %v4044_v4 = vpop.xlane.xlu1 %4043 }
 0x62e   : > { %10675 = vpow2.f32 %v4244_v0  ;;  %v4154_v59 = vsub.f32 %v12416_v9, %v4044_v4 }
 0x62f   : > { %10677 = vrcp.f32 %v12584_v29 }
 0x630   : > { %v4258_v57 = vmul.f32 1.442695, %v4154_v59 }
 0x631   : > { %v4056_v7 = vpop.xlane.xlu1 %4055 }
 0x632   : > { %v4158_v45 = vsub.f32 %v12421_v23, %v4056_v7 }
 0x634   : > { %v4266_v53 = vmul.f32 1.442695, %v4158_v45 }
 0x635   : > { %v4068_v20 = vpop.xlane.xlu1 %4067 }
 0x638   : > { %v12641_v17 = vpop.eup %10675 }
 0x639   : > { %v4080_v12 = vpop.xlane.xlu1 %4079  ;;  %v4405_v43 = vsel %vm3921_vm3, %v12641_v17, 0.0  ;;  %v10678_v22 = vpop.eup %10677 }
 0x63a   : > { %v4593_v34 = vmul.f32 %v10678_v22, %v12393_v13  ;;  %v4166_v46 = vsub.f32 %v12436_v55, %v4080_v12 }
 0x63c   : > { %v4282_v26 = vmul.f32 1.442695, %v4166_v46 }
 0x63d   : > { %v12639_v18 = vpop.xlane.xlu1 %4091 }
 0x641   : > { %v12643_v49 = vpop.xlane.xlu1 %4103  ;;  %v4398_v15 = vpop.xlane.xlu0 %4397 }
 0x642   : > { %10679 = vrcp.f32 %v4398_v15  ;;  %4406 = vadd.xlane.f32.xlu0 %v4405_v43 }
 0x645   : > { %v10441_v63 = vpop.permute.xlu1 %10440  ;;  %v10436_v48 = vpop.permute.xlu0 %10435 }
 0x646   : > { %v10443_v32 = vunpack.i.h.bf16 %v10441_v63  ;;  %v10442_v47 = vunpack.i.l.bf16 %v10441_v63  ;;  %v10438_v6 = vunpack.i.h.bf16 %v10436_v48  ;;  %v10437_v62 = vunpack.i.l.bf16 %v10436_v48 }
 0x648   : > { %v10009_v61 = vpack.c.bf16 %v10443_v32, %v10442_v47  ;;  %v10005_v30 = vpack.c.bf16 %v10438_v6, %v10437_v62  ;;  %v4170_v6 = vsub.f32 %v12447_v11, %v12639_v18 }
 0x64a   : > { %10010 = vmatprep.subr.bf16.mxu0 %v10009_v61  ;;  %10006 = vmatprep.subr.bf16.mxu1 %v10005_v30 }
 0x64b   : > { %10012 = vmatpush3.bf16.msra.mxu0 %v10009_v61  ;;  %10008 = vmatpush3.bf16.msra.mxu1 %v10005_v30 }
 0x64c   : > { %v10680_v29 = vpop.eup %10679 }
 0x64d   : > { %v4592_v1 = vmul.f32 %v10680_v29, %v12463_v60 }
 0x64f   : > { %9538 = vmatprep.mubr.msk.f32.mxu1 %vm3921_vm3, %v4592_v1 }
 0x650   : > { %9539 = vmatmul.mubr.msk.f32.vlgmr.msra.gmra.mrb[62].mxu1 %vm3921_vm3, %v4593_v34  ;;  %v4290_v34 = vmul.f32 1.442695, %v4170_v6 }
 0x676   : > { %v4020_v31 = vpop.xlane.xlu0 %4019 }
 0x677   : > { %v4146_v51 = vsub.f32 %v12544_v56, %v4020_v31  ;;  %v4162_v56 = vsub.f32 %v12430_v50, %v4068_v20 }
 0x679   : > { %v4242_v58 = vmul.f32 1.442695, %v4146_v51  ;;  %v4274_v23 = vmul.f32 1.442695, %v4162_v56 }
 0x67a   : > { %v4032_v40 = vpop.xlane.xlu0 %4031 }
 0x67b   : > { %10681 = vpow2.f32 %v4242_v58  ;;  %v4150_v24 = vsub.f32 %v12550_v42, %v4032_v40 }
 0x67d   : > { %v4250_v60 = vmul.f32 1.442695, %v4150_v24 }
 0x67e   : > { %v4035_v35 = vpop.xlane.xlu0 %4034 }
 0x67f   : > { %10683 = vpow2.f32 %v4250_v60  ;;  %v4151_v13 = vsub.f32 %v12562_v36, %v4035_v35 }
 0x680   : > { %v12657_v21 = vpop.f32.mrb[32].mxu0  ;;  %10685 = vpow2.f32 %v4258_v57 }
 0x681   : > { %v4252_v9 = vmul.f32 1.442695, %v4151_v13  ;;  %v12660_v41 = vpop.f32.mrb[33].mxu0 }
 0x682   : > { %v4047_v5 = vpop.xlane.xlu0 %4046 }
 0x683   : > { %10687 = vpow2.f32 %v4252_v9  ;;  %v4155_v42 = vsub.f32 %v12572_v3, %v4047_v5  ;;  %v4174_v3 = vsub.f32 %v12454_v8, %v12643_v49 }
 0x684   : > { %10689 = vpow2.f32 %v4266_v53 }
 0x685   : > { %v12663_v16 = vpop.eup %10681  ;;  %v4260_v36 = vmul.f32 1.442695, %v4155_v42  ;;  %v4298_v12 = vmul.f32 1.442695, %v4174_v3 }
 0x686   : > { %v4059_v10 = vpop.xlane.xlu0 %4058  ;;  %v4402_v27 = vsel %vm3921_vm3, %v12663_v16, 0.0 }
 0x687   : > { %10691 = vpow2.f32 %v4260_v36  ;;  %v4159_v50 = vsub.f32 %v12582_v28, %v4059_v10  ;;  %4403 = vadd.xlane.f32.xlu1 %v4402_v27 }
 0x688   : > { %10693 = vpow2.f32 %v4274_v23 }
 0x689   : > { %v12669_v44 = vpop.eup %10683  ;;  %v4268_v4 = vmul.f32 1.442695, %v4159_v50 }
 0x68a   : > { %v4071_v0 = vpop.xlane.xlu0 %4070  ;;  %v4414_v55 = vsel %vm3921_vm3, %v12669_v44, 0.0  ;;  %v12675_v7 = vpop.eup %10685 }
 0x68b   : > { %10695 = vpow2.f32 %v4268_v4  ;;  %v4163_v20 = vsub.f32 %v12596_v19, %v4071_v0  ;;  %4415 = vadd.xlane.f32.xlu1 %v4414_v55  ;;  %v4426_v32 = vsel %vm3921_vm3, %v12675_v7, 0.0 }
 0x68c   : > { %10697 = vpow2.f32 %v4282_v26 }
 0x68d   : > { %v12678_v28 = vpop.eup %10687  ;;  %v4276_v15 = vmul.f32 1.442695, %v4163_v20  ;;  %v12680_v43 = vpop.f32.mrb[48].mxu1 }
 0x68e   : > { %v4083_v63 = vpop.xlane.xlu0 %4082  ;;  %v12682_v8 = vpop.f32.mrb[49].mxu1  ;;  %v4417_v49 = vsel %vm3921_vm3, %v12678_v28, 0.0 }
 0x68f   : > { %v12688_v47 = vpop.eup %10689  ;;  %10699 = vpow2.f32 %v4276_v15  ;;  %v4167_v19 = vsub.f32 %v12605_v52, %v4083_v63  ;;  %4418 = vadd.xlane.f32.xlu0 %v4417_v49  ;;  %4427 = vadd.xlane.f32.xlu1 %v4426_v32 }
 0x690   : > { %10701 = vpow2.f32 %v4298_v12  ;;  %v4438_v22 = vsel %vm3921_vm3, %v12688_v47, 0.0 }
 0x691   : > { %v12691_v48 = vpop.eup %10691  ;;  %v4284_v62 = vmul.f32 1.442695, %v4167_v19 }
 0x692   : > { %v4095_v61 = vpop.xlane.xlu0 %4094  ;;  %v4429_v30 = vsel %vm3921_vm3, %v12691_v48, 0.0  ;;  %v12699_v29 = vpop.eup %10693 }
 0x693   : > { %10703 = vpow2.f32 %v4284_v62  ;;  %v4171_v52 = vsub.f32 %v12615_v33, %v4095_v61  ;;  %4430 = vadd.xlane.f32.xlu0 %v4429_v30  ;;  %4439 = vadd.xlane.f32.xlu1 %v4438_v22  ;;  %v4450_v58 = vsel %vm3921_vm3, %v12699_v29, 0.0 }
 0x695   : > { %v12702_v1 = vpop.eup %10695  ;;  %v4292_v11 = vmul.f32 1.442695, %v4171_v52  ;;  %v12704_v18 = vpop.f32.mrb[34].mxu0 }
 0x696   : > { %v4107_v31 = vpop.xlane.xlu0 %4106  ;;  %v12706_v51 = vpop.f32.mrb[35].mxu0  ;;  %v4441_v59 = vsel %vm3921_vm3, %v12702_v1, 0.0 }
 0x697   : > { %v12712_v40 = vpop.eup %10697  ;;  %10705 = vpow2.f32 %v4292_v11  ;;  %v4175_v33 = vsub.f32 %v12627_v39, %v4107_v31  ;;  %4442 = vadd.xlane.f32.xlu0 %v4441_v59  ;;  %4451 = vadd.xlane.f32.xlu1 %v4450_v58 }
 0x698   : > { %10707 = vpow2.f32 %v4290_v34  ;;  %v12717_v45 = vpop.f32.mrb[50].mxu1  ;;  %v4462_v53 = vsel %vm3921_vm3, %v12712_v40, 0.0 }
 0x699   : > { %v12715_v24 = vpop.eup %10699  ;;  %v4300_v57 = vmul.f32 1.442695, %v4175_v33  ;;  %v12719_v60 = vpop.f32.mrb[51].mxu1 }
 0x69a   : > { %v10446_v35 = vpop.permute.xlu0 %10445  ;;  %v4453_v13 = vsel %vm3921_vm3, %v12715_v24, 0.0  ;;  %v12725_v56 = vpop.eup %10701 }
 0x69b   : > { %v10448_v39 = vunpack.i.h.bf16 %v10446_v35  ;;  %v10447_v9 = vunpack.i.l.bf16 %v10446_v35  ;;  %4454 = vadd.xlane.f32.xlu0 %v4453_v13  ;;  %4463 = vadd.xlane.f32.xlu1 %v4462_v53  ;;  %10709 = vpow2.f32 %v4300_v57  ;;  %v4486_v10 = vsel %vm3921_vm3, %v12725_v56, 0.0  ;;  %v10451_v57 = vpop.permute.xlu1 %10450 }
 0x69c   : > { %v9470_v42 = vpop.f32.mrb[52].mxu1 }
 0x69d   : > { %v12727_v5 = vpop.eup %10703  ;;  %v12729_v23 = vpack.c.bf16 %v10448_v39, %v10447_v9  ;;  %v5139_v46 = vpop.f32.mrb[53].mxu1 }
 0x69e   : > { %v4465_v36 = vsel %vm3921_vm3, %v12727_v5, 0.0  ;;  %v10456_v39 = vpop.permute.xlu0 %10455 }
 0x69f   : > { %4466 = vadd.xlane.f32.xlu0 %v4465_v36  ;;  %4487 = vadd.xlane.f32.xlu1 %v4486_v10  ;;  %v12770_v35 = vpop.permute.xlu1 %10460 }
 0x6a0   : > { %10018 = vmatprep.subr.bf16.mxu0 %v12729_v23 }
 0x6a1   : > { %v12736_v27 = vpop.eup %10705 }
 0x6a2   : > { %v9463_v50 = vpop.f32.mrb[36].mxu0  ;;  %v4477_v26 = vsel %vm3921_vm3, %v12736_v27, 0.0  ;;  %v12740_v3 = vpop.eup %10707 }
 0x6a3   : > { %v5052_v4 = vpop.f32.mrb[37].mxu0  ;;  %4478 = vadd.xlane.f32.xlu0 %v4477_v26  ;;  %v4474_v12 = vsel %vm3921_vm3, %v12740_v3, 0.0  ;;  %v12772_v13 = vpop.permute.xlu1 %10465 }
 0x6a5   : > { %v12744_v15 = vpop.eup %10709 }
 0x6a6   : > { %v9484_v0 = vpop.f32.mrb[54].mxu1  ;;  %v9477_v55 = vpop.f32.mrb[38].mxu0  ;;  %v4489_v49 = vsel %vm3921_vm3, %v12744_v15, 0.0 }
 0x6a7   : > { %v5313_v20 = vpop.f32.mrb[55].mxu1  ;;  %v5226_v63 = vpop.f32.mrb[39].mxu0  ;;  %4475 = vadd.xlane.f32.xlu0 %v4474_v12 }
 0x6a8   : > { %v12774_v53 = vpop.permute.xlu1 %10470 }
 0x6ab   : > { %4490 = vadd.xlane.f32.xlu0 %v4489_v49 }
 0x6ac   : > { %v12776_v9 = vpop.permute.xlu1 %10475 }
 0x6ad   : > { %v9491_v32 = vpop.f32.mrb[40].mxu0 }
 0x6ae   : > { %v5400_v19 = vpop.f32.mrb[41].mxu0 }
 0x6b0   : > { %7420 = vrot.lane.b32.xlu1 %v9463_v50, %s10901_s28 }
 0x6b4   : > { %7424 = vrot.lane.b32.xlu1 %v9470_v42, %s10901_s28 }
 0x6b5   : > { %v9498_v6 = vpop.f32.mrb[56].mxu1 }
 0x6b6   : > { %v5487_v62 = vpop.f32.mrb[57].mxu1 }
 0x6b8   : > { %7428 = vrot.lane.b32.xlu1 %v9477_v55, %s10901_s28  ;;  %v10452_v55 = vunpack.i.l.bf16 %v10451_v57 }
 0x6bc   : > { %7432 = vrot.lane.b32.xlu1 %v9484_v0, %s10901_s28  ;;  %v10453_v0 = vunpack.i.h.bf16 %v10451_v57 }
 0x6be   : > { %v9505_v61 = vpop.f32.mrb[42].mxu0 }
 0x6bf   : > { %v5574_v30 = vpop.f32.mrb[43].mxu0 }
 0x6c0   : > { %7452 = vrot.lane.b32.xlu1 %v9491_v32, %s10902_s29 }
 0x6c1   : > { %7418 = vrot.lane.b32.xlu0 %v5052_v4, %s10901_s28 }
 0x6c4   : > { %7456 = vrot.lane.b32.xlu1 %v9498_v6, %s10902_s29  ;;  %v10025_v6 = vpack.c.bf16 %v10453_v0, %v10452_v55  ;;  %v10473_v55 = vunpack.i.h.bf16 %v12774_v53 }
 0x6c5   : > { %7422 = vrot.lane.b32.xlu0 %v5139_v46, %s10901_s28 }
 0x6c8   : > { %7460 = vrot.lane.b32.xlu1 %v9505_v61, %s10902_s29 }
 0x6c9   : > { %v9519_v22 = vpop.f32.mrb[44].mxu0  ;;  %7426 = vrot.lane.b32.xlu0 %v5226_v63, %s10901_s28 }
 0x6ca   : > { %v5748_v52 = vpop.f32.mrb[45].mxu0 }
 0x6cd   : > { %7430 = vrot.lane.b32.xlu0 %v5313_v20, %s10901_s28 }
 0x6cf   : > { %v4407_v42 = vpop.xlane.xlu0 %4406 }
 0x6d0   : > { %10711 = vrcp.f32 %v4407_v42 }
 0x6d1   : > { %v9533_v34 = vpop.f32.mrb[46].mxu0  ;;  %7450 = vrot.lane.b32.xlu0 %v5400_v19, %s10902_s29 }
 0x6d2   : > { %v5922_v11 = vpop.f32.mrb[47].mxu0 }
 0x6d4   : > { %v9512_v31 = vpop.f32.mrb[58].mxu1 }
 0x6d5   : > { %7464 = vrot.lane.b32.xlu1 %v9512_v31, %s10902_s29  ;;  %v5661_v59 = vpop.f32.mrb[59].mxu1  ;;  %7454 = vrot.lane.b32.xlu0 %v5487_v62, %s10902_s29 }
 0x6d8   : > { %v9526_v58 = vpop.f32.mrb[60].mxu1 }
 0x6d9   : > { %7484 = vrot.lane.b32.xlu1 %v9519_v22, %s10903_s30  ;;  %v5835_v33 = vpop.f32.mrb[61].mxu1  ;;  %7458 = vrot.lane.b32.xlu0 %v5574_v30, %s10902_s29  ;;  %v10457_v22 = vunpack.i.l.bf16 %v10456_v39 }
 0x6da   : > { %v10712_v26 = vpop.eup %10711 }
 0x6db   : > { %v4595_v49 = vmul.f32 %v10712_v26, %v12641_v17  ;;  %v10458_v17 = vunpack.i.h.bf16 %v10456_v39 }
 0x6dd   : > { %7488 = vrot.lane.b32.xlu1 %v9526_v58, %s10903_s30  ;;  %7462 = vrot.lane.b32.xlu0 %v5661_v59, %s10902_s29  ;;  %v10462_v58 = vunpack.i.l.bf16 %v12770_v35 }
 0x6e1   : > { %7492 = vrot.lane.b32.xlu1 %v9533_v34, %s10903_s30  ;;  %7482 = vrot.lane.b32.xlu0 %v5748_v52, %s10903_s30 }
 0x6e5   : > { %7486 = vrot.lane.b32.xlu0 %v5835_v33, %s10903_s30  ;;  %v10033_v33 = vpack.c.bf16 %v10458_v17, %v10457_v22 }
 0x6e9   : > { %7490 = vrot.lane.b32.xlu0 %v5922_v11, %s10903_s30 }
 0x714   : > { %v4404_v46 = vpop.xlane.xlu1 %4403 }
 0x715   : > { %10713 = vrcp.f32 %v4404_v46 }
 0x718   : > { %v4416_v36 = vpop.xlane.xlu1 %4415 }
 0x719   : > { %10715 = vrcp.f32 %v4416_v36  ;;  %v10468_v36 = vunpack.i.h.bf16 %v12772_v13 }
 0x71c   : > { %v4419_v10 = vpop.xlane.xlu0 %4418  ;;  %v4428_v50 = vpop.xlane.xlu1 %4427 }
 0x71d   : > { %10717 = vrcp.f32 %v4419_v10 }
 0x71e   : > { %10719 = vrcp.f32 %v4428_v50 }
 0x71f   : > { %v10714_v4 = vpop.eup %10713 }
 0x720   : > { %v4431_v20 = vpop.xlane.xlu0 %4430  ;;  %v4440_v12 = vpop.xlane.xlu1 %4439  ;;  %v4594_v63 = vmul.f32 %v10714_v4, %v12663_v16 }
 0x721   : > { %10721 = vrcp.f32 %v4431_v20 }
 0x722   : > { %10723 = vrcp.f32 %v4440_v12  ;;  %9545 = vmatprep.mubr.msk.f32.mxu0 %vm3921_vm3, %v4594_v63 }
 0x723   : > { %v10716_v32 = vpop.eup %10715  ;;  %v9540_v19 = vpop.f32.mrb[62].mxu1  ;;  %9546 = vmatmul.mubr.msk.f32.vlgmr.msra.gmra.mrb[48].mxu0 %vm3921_vm3, %v4595_v49 }
 0x724   : > { %10020 = vmatpush3.bf16.msra.mxu0 %v12729_v23  ;;  %v4443_v62 = vpop.xlane.xlu0 %4442  ;;  %v4452_v61 = vpop.xlane.xlu1 %4451  ;;  %7496 = vrot.lane.b32.xlu1 %v9540_v19, %s10903_s30  ;;  %v4598_v30 = vmul.f32 %v10716_v32, %v12669_v44  ;;  %v10463_v44 = vunpack.i.h.bf16 %v12770_v35  ;;  %v10467_v35 = vunpack.i.l.bf16 %v12772_v13  ;;  %v10472_v13 = vunpack.i.l.bf16 %v12774_v53 }
 0x725   : > { %10725 = vrcp.f32 %v4443_v62  ;;  %10026 = vmatprep.subr.bf16.mxu0 %v10025_v6  ;;  %v6009_v16 = vpop.f32.mrb[63].mxu1  ;;  %v10478_v53 = vunpack.i.h.bf16 %v12776_v9  ;;  %v10477_v19 = vunpack.i.l.bf16 %v12776_v9 }
 0x726   : > { %10727 = vrcp.f32 %v4452_v61  ;;  %7494 = vrot.lane.b32.xlu0 %v6009_v16, %s10903_s30  ;;  %9559 = vmatprep.mubr.msk.f32.mxu0 %vm3921_vm3, %v4598_v30  ;;  %v10041_v10 = vpack.c.bf16 %v10463_v44, %v10462_v58  ;;  %v10049_v20 = vpack.c.bf16 %v10468_v36, %v10467_v35 }
 0x727   : > { %v10718_v52 = vpop.eup %10717 }
 0x728   : > { %v10720_v34 = vpop.eup %10719  ;;  %v4455_v11 = vpop.xlane.xlu0 %4454  ;;  %v4599_v31 = vmul.f32 %v10718_v52, %v12678_v28  ;;  %v7691_v52 = vld [vmem:[%s13754_s6] sm:$0xff] }
 0x729   : > { %v4464_v23 = vpop.xlane.xlu1 %4463  ;;  %10729 = vrcp.f32 %v4455_v11  ;;  %v4602_v59 = vmul.f32 %v10720_v34, %v12675_v7  ;;  %v10864_v11 = vld [vmem:[%s13756_s8 + $0x10] sm:$0xff] }
 0x72a   : > { %10731 = vrcp.f32 %v4464_v23  ;;  %9560 = vmatmul.mubr.msk.f32.vlgmr.msra.gmra.mrb[50].mxu0 %vm3921_vm3, %v4599_v31  ;;  %v12833_v23 = vadd.f32 %v10864_v11, %v12288_v37  ;;  %v7694_v37 = vld [vmem:[%s13754_s6 + $0x18] sm:$0xff]  ;;  %v13903_v11 = vld [vmem:[#allocation27_spill] sm:$0xff] }
 0x72b   : > { %v10722_v57 = vpop.eup %10721  ;;  %10028 = vmatpush3.bf16.msra.mxu0 %v10025_v6  ;;  %9573 = vmatprep.mubr.msk.f32.mxu0 %vm3921_vm3, %v4602_v59  ;;  %v10057_v6 = vpack.c.bf16 %v10473_v55, %v10472_v13  ;;  %v10869_v13 = vld [vmem:[%s13756_s8 + $0x70] sm:$0xff] }
 0x72c   : > { %v10724_v39 = vpop.eup %10723  ;;  %10034 = vmatprep.subr.bf16.mxu0 %v10033_v33  ;;  %v4467_v42 = vpop.xlane.xlu0 %4466  ;;  %v4603_v28 = vmul.f32 %v10722_v57, %v12691_v48 }
 0x72d   : > { %v4488_v46 = vpop.xlane.xlu1 %4487  ;;  %10733 = vrcp.f32 %v4467_v42  ;;  %v4606_v7 = vmul.f32 %v10724_v39, %v12688_v47  ;;  %v7693_v39 = vld [vmem:[%s13754_s6 + $0x10] sm:$0xff] }
 0x72e   : > { %9574 = vmatmul.mubr.msk.f32.vlgmr.msra.gmra.mrb[52].mxu0 %vm3921_vm3, %v4603_v28  ;;  %10735 = vrcp.f32 %v4488_v46  ;;  %v10077_v35 = vpack.c.bf16 %v7694_v37, %v7693_v39 }
 0x72f   : > { %v10726_v50 = vpop.eup %10725  ;;  %10036 = vmatpush3.bf16.msra.mxu0 %v10033_v33  ;;  %9587 = vmatprep.mubr.msk.f32.mxu0 %vm3921_vm3, %v4606_v7  ;;  %v4024_v7 = vsel %vm3921_vm3, %v12833_v23, -inf }
 0x730   : > { %v10728_v26 = vpop.eup %10727  ;;  %10042 = vmatprep.subr.bf16.mxu0 %v10041_v10  ;;  %v4479_v4 = vpop.xlane.xlu0 %4478  ;;  %v4607_v48 = vmul.f32 %v10726_v50, %v12702_v1 }
 0x731   : > { %v12799_v0 = vpop.permute.xlu1 %7420  ;;  %v4610_v47 = vmul.f32 %v10728_v26, %v12699_v29  ;;  %10737 = vrcp.f32 %v4479_v4  ;;  %v13899_v4 = vld [vmem:[#allocation2_spill] sm:$0xff] }
 0x732   : > { %9588 = vmatmul.mubr.msk.f32.vlgmr.msra.gmra.mrb[54].mxu0 %vm3921_vm3, %v4607_v48 }
 0x733   : > { %v10730_v12 = vpop.eup %10729  ;;  %10044 = vmatpush3.bf16.msra.mxu0 %v10041_v10  ;;  %9601 = vmatprep.mubr.msk.f32.mxu0 %vm3921_vm3, %v4610_v47  ;;  %v13898_v10 = vld [vmem:[#allocation33_spill] sm:$0xff] }
 0x734   : > { %v10732_v63 = vpop.eup %10731  ;;  %10050 = vmatprep.subr.bf16.mxu0 %v10049_v20  ;;  %v4476_v49 = vpop.xlane.xlu0 %4475  ;;  %v4611_v29 = vmul.f32 %v10730_v12, %v12715_v24 }
 0x735   : > { %v12807_v32 = vpop.permute.xlu1 %7424  ;;  %10739 = vrcp.f32 %v4476_v49  ;;  %v4614_v1 = vmul.f32 %v10732_v63, %v12712_v40  ;;  %v10065_v40 = vpack.c.bf16 %v10478_v53, %v10477_v19 }
 0x736   : > { %9602 = vmatmul.mubr.msk.f32.vlgmr.msra.gmra.mrb[56].mxu0 %vm3921_vm3, %v4611_v29  ;;  %v10870_v29 = vld [vmem:[%s13756_s8 + $0x58] sm:$0xff] }
 0x737   : > { %v10734_v62 = vpop.eup %10733  ;;  %10052 = vmatpush3.bf16.msra.mxu0 %v10049_v20  ;;  %9615 = vmatprep.mubr.msk.f32.mxu0 %vm3921_vm3, %v4614_v1  ;;  %v13900_v20 = vld [vmem:[#allocation23_spill] sm:$0xff]  ;;  %v13901_v1 = vld [vmem:[#allocation21_spill] sm:$0xff] }
 0x738   : > { %10058 = vmatprep.subr.bf16.mxu0 %v10057_v6  ;;  %v4491_v61 = vpop.xlane.xlu0 %4490  ;;  %v4615_v24 = vmul.f32 %v10734_v62, %v12727_v5  ;;  %v10736_v17 = vpop.eup %10735  ;;  %v7692_v5 = vld [vmem:[%s13754_s6 + $0x8] sm:$0xff]  ;;  %v12893_v12 = vadd.f32 %v10869_v13, %v13900_v20  ;;  %v12903_v53 = vadd.f32 %v10870_v29, %v13901_v1  ;;  %v10871_v62 = vld [vmem:[%s13756_s8 + $0x90] sm:$0xff]  ;;  %v10878_v20 = vld [vmem:[%s13756_s8 + $0xd8] sm:$0xff] }
 0x739   : > { %v12815_v30 = vpop.permute.xlu1 %7428  ;;  %10741 = vrcp.f32 %v4491_v61  ;;  %v10073_v33 = vpack.c.bf16 %v7692_v5, %v7691_v52  ;;  %v4622_v57 = vmul.f32 %v10736_v17, %v12725_v56  ;;  %v10866_v56 = vld [vmem:[%s13756_s8 + $0x30] sm:$0xff]  ;;  %v12911_v61 = vadd.f32 %v10871_v62, %v12442_v54  ;;  %v13902_v17 = vld [vmem:[#allocation22_spill] sm:$0xff] }
 0x73a   : > { %9616 = vmatmul.mubr.msk.f32.vlgmr.msra.gmra.mrb[58].mxu0 %vm3921_vm3, %v4615_v24  ;;  %v12860_v46 = vadd.f32 %v10866_v56, %v12309_v14  ;;  %v10867_v14 = vld [vmem:[%s13756_s8 + $0x50] sm:$0xff]  ;;  %v4060_v24 = vsel %vm3921_vm3, %v12893_v12, -inf  ;;  %v4051_v5 = vsel %vm3921_vm3, %v12903_v53, -inf }
 0x73b   : > { %10060 = vmatpush3.bf16.msra.mxu0 %v10057_v6  ;;  %v10738_v22 = vpop.eup %10737  ;;  %v12874_v50 = vadd.f32 %v10867_v14, %v13898_v10  ;;  %v10873_v54 = vld [vmem:[%s13756_s8 + $0xb0] sm:$0xff]  ;;  %v13905_v14 = vld [vmem:[#allocation31_spill] sm:$0xff] }
 0x73c   : > { %10066 = vmatprep.subr.bf16.mxu0 %v10065_v40  ;;  %v12819_v9 = vpop.permute.xlu0 %7418  ;;  %v4619_v58 = vmul.f32 %v10738_v22, %v12736_v27  ;;  %v4036_v55 = vsel %vm3921_vm3, %v12860_v46, -inf }
 0x73d   : > { %v12821_v16 = vpop.permute.xlu1 %7432  ;;  %v4048_v49 = vsel %vm3921_vm3, %v12874_v50, -inf }
 0x73f   : > { %v10740_v34 = vpop.eup %10739 }
 0x740   : > { %v12835_v31 = vpop.permute.xlu0 %7422  ;;  %v4618_v44 = vmul.f32 %v10740_v34, %v12740_v3  ;;  %v10865_v3 = vld [vmem:[%s13756_s8 + $0x18] sm:$0xff] }
 0x741   : > { %v12837_v59 = vpop.permute.xlu1 %7452  ;;  %v12853_v27 = vadd.f32 %v10865_v3, %v12282_v38  ;;  %v10875_v3 = vld [vmem:[%s13756_s8 + $0xd0] sm:$0xff] }
 0x742   : > { %9629 = vmatprep.mubr.msk.f32.mxu0 %vm3921_vm3, %v4618_v44  ;;  %v12929_v44 = vadd.f32 %v10873_v54, %v13903_v11  ;;  %v12945_v56 = vadd.f32 %v10875_v3, %v12474_v25  ;;  %v10877_v25 = vld [vmem:[%s13756_s8 + $0xf0] sm:$0xff] }
 0x743   : > { %v10742_v42 = vpop.eup %10741  ;;  %9630 = vmatmul.mubr.msk.f32.vlgmr.msra.gmra.mrb[60].mxu0 %vm3921_vm3, %v4619_v58  ;;  %v4027_v26 = vsel %vm3921_vm3, %v12853_v27, -inf  ;;  %v4072_v58 = vsel %vm3921_vm3, %v12911_v61, -inf }
 0x744   : > { %10068 = vmatpush3.bf16.msra.mxu0 %v10065_v40  ;;  %v12862_v28 = vpop.permute.xlu0 %7426  ;;  %9643 = vmatprep.mubr.msk.f32.mxu0 %vm3921_vm3, %v4622_v57  ;;  %v4623_v38 = vmul.f32 %v10742_v42, %v12744_v15  ;;  %v10868_v15 = vld [vmem:[%s13756_s8 + $0x38] sm:$0xff]  ;;  %v4096_v13 = vsel %vm3921_vm3, %v12945_v56, -inf }
 0x745   : > { %v12868_v36 = vpop.permute.xlu1 %7456  ;;  %4025 = vmax.xlane.f32.xlu0 %v4024_v7  ;;  %10074 = vmatprep.subr.bf16.mxu0 %v10073_v33  ;;  %v12883_v48 = vadd.f32 %v10868_v15, %v13899_v4  ;;  %v10872_v40 = vld [vmem:[%s13756_s8 + $0x78] sm:$0xff]  ;;  %v12961_v4 = vadd.f32 %v10877_v25, %v12487_v2  ;;  %v7507_v2 = vsel %vm1204_vm1, %v12657_v21, %v12799_v0 }
 0x746   : > { %v12919_v22 = vadd.f32 %v10872_v40, %v13902_v17  ;;  %v13904_v57 = vld [vmem:[#allocation25_spill] sm:$0xff]  ;;  %v7508_v21 = vsel %vm1204_vm1, %v12682_v8, %v12835_v31 }
 0x747   : > { %9644 = vmatmul.mubr.msk.f32.vlgmr.msra.gmra.mrb[62].mxu0 %vm3921_vm3, %v4623_v38  ;;  %v4039_v6 = vsel %vm3921_vm3, %v12883_v48, -inf  ;;  %v4084_v38 = vsel %vm3921_vm3, %v12929_v44, -inf  ;;  %v4108_v0 = vsel %vm3921_vm3, %v12961_v4, -inf }
 0x748   : > { %v12885_v47 = vpop.permute.xlu0 %7430  ;;  %4028 = vmax.xlane.f32.xlu1 %v4027_v26  ;;  %10076 = vmatpush3.bf16.msra.mxu0 %v10073_v33  ;;  %v10874_v33 = vld [vmem:[%s13756_s8 + $0x98] sm:$0xff]  ;;  %v4063_v42 = vsel %vm3921_vm3, %v12919_v22, -inf }
 0x749   : > { %4037 = vmax.xlane.f32.xlu0 %v4036_v55  ;;  %10078 = vmatprep.subr.bf16.mxu0 %v10077_v35  ;;  %v12895_v63 = vpop.permute.xlu1 %7460  ;;  %v12937_v39 = vadd.f32 %v10874_v33, %v13904_v57  ;;  %v7506_v55 = vsel %vm1204_vm1, %v12660_v41, %v12819_v9  ;;  %v7515_v9 = vsel %vm3921_vm3, %v7507_v2, %v12837_v59  ;;  %v10879_v59 = vld [vmem:[%s13756_s8 + $0xf8] sm:$0xff] }
 0x74b   : > { %v4075_v15 = vsel %vm3921_vm3, %v12937_v39, -inf }
 0x74c   : > { %v7451_v19 = vpop.permute.xlu0 %7450  ;;  %4049 = vmax.xlane.f32.xlu1 %v4048_v49  ;;  %10080 = vmatpush3.bf16.msra.mxu0 %v10077_v35  ;;  %v10876_v35 = vld [vmem:[%s13756_s8 + $0xb8] sm:$0xff] }
 0x74d   : > { %4040 = vmax.xlane.f32.xlu0 %v4039_v6  ;;  %v12923_v34 = vpop.permute.xlu1 %7464  ;;  %v12953_v10 = vadd.f32 %v10876_v35, %v13905_v14  ;;  %v13906_v49 = vld [vmem:[#allocation29_spill] sm:$0xff]  ;;  %v7514_v1 = vsel %vm3921_vm3, %v7506_v55, %v7451_v19  ;;  %v13907_v19 = vld [vmem:[#allocation30_spill] sm:$0xff] }
 0x74e   : > { %v12972_v29 = vadd.f32 %v10878_v20, %v13906_v49  ;;  %v13001_v17 = vadd.f32 %v10879_v59, %v13907_v19 }
 0x74f   : > { %v4087_v41 = vsel %vm3921_vm3, %v12953_v10, -inf }
 0x750   : > { %v7455_v52 = vpop.permute.xlu0 %7454  ;;  %4061 = vmax.xlane.f32.xlu1 %v4060_v24  ;;  %v4099_v31 = vsel %vm3921_vm3, %v12972_v29, -inf }
 0x751   : > { %4052 = vmax.xlane.f32.xlu0 %v4051_v5  ;;  %v7485_v7 = vpop.permute.xlu1 %7484  ;;  %v7509_v5 = vsel %vm1204_vm1, %v12680_v43, %v12807_v32  ;;  %v7516_v54 = vsel %vm3921_vm3, %v7508_v21, %v7455_v52  ;;  %v7510_v43 = vsel %vm1204_vm1, %v12706_v51, %v12862_v28  ;;  %v7513_v28 = vsel %vm1204_vm1, %v12717_v45, %v12821_v16 }
 0x752   : > { %v12986_v40 = vsel %vm7522_vm4, %v7515_v9, %v7485_v7  ;;  %v7517_v11 = vsel %vm3921_vm3, %v7509_v5, %v12868_v36  ;;  %v7511_v36 = vsel %vm1204_vm1, %v12704_v18, %v12815_v30  ;;  %v7512_v18 = vsel %vm1204_vm1, %v12719_v60, %v12885_v47 }
 0x753   : > { %v7519_v3 = vsel %vm3921_vm3, %v7511_v36, %v12895_v63 }
 0x754   : > { %v7459_v37 = vpop.permute.xlu0 %7458  ;;  %4073 = vmax.xlane.f32.xlu1 %v4072_v58 }
 0x755   : > { %4064 = vmax.xlane.f32.xlu0 %v4063_v42  ;;  %v7489_v62 = vpop.permute.xlu1 %7488  ;;  %v7518_v52 = vsel %vm3921_vm3, %v7510_v43, %v7459_v37  ;;  %v4111_v42 = vsel %vm3921_vm3, %v13001_v17, -inf }
 0x756   : > { %v13015_v33 = vsel %vm7522_vm4, %v7517_v11, %v7489_v62 }
 0x757   : > { %13909 = vst [vmem:[#allocation8_spill] sm:$0xff] %v13015_v33 }
 0x758   : > { %v7463_v26 = vpop.permute.xlu0 %7462  ;;  %4085 = vmax.xlane.f32.xlu1 %v4084_v38  ;;  %v7521_v38 = vsel %vm3921_vm3, %v7513_v28, %v12923_v34 }
 0x759   : > { %4076 = vmax.xlane.f32.xlu0 %v4075_v15  ;;  %v7493_v32 = vpop.permute.xlu1 %7492  ;;  %v7520_v63 = vsel %vm3921_vm3, %v7512_v18, %v7463_v26 }
 0x75a   : > { %v13036_v51 = vsel %vm7522_vm4, %v7519_v3, %v7493_v32 }
 0x75b   : > { %13911 = vst [vmem:[#allocation6_spill] sm:$0xff] %v13036_v51 }
 0x75c   : > { %v7483_v6 = vpop.permute.xlu0 %7482  ;;  %4097 = vmax.xlane.f32.xlu1 %v4096_v13 }
 0x75d   : > { %v12983_v24 = vsel %vm7522_vm4, %v7514_v1, %v7483_v6  ;;  %4088 = vmax.xlane.f32.xlu0 %v4087_v41 }
 0x75e   : > { %9661 = vmatprep.mubr.msk.f32.mxu0 %vm533_vm0, %v12983_v24 }
 0x75f   : > { %9662 = vmatmul.mubr.msk.f32.vlgmr.msra.gmra.mrb[64].mxu0 %vm533_vm0, %v12986_v40 }
 0x760   : > { %v7487_v8 = vpop.permute.xlu0 %7486  ;;  %4109 = vmax.xlane.f32.xlu1 %v4108_v0 }
 0x761   : > { %v13012_v58 = vsel %vm7522_vm4, %v7516_v54, %v7487_v8  ;;  %4100 = vmax.xlane.f32.xlu0 %v4099_v31 }
 0x762   : > { %13908 = vst [vmem:[#allocation7_spill] sm:$0xff] %v13012_v58  ;;  %9664 = vmatprep.mubr.msk.f32.mxu0 %vm533_vm0, %v13012_v58 }
 0x763   : > { %9665 = vmatmul.mubr.msk.f32.gmra.mrb[66].mxu0 %vm533_vm0, %v13015_v33  ;;  %v10887_v33 = vld [vmem:[%s11000_s23 + $0x30] sm:$0xff] }
 0x764   : > { %v7491_v57 = vpop.permute.xlu0 %7490 }
 0x765   : > { %v13033_v7 = vsel %vm7522_vm4, %v7518_v52, %v7491_v57  ;;  %4112 = vmax.xlane.f32.xlu0 %v4111_v42 }
 0x766   : > { %13910 = vst [vmem:[#allocation9_spill] sm:$0xff] %v13033_v7  ;;  %9667 = vmatprep.mubr.msk.f32.mxu0 %vm533_vm0, %v13033_v7 }
 0x767   : > { %9668 = vmatmul.mubr.msk.f32.gmra.mrb[68].mxu0 %vm533_vm0, %v13036_v51 }
 0x796   : > { %v7497_v30 = vpop.permute.xlu1 %7496 }
 0x797   : > { %v13055_v14 = vsel %vm7522_vm4, %v7521_v38, %v7497_v30 }
 0x798   : > { %v7495_v37 = vpop.permute.xlu0 %7494  ;;  %13913 = vst [vmem:[#allocation38_spill] sm:$0xff] %v13055_v14 }
 0x799   : > { %v13052_v35 = vsel %vm7522_vm4, %v7520_v63, %v7495_v37 }
 0x79a   : > { %13912 = vst [vmem:[#allocation42_spill] sm:$0xff] %v13052_v35  ;;  %9670 = vmatprep.mubr.msk.f32.mxu0 %vm533_vm0, %v13052_v35  ;;  %v13918_v35 = vld [vmem:[#allocation24_spill] sm:$0xff] }
 0x79b   : > { %9671 = vmatmul.mubr.msk.f32.gmra.mrb[70].mxu0 %vm533_vm0, %v13055_v14 }
 0x7d2   : > { %v4026_v60 = vpop.xlane.xlu0 %4025 }
 0x7d3   : > { %v4148_v45 = vsub.f32 %v12833_v23, %v4026_v60 }
 0x7d5   : > { %v4246_v16 = vmul.f32 1.442695, %v4148_v45  ;;  %v4029_v47 = vpop.xlane.xlu1 %4028 }
 0x7d6   : > { %v4149_v26 = vsub.f32 %v12853_v27, %v4029_v47  ;;  %v4038_v34 = vpop.xlane.xlu0 %4037 }
 0x7d7   : > { %10743 = vpow2.f32 %v4246_v16  ;;  %v4152_v15 = vsub.f32 %v12860_v46, %v4038_v34 }
 0x7d8   : > { %v4248_v25 = vmul.f32 1.442695, %v4149_v26 }
 0x7d9   : > { %v4254_v55 = vmul.f32 1.442695, %v4152_v15  ;;  %v4050_v13 = vpop.xlane.xlu1 %4049 }
 0x7da   : > { %10745 = vpow2.f32 %v4248_v25  ;;  %v4156_v20 = vsub.f32 %v12874_v50, %v4050_v13  ;;  %v4041_v49 = vpop.xlane.xlu0 %4040 }
 0x7db   : > { %10747 = vpow2.f32 %v4254_v55  ;;  %v4153_v2 = vsub.f32 %v12883_v48, %v4041_v49 }
 0x7dc   : > { %v4262_v1 = vmul.f32 1.442695, %v4156_v20 }
 0x7dd   : > { %v4256_v23 = vmul.f32 1.442695, %v4153_v2  ;;  %v4062_v6 = vpop.xlane.xlu1 %4061 }
 0x7de   : > { %10749 = vpow2.f32 %v4262_v1  ;;  %v4160_v27 = vsub.f32 %v12893_v12, %v4062_v6  ;;  %v4053_v41 = vpop.xlane.xlu0 %4052 }
 0x7df   : > { %10751 = vpow2.f32 %v4256_v23  ;;  %v4157_v46 = vsub.f32 %v12903_v53, %v4053_v41 }
 0x7e0   : > { %v4270_v9 = vmul.f32 1.442695, %v4160_v27 }
 0x7e1   : > { %v13068_v62 = vpop.eup %10743  ;;  %v4264_v21 = vmul.f32 1.442695, %v4157_v46  ;;  %v4074_v0 = vpop.xlane.xlu1 %4073 }
 0x7e2   : > { %10753 = vpow2.f32 %v4270_v9  ;;  %v4164_v50 = vsub.f32 %v12911_v61, %v4074_v0  ;;  %v4065_v59 = vpop.xlane.xlu0 %4064  ;;  %v4408_v48 = vsel %vm3921_vm3, %v13068_v62, 0.0 }
 0x7e3   : > { %10755 = vpow2.f32 %v4264_v21  ;;  %v4161_v19 = vsub.f32 %v12919_v22, %v4065_v59  ;;  %4409 = vadd.xlane.f32.xlu1 %v4408_v48  ;;  %v13914_v48 = vld [vmem:[#allocation4_spill] sm:$0xff] }
 0x7e4   : > { %v13074_v12 = vpop.eup %10745  ;;  %v4278_v5 = vmul.f32 1.442695, %v4164_v50 }
 0x7e5   : > { %v13076_v53 = vpop.eup %10747  ;;  %v4272_v54 = vmul.f32 1.442695, %v4161_v19  ;;  %v4086_v8 = vpop.xlane.xlu1 %4085  ;;  %v4411_v31 = vsel %vm3921_vm3, %v13074_v12, 0.0 }
 0x7e6   : > { %10757 = vpow2.f32 %v4278_v5  ;;  %v4168_v61 = vsub.f32 %v12929_v44, %v4086_v8  ;;  %v4077_v11 = vpop.xlane.xlu0 %4076  ;;  %4412 = vadd.xlane.f32.xlu0 %v4411_v31  ;;  %v4420_v43 = vsel %vm3921_vm3, %v13076_v53, 0.0 }
 0x7e7   : > { %10759 = vpow2.f32 %v4272_v54  ;;  %v4165_v22 = vsub.f32 %v12937_v39, %v4077_v11  ;;  %4421 = vadd.xlane.f32.xlu1 %v4420_v43 }
 0x7e8   : > { %v13084_v32 = vpop.eup %10749  ;;  %v4286_v36 = vmul.f32 1.442695, %v4168_v61 }
 0x7e9   : > { %v13086_v52 = vpop.eup %10751  ;;  %v4280_v57 = vmul.f32 1.442695, %v4165_v22  ;;  %v4098_v42 = vpop.xlane.xlu1 %4097  ;;  %v4432_v3 = vsel %vm3921_vm3, %v13084_v32, 0.0  ;;  %v13915_v22 = vld [vmem:[#allocation20_spill] sm:$0xff] }
 0x7ea   : > { %10761 = vpow2.f32 %v4286_v36  ;;  %v4172_v44 = vsub.f32 %v12945_v56, %v4098_v42  ;;  %v4089_v18 = vpop.xlane.xlu0 %4088  ;;  %v4423_v30 = vsel %vm3921_vm3, %v13086_v52, 0.0 }
 0x7eb   : > { %10763 = vpow2.f32 %v4280_v57  ;;  %v4169_v39 = vsub.f32 %v12953_v10, %v4089_v18  ;;  %4433 = vadd.xlane.f32.xlu1 %v4432_v3  ;;  %4424 = vadd.xlane.f32.xlu0 %v4423_v30 }
 0x7ec   : > { %v13094_v28 = vpop.eup %10753  ;;  %v4294_v37 = vmul.f32 1.442695, %v4172_v44 }
 0x7ed   : > { %v13096_v63 = vpop.eup %10755  ;;  %v4288_v38 = vmul.f32 1.442695, %v4169_v39  ;;  %v4444_v60 = vsel %vm3921_vm3, %v13094_v28, 0.0  ;;  %v4110_v3 = vpop.xlane.xlu1 %4109  ;;  %v8811_v39 = vld [vmem:[%s13755_s7] ss:$0 sm:$0xff] }
 0x7ee   : > { %v4101_v45 = vpop.xlane.xlu0 %4100  ;;  %v4435_v56 = vsel %vm3921_vm3, %v13096_v63, 0.0  ;;  %v4176_v44 = vsub.f32 %v12961_v4, %v4110_v3 }
 0x7ef   : > { %10765 = vpow2.f32 %v4288_v38  ;;  %v4173_v16 = vsub.f32 %v12972_v29, %v4101_v45  ;;  %4445 = vadd.xlane.f32.xlu1 %v4444_v60  ;;  %4436 = vadd.xlane.f32.xlu0 %v4435_v56  ;;  %v10880_v56 = vld [vmem:[%s11000_s23 + $0x8] sm:$0xff] }
 0x7f0   : > { %v13103_v10 = vpop.eup %10757  ;;  %10767 = vpow2.f32 %v4294_v37  ;;  %v4302_v18 = vmul.f32 1.442695, %v4176_v44 }
 0x7f1   : > { %v13105_v47 = vpop.eup %10759  ;;  %v4296_v26 = vmul.f32 1.442695, %v4173_v16  ;;  %v4456_v34 = vsel %vm3921_vm3, %v13103_v10, 0.0 }
 0x7f2   : > { %v4447_v15 = vsel %vm3921_vm3, %v13105_v47, 0.0  ;;  %v4113_v31 = vpop.xlane.xlu0 %4112 }
 0x7f3   : > { %4457 = vadd.xlane.f32.xlu1 %v4456_v34  ;;  %4448 = vadd.xlane.f32.xlu0 %v4447_v15  ;;  %10769 = vpow2.f32 %v4296_v26  ;;  %v4177_v61 = vsub.f32 %v13001_v17, %v4113_v31  ;;  %v13916_v31 = vld [vmem:[#allocation17_spill] sm:$0xff] }
 0x7f4   : > { %v13111_v25 = vpop.eup %10761 }
 0x7f5   : > { %v13113_v55 = vpop.eup %10763  ;;  %v4468_v29 = vsel %vm3921_vm3, %v13111_v25, 0.0  ;;  %v4304_v36 = vmul.f32 1.442695, %v4177_v61  ;;  %v10882_v61 = vld [vmem:[%s11000_s23 + $0x28] sm:$0xff] }
 0x7f6   : > { %v13117_v13 = vpop.f32.mrb[48].mxu0  ;;  %v4459_v20 = vsel %vm3921_vm3, %v13113_v55, 0.0 }
 0x7f7   : > { %4469 = vadd.xlane.f32.xlu1 %v4468_v29  ;;  %4460 = vadd.xlane.f32.xlu0 %v4459_v20  ;;  %v13121_v49 = vpop.f32.mrb[49].mxu0  ;;  %10771 = vpow2.f32 %v4304_v36  ;;  %v10881_v20 = vld [vmem:[%s11000_s23 + $0x18] sm:$0xff] }
 0x7f8   : > { %10773 = vpow2.f32 %v4302_v18  ;;  %v10883_v18 = vld [vmem:[%s11000_s23] sm:$0xff] }
 0x7f9   : > { %v13123_v2 = vpop.eup %10765 }
 0x7fa   : > { %v4471_v1 = vsel %vm3921_vm3, %v13123_v2, 0.0  ;;  %v13127_v23 = vpop.eup %10767 }
 0x7fb   : > { %4472 = vadd.xlane.f32.xlu0 %v4471_v1  ;;  %v4480_v41 = vsel %vm3921_vm3, %v13127_v23, 0.0 }
 0x7fd   : > { %v13129_v6 = vpop.f32.mrb[50].mxu0  ;;  %v13135_v46 = vpop.eup %10769 }
 0x7fe   : > { %v13131_v27 = vpop.f32.mrb[51].mxu0  ;;  %v4483_v0 = vsel %vm3921_vm3, %v13135_v46, 0.0 }
 0x7ff   : > { %4481 = vadd.xlane.f32.xlu0 %v4480_v41 }
 0x801   : > { %v13137_v9 = vpop.f32.mrb[52].mxu0  ;;  %v13169_v30 = vpop.eup %10771 }
 0x802   : > { %v13139_v21 = vpop.f32.mrb[53].mxu0  ;;  %v4495_v17 = vsel %vm3921_vm3, %v13169_v30, 0.0  ;;  %v13176_v45 = vpop.eup %10773 }
 0x803   : > { %4484 = vadd.xlane.f32.xlu0 %v4483_v0  ;;  %v4492_v15 = vsel %vm3921_vm3, %v13176_v45, 0.0 }
 0x805   : > { %v13143_v50 = vpop.f32.mrb[54].mxu0 }
 0x806   : > { %v13145_v59 = vpop.f32.mrb[55].mxu0 }
 0x808   : > { %10480 = vrot.lane.b32.xlu1 %v13914_v48, %s10900_s19 }
 0x809   : > { %v13149_v19 = vpop.f32.mrb[56].mxu0 }
 0x80a   : > { %v13151_v5 = vpop.f32.mrb[57].mxu0 }
 0x80d   : > { %v13153_v54 = vpop.f32.mrb[58].mxu0 }
 0x80e   : > { %v13155_v8 = vpop.f32.mrb[59].mxu0 }
 0x816   : > { %v13158_v11 = vpop.f32.mrb[60].mxu0 }
 0x817   : > { %v13160_v43 = vpop.f32.mrb[61].mxu0 }
 0x819   : > { %10485 = vrot.lane.b32.xlu0 %v13915_v22, %s10900_s19 }
 0x81a   : > { %v13164_v57 = vpop.f32.mrb[62].mxu0 }
 0x81b   : > { %v13166_v42 = vpop.f32.mrb[63].mxu0 }
 0x82c   : > { %4496 = vadd.xlane.f32.xlu1 %v4495_v17 }
 0x832   : > { %v9663_v37 = vpop.f32.mrb[64].mxu0 }
 0x833   : > { %v7798_v38 = vadd.f32 %v9663_v37, %v8811_v39  ;;  %v7792_v60 = vpop.f32.mrb[65].mxu0 }
 0x834   : > { %v7793_v44 = vadd.f32 %v8811_v39, %v7792_v60 }
 0x835   : > { %v13179_v16 = vadd.f32 %v10880_v56, %v7798_v38  ;;  %v10884_v38 = vld [vmem:[%s11000_s23 + $0x10] sm:$0xff] }
 0x836   : > { %v9666_v4 = vpop.f32.mrb[66].mxu0  ;;  %v13198_v17 = vadd.f32 %v10883_v18, %v7793_v44 }
 0x837   : > { %v7808_v26 = vadd.f32 %v9666_v4, %v8811_v39  ;;  %v7802_v34 = vpop.f32.mrb[67].mxu0  ;;  %v7844_v48 = vsel %vm533_vm0, %v13179_v16, 0.0 }
 0x838   : > { %4493 = vadd.xlane.f32.xlu0 %v4492_v15  ;;  %v7803_v37 = vadd.f32 %v8811_v39, %v7802_v34  ;;  %v10885_v15 = vld [vmem:[%s11000_s23 + $0x20] sm:$0xff] }
 0x839   : > { %v13184_v1 = vadd.f32 %v10881_v20, %v7808_v26  ;;  %v7841_v26 = vsel %vm533_vm0, %v13198_v17, 0.0 }
 0x83a   : > { %v9669_v29 = vpop.f32.mrb[68].mxu0  ;;  %v13201_v4 = vadd.f32 %v10884_v38, %v7803_v37 }
 0x83b   : > { %v7818_v41 = vadd.f32 %v9669_v29, %v8811_v39  ;;  %v7812_v0 = vpop.f32.mrb[69].mxu0  ;;  %v7850_v36 = vsel %vm533_vm0, %v13184_v1, 0.0 }
 0x83c   : > { %7845 = vadd.xlane.f32.xlu0 %v7844_v48  ;;  %v7813_v56 = vadd.f32 %v8811_v39, %v7812_v0  ;;  %v7847_v20 = vsel %vm533_vm0, %v13201_v4, 0.0 }
 0x83d   : > { %10490 = vrot.lane.b32.xlu1 %v13916_v31, %s10900_s19  ;;  %v13191_v22 = vadd.f32 %v10882_v61, %v7818_v41  ;;  %v10886_v61 = vld [vmem:[%s11000_s23 + $0x38] sm:$0xff] }
 0x83e   : > { %v13206_v29 = vadd.f32 %v10885_v15, %v7813_v56  ;;  %v13917_v56 = vld [vmem:[#allocation18_spill] sm:$0xff] }
 0x83f   : > { %v7856_v3 = vsel %vm533_vm0, %v13191_v22, 0.0 }
 0x840   : > { %7851 = vadd.xlane.f32.xlu0 %v7850_v36  ;;  %v7853_v60 = vsel %vm533_vm0, %v13206_v29, 0.0 }
 0x844   : > { %7857 = vadd.xlane.f32.xlu0 %v7856_v3 }
 0x861   : > { %7842 = vadd.xlane.f32.xlu1 %v7841_v26 }
 0x865   : > { %7848 = vadd.xlane.f32.xlu1 %v7847_v20 }
 0x869   : > { %7854 = vadd.xlane.f32.xlu1 %v7853_v60 }
 0x86e   : > { %v9672_v34 = vpop.f32.mrb[70].mxu0 }
 0x86f   : > { %v7828_v41 = vadd.f32 %v9672_v34, %v8811_v39  ;;  %v7822_v48 = vpop.f32.mrb[71].mxu0 }
 0x870   : > { %v7823_v31 = vadd.f32 %v8811_v39, %v7822_v48  ;;  %v4410_v0 = vpop.xlane.xlu1 %4409 }
 0x871   : > { %v13213_v36 = vadd.f32 %v10886_v61, %v7828_v41  ;;  %10775 = vrcp.f32 %v4410_v0 }
 0x873   : > { %v7862_v3 = vsel %vm533_vm0, %v13213_v36, 0.0  ;;  %v4413_v44 = vpop.xlane.xlu0 %4412 }
 0x874   : > { %v4422_v18 = vpop.xlane.xlu1 %4421  ;;  %7863 = vadd.xlane.f32.xlu0 %v7862_v3  ;;  %10777 = vrcp.f32 %v4413_v44 }
 0x875   : > { %10779 = vrcp.f32 %v4422_v18 }
 0x878   : > { %v4434_v37 = vpop.xlane.xlu1 %4433  ;;  %v4425_v38 = vpop.xlane.xlu0 %4424 }
 0x879   : > { %10781 = vrcp.f32 %v4425_v38  ;;  %v13242_v38 = vadd.f32 %v10887_v33, %v7823_v31 }
 0x87a   : > { %10500 = vrot.lane.b32.xlu1 %v13917_v56, %s10900_s19  ;;  %10783 = vrcp.f32 %v4434_v37 }
 0x87b   : > { %v10776_v26 = vpop.eup %10775 }
 0x87c   : > { %v4446_v15 = vpop.xlane.xlu1 %4445  ;;  %v4437_v20 = vpop.xlane.xlu0 %4436  ;;  %v4596_v39 = vmul.f32 %v10776_v26, %v13068_v62 }
 0x87d   : > { %10785 = vrcp.f32 %v4437_v20 }
 0x87e   : > { %9552 = vmatprep.mubr.msk.f32.mxu1 %vm3921_vm3, %v4596_v39  ;;  %v10778_v26 = vpop.eup %10777  ;;  %10787 = vrcp.f32 %v4446_v15 }
 0x87f   : > { %v10780_v14 = vpop.eup %10779  ;;  %v4597_v44 = vmul.f32 %v10778_v26, %v13074_v12 }
 0x880   : > { %v13221_v60 = vpop.xlane.xlu1 %4457  ;;  %v13223_v34 = vpop.xlane.xlu0 %4448  ;;  %v4600_v7 = vmul.f32 %v10780_v14, %v13076_v53  ;;  %v13919_v14 = vld [vmem:[#allocation28_spill] sm:$0xff] }
 0x881   : > { %10789 = vrcp.f32 %v13223_v34 }
 0x882   : > { %10791 = vrcp.f32 %v13221_v60 }
 0x883   : > { %v10782_v51 = vpop.eup %10781 }
 0x884   : > { %v13225_v41 = vpop.xlane.xlu1 %4469  ;;  %v13227_v48 = vpop.xlane.xlu0 %4460  ;;  %v4601_v12 = vmul.f32 %v10782_v51, %v13086_v52 }
 0x885   : > { %v10784_v58 = vpop.eup %10783  ;;  %10793 = vrcp.f32 %v13227_v48 }
 0x886   : > { %v4604_v37 = vmul.f32 %v10784_v58, %v13084_v32  ;;  %10795 = vrcp.f32 %v13225_v41 }
 0x887   : > { %v10786_v58 = vpop.eup %10785 }
 0x888   : > { %v10481_v0 = vpop.permute.xlu1 %10480  ;;  %v13229_v61 = vpop.xlane.xlu0 %4472 }
 0x889   : > { %v10483_v3 = vunpack.i.h.bf16 %v10481_v0  ;;  %v10482_v56 = vunpack.i.l.bf16 %v10481_v0  ;;  %v10788_v32 = vpop.eup %10787  ;;  %10797 = vrcp.f32 %v13229_v61 }
 0x88a   : > { %10495 = vrot.lane.b32.xlu0 %v13918_v35, %s10900_s19 }
 0x88b   : > { %v10013_v62 = vpack.c.bf16 %v10483_v3, %v10482_v56 }
 0x88c   : > { %v13233_v39 = vpop.xlane.xlu0 %4481 }
 0x88d   : > { %10014 = vmatprep.subr.bf16.mxu1 %v10013_v62  ;;  %10799 = vrcp.f32 %v13233_v39 }
 0x88e   : > { %10016 = vmatpush3.bf16.msra.mxu1 %v10013_v62  ;;  %v4605_v62 = vmul.f32 %v10786_v58, %v13096_v63 }
 0x890   : > { %v13236_v18 = vpop.xlane.xlu0 %4484 }
 0x891   : > { %9553 = vmatmul.mubr.msk.f32.vlgmr.msra.gmra.mrb[64].mxu1 %vm3921_vm3, %v4597_v44  ;;  %v4608_v44 = vmul.f32 %v10788_v32, %v13094_v28 }
 0x892   : > { %9566 = vmatprep.mubr.msk.f32.mxu1 %vm3921_vm3, %v4600_v7  ;;  %v7859_v7 = vsel %vm533_vm0, %v13242_v38, 0.0 }
 0x894   : > { %v10486_v35 = vpop.permute.xlu0 %10485 }
 0x895   : > { %v10488_v0 = vunpack.i.h.bf16 %v10486_v35  ;;  %v10487_v3 = vunpack.i.l.bf16 %v10486_v35 }
 0x897   : > { %v10021_v56 = vpack.c.bf16 %v10488_v0, %v10487_v3 }
 0x899   : > { %10022 = vmatprep.subr.bf16.mxu1 %v10021_v56 }
 0x89a   : > { %10024 = vmatpush3.bf16.msra.mxu1 %v10021_v56 }
 0x89d   : > { %9567 = vmatmul.mubr.msk.f32.vlgmr.msra.gmra.mrb[66].mxu1 %vm3921_vm3, %v4601_v12 }
 0x89e   : > { %7860 = vadd.xlane.f32.xlu1 %v7859_v7  ;;  %9580 = vmatprep.mubr.msk.f32.mxu1 %vm3921_vm3, %v4604_v37 }
 0x8af   : > { %10505 = vrot.lane.b32.xlu1 %v13919_v14, %s10900_s19 }
 0x8b9   : > { %v13252_v33 = vpop.xlane.xlu1 %4496 }
 0x8bd   : > { %v10491_v53 = vpop.permute.xlu1 %10490 }
 0x8be   : > { %v10493_v31 = vunpack.i.h.bf16 %v10491_v53  ;;  %v10492_v51 = vunpack.i.l.bf16 %v10491_v53 }
 0x8c0   : > { %v10029_v52 = vpack.c.bf16 %v10493_v31, %v10492_v51 }
 0x8c2   : > { %10030 = vmatprep.subr.bf16.mxu1 %v10029_v52 }
 0x8c3   : > { %10032 = vmatpush3.bf16.msra.mxu1 %v10029_v52 }
 0x8c5   : > { %v13255_v26 = vpop.xlane.xlu0 %4493 }
 0x8c6   : > { %9581 = vmatmul.mubr.msk.f32.vlgmr.msra.gmra.mrb[68].mxu1 %vm3921_vm3, %v4605_v62 }
 0x8c7   : > { %9594 = vmatprep.mubr.msk.f32.mxu1 %vm3921_vm3, %v4608_v44 }
 0x8c9   : > { %v7846_v15 = vpop.xlane.xlu0 %7845 }
 0x8ca   : > { %v7866_v20 = vmul.f32 0.03125, %v7846_v15 }
 0x8cc   : > { %v13261_v35 = vsub.f32 %v13179_v16, %v7866_v20 }
 0x8cd   : > { %v7852_v0 = vpop.xlane.xlu0 %7851 }
 0x8ce   : > { %v7868_v3 = vmul.f32 0.03125, %v7852_v0  ;;  %v7882_v56 = vmul.f32 %v13261_v35, %v13261_v35 }
 0x8d0   : > { %v13266_v63 = vsub.f32 %v13184_v1, %v7868_v3  ;;  %v7892_v12 = vsel %vm533_vm0, %v7882_v56, 0.0 }
 0x8d1   : > { %v7858_v7 = vpop.xlane.xlu0 %7857 }
 0x8d2   : > { %v7884_v28 = vmul.f32 %v13266_v63, %v13266_v63  ;;  %v7870_v31 = vmul.f32 0.03125, %v7858_v7 }
 0x8d3   : > { %7893 = vadd.xlane.f32.xlu1 %v7892_v12 }
 0x8d4   : > { %v7898_v37 = vsel %vm533_vm0, %v7884_v28, 0.0  ;;  %v13278_v62 = vsub.f32 %v13191_v22, %v7870_v31 }
 0x8d5   : > { %7899 = vadd.xlane.f32.xlu0 %v7898_v37 }
 0x8d6   : > { %v7886_v28 = vmul.f32 %v13278_v62, %v13278_v62 }
 0x8ee   : > { %v7843_v14 = vpop.xlane.xlu1 %7842 }
 0x8ef   : > { %v7865_v53 = vmul.f32 0.03125, %v7843_v14  ;;  %v7904_v14 = vsel %vm533_vm0, %v7886_v28, 0.0  ;;  %v10790_v28 = vpop.eup %10789 }
 0x8f0   : > { %v10792_v48 = vpop.eup %10791  ;;  %v4609_v41 = vmul.f32 %v10790_v28, %v13105_v47 }
 0x8f1   : > { %v13273_v51 = vsub.f32 %v13198_v17, %v7865_v53 }
 0x8f2   : > { %v7849_v52 = vpop.xlane.xlu1 %7848 }
 0x8f3   : > { %v7867_v58 = vmul.f32 0.03125, %v7849_v52  ;;  %v7881_v32 = vmul.f32 %v13273_v51, %v13273_v51 }
 0x8f5   : > { %v13281_v44 = vsub.f32 %v13201_v4, %v7867_v58  ;;  %v7889_v15 = vsel %vm533_vm0, %v7881_v32, 0.0 }
 0x8f6   : > { %v7855_v20 = vpop.xlane.xlu1 %7854  ;;  %7890 = vadd.xlane.f32.xlu1 %v7889_v15 }
 0x8f7   : > { %v7869_v0 = vmul.f32 0.03125, %v7855_v20  ;;  %v7883_v3 = vmul.f32 %v13281_v44, %v13281_v44 }
 0x8f9   : > { %v13287_v56 = vsub.f32 %v13206_v29, %v7869_v0  ;;  %v7895_v12 = vsel %vm533_vm0, %v7883_v3, 0.0 }
 0x8fa   : > { %7896 = vadd.xlane.f32.xlu0 %v7895_v12  ;;  %v10501_v31 = vpop.permute.xlu1 %10500 }
 0x8fb   : > { %v7885_v37 = vmul.f32 %v13287_v56, %v13287_v56  ;;  %v10503_v32 = vunpack.i.h.bf16 %v10501_v31  ;;  %v10502_v20 = vunpack.i.l.bf16 %v10501_v31  ;;  %v13920_v31 = vld [vmem:[#allocation26_spill] sm:$0xff] }
 0x8fd   : > { %v7901_v7 = vsel %vm533_vm0, %v7885_v37, 0.0  ;;  %v10045_v37 = vpack.c.bf16 %v10503_v32, %v10502_v20 }
 0x8fe   : > { %7902 = vadd.xlane.f32.xlu1 %v7901_v7  ;;  %7905 = vadd.xlane.f32.xlu0 %v7904_v14  ;;  %v10794_v7 = vpop.eup %10793 }
 0x8ff   : > { %v10796_v14 = vpop.eup %10795 }
 0x900   : > { %v4616_v32 = vmul.f32 %v10796_v14, %v13111_v25 }
 0x901   : > { %v7864_v53 = vpop.xlane.xlu0 %7863 }
 0x902   : > { %v7872_v52 = vmul.f32 0.03125, %v7864_v53  ;;  %v4612_v53 = vmul.f32 %v10792_v48, %v13103_v10 }
 0x904   : > { %v13301_v58 = vsub.f32 %v13213_v36, %v7872_v52  ;;  %v4613_v52 = vmul.f32 %v10794_v7, %v13113_v55 }
 0x905   : > { %v10496_v15 = vpop.permute.xlu0 %10495 }
 0x906   : > { %v10498_v0 = vunpack.i.h.bf16 %v10496_v15  ;;  %v10497_v3 = vunpack.i.l.bf16 %v10496_v15  ;;  %v7888_v34 = vmul.f32 %v13301_v58, %v13301_v58 }
 0x908   : > { %v10037_v12 = vpack.c.bf16 %v10498_v0, %v10497_v3  ;;  %v7910_v60 = vsel %vm533_vm0, %v7888_v34, 0.0  ;;  %v10798_v34 = vpop.eup %10797 }
 0x909   : > { %7911 = vadd.xlane.f32.xlu0 %v7910_v60  ;;  %v4617_v61 = vmul.f32 %v10798_v34, %v13123_v2 }
 0x90a   : > { %10038 = vmatprep.subr.bf16.mxu1 %v10037_v12 }
 0x90b   : > { %10040 = vmatpush3.bf16.msra.mxu1 %v10037_v12  ;;  %v13921_v12 = vld [vmem:[#allocation19_spill] sm:$0xff] }
 0x90c   : > { %10046 = vmatprep.subr.bf16.mxu1 %v10045_v37 }
 0x90e   : > { %9595 = vmatmul.mubr.msk.f32.vlgmr.msra.gmra.mrb[70].mxu1 %vm3921_vm3, %v4609_v41 }
 0x90f   : > { %10515 = vrot.lane.b32.xlu1 %v13920_v31, %s10900_s19  ;;  %10048 = vmatpush3.bf16.msra.mxu1 %v10045_v37 }
 0x910   : > { %9608 = vmatprep.mubr.msk.f32.mxu1 %vm3921_vm3, %v4612_v53 }
 0x912   : > { %9609 = vmatmul.mubr.msk.f32.vlgmr.msra.gmra.mrb[72].mxu1 %vm3921_vm3, %v4613_v52 }
 0x913   : > { %7539 = vrot.lane.b32.xlu1 %v13139_v21, %s10901_s28  ;;  %9622 = vmatprep.mubr.msk.f32.mxu1 %vm3921_vm3, %v4616_v32 }
 0x917   : > { %7541 = vrot.lane.b32.xlu1 %v13137_v9, %s10901_s28  ;;  %v10800_v9 = vpop.eup %10799 }
 0x918   : > { %v4620_v39 = vmul.f32 %v10800_v9, %v13127_v23 }
 0x92b   : > { %v7861_v10 = vpop.xlane.xlu1 %7860 }
 0x92c   : > { %v7871_v47 = vmul.f32 0.03125, %v7861_v10 }
 0x92e   : > { %v13323_v55 = vsub.f32 %v13242_v38, %v7871_v47 }
 0x92f   : > { %v10506_v25 = vpop.permute.xlu1 %10505 }
 0x930   : > { %v10508_v15 = vunpack.i.h.bf16 %v10506_v25  ;;  %v10507_v20 = vunpack.i.l.bf16 %v10506_v25  ;;  %v7887_v21 = vmul.f32 %v13323_v55, %v13323_v55 }
 0x932   : > { %v10053_v0 = vpack.c.bf16 %v10508_v15, %v10507_v20  ;;  %v7907_v3 = vsel %vm533_vm0, %v7887_v21, 0.0 }
 0x933   : > { %7908 = vadd.xlane.f32.xlu0 %v7907_v3 }
 0x934   : > { %10054 = vmatprep.subr.bf16.mxu1 %v10053_v0 }
 0x935   : > { %10056 = vmatpush3.bf16.msra.mxu1 %v10053_v0 }
 0x938   : > { %9623 = vmatmul.mubr.msk.f32.vlgmr.msra.gmra.mrb[74].mxu1 %vm3921_vm3, %v4617_v61 }
 0x939   : > { %9636 = vmatprep.mubr.msk.f32.mxu1 %vm3921_vm3, %v4620_v39 }
 0x949   : > { %10510 = vrot.lane.b32.xlu0 %v13921_v12, %s10900_s19 }
 0x94d   : > { %7547 = vrot.lane.b32.xlu0 %v13145_v59, %s10901_s28 }
 0x960   : > { %v7894_v41 = vpop.xlane.xlu1 %7893 }
 0x961   : > { %v7914_v32 = vmul.f32 0.03125, %v7894_v41 }
 0x962   : > { %v7900_v7 = vpop.xlane.xlu0 %7899 }
 0x963   : > { %v7922_v15 = vadd.f32 1e-05, %v7914_v32  ;;  %v7916_v20 = vmul.f32 0.03125, %v7900_v7 }
 0x964   : > { %v13336_v60 = vpop.f32.mrb[64].mxu1 }
 0x965   : > { %v13338_v28 = vpop.f32.mrb[65].mxu1  ;;  %v7924_v3 = vadd.f32 1e-05, %v7916_v20 }
 0x970   : > { %v13340_v37 = vpop.f32.mrb[66].mxu1 }
 0x971   : > { %v13342_v48 = vpop.f32.mrb[67].mxu1 }
 0x983   : > { %v7891_v59 = vpop.xlane.xlu1 %7890 }
 0x984   : > { %v7913_v53 = vmul.f32 0.03125, %v7891_v59 }
 0x986   : > { %v7921_v31 = vadd.f32 1e-05, %v7913_v53 }
 0x987   : > { %v7897_v14 = vpop.xlane.xlu0 %7896 }
 0x988   : > { %10801 = vrsqrt.f32 %v7921_v31  ;;  %v7915_v10 = vmul.f32 0.03125, %v7897_v14  ;;  %v7973_v31 = vld [vmem:[%s13759_s11] sm:$0xff] }
 0x989   : > { %10803 = vrcp.f32 %v13236_v18 }
 0x98a   : > { %10805 = vrcp.f32 %v13255_v26  ;;  %v7923_v21 = vadd.f32 1e-05, %v7915_v10 }
 0x98b   : > { %v7906_v52 = vpop.xlane.xlu0 %7905  ;;  %v7903_v47 = vpop.xlane.xlu1 %7902  ;;  %10807 = vrcp.f32 %v13252_v33 }
 0x98c   : > { %10809 = vrsqrt.f32 %v7922_v15  ;;  %v7918_v34 = vmul.f32 0.03125, %v7906_v52  ;;  %v7974_v52 = vld [vmem:[%s13759_s11 + $0x8] sm:$0xff] }
 0x98d   : > { %10811 = vrsqrt.f32 %v7923_v21  ;;  %v10081_v21 = vpack.c.bf16 %v7974_v52, %v7973_v31 }
 0x98e   : > { %10813 = vrsqrt.f32 %v7924_v3  ;;  %v7926_v26 = vadd.f32 1e-05, %v7918_v34  ;;  %v7975_v34 = vld [vmem:[%s13759_s11 + $0x10] sm:$0xff] }
 0x98f   : > { %v10516_v9 = vpop.permute.xlu1 %10515 }
 0x990   : > { %v10517_v18 = vunpack.i.l.bf16 %v10516_v9 }
 0x996   : > { %v7912_v25 = vpop.xlane.xlu0 %7911 }
 0x997   : > { %v7920_v59 = vmul.f32 0.03125, %v7912_v25 }
 0x999   : > { %v9582_v2 = vpop.f32.mrb[68].mxu1  ;;  %v7928_v15 = vadd.f32 1e-05, %v7920_v59 }
 0x99a   : > { %v6531_v23 = vpop.f32.mrb[69].mxu1 }
 0x99b   : > { %7543 = vrot.lane.b32.xlu1 %v6531_v23, %s10901_s28  ;;  %v10518_v23 = vunpack.i.h.bf16 %v10516_v9  ;;  %v7976_v9 = vld [vmem:[%s13759_s11 + $0x18] sm:$0xff] }
 0x99f   : > { %7545 = vrot.lane.b32.xlu1 %v9582_v2, %s10901_s28  ;;  %v10802_v2 = vpop.eup %10801 }
 0x9a0   : > { %v10804_v33 = vpop.eup %10803  ;;  %v7937_v32 = vmul.f32 %v10802_v2, %v13273_v51 }
 0x9a1   : > { %v10806_v10 = vpop.eup %10805  ;;  %v4621_v20 = vmul.f32 %v10804_v33, %v13135_v46 }
 0x9a2   : > { %v10808_v25 = vpop.eup %10807  ;;  %v4624_v3 = vmul.f32 %v10806_v10, %v13176_v45 }
 0x9a3   : > { %7549 = vrot.lane.b32.xlu1 %v13143_v50, %s10901_s28  ;;  %v7917_v50 = vmul.f32 0.03125, %v7903_v47  ;;  %v10069_v47 = vpack.c.bf16 %v10518_v23, %v10517_v18 }
 0x9a5   : > { %v7925_v61 = vadd.f32 1e-05, %v7917_v50  ;;  %v8820_v50 = vld [vmem:[%s13757_s9] ss:$0 sm:$0xff] }
 0x9a6   : > { %v7951_v51 = vmul.f32 %v8820_v50, %v7937_v32 }
 0x9a7   : > { %10815 = vrsqrt.f32 %v7925_v61  ;;  %v4625_v61 = vmul.f32 %v10808_v25, %v13169_v30 }
 0x9a8   : > { %10817 = vrsqrt.f32 %v7926_v26 }
 0x9c0   : > { %v7909_v0 = vpop.xlane.xlu0 %7908 }
 0x9c1   : > { %v7919_v39 = vmul.f32 0.03125, %v7909_v0  ;;  %v10810_v0 = vpop.eup %10809 }
 0x9c2   : > { %v10812_v46 = vpop.eup %10811  ;;  %v7938_v45 = vmul.f32 %v10810_v0, %v13261_v35 }
 0x9c3   : > { %v7927_v14 = vadd.f32 1e-05, %v7919_v39  ;;  %v8821_v39 = vld [vmem:[%s13758_s10] ss:$0 sm:$0xff]  ;;  %v10814_v2 = vpop.eup %10813  ;;  %v7939_v18 = vmul.f32 %v10812_v46, %v13281_v44 }
 0x9c4   : > { %v10511_v12 = vpop.permute.xlu0 %10510  ;;  %v7965_v23 = vadd.f32 %v8821_v39, %v7951_v51  ;;  %v7952_v30 = vmul.f32 %v8820_v50, %v7938_v45  ;;  %v7940_v35 = vmul.f32 %v10814_v2, %v13266_v63  ;;  %v8326_v2 = vld [vmem:[%s13761_s13 + $0x28] sm:$0xff] }
 0x9c5   : > { %v10513_v41 = vunpack.i.h.bf16 %v10511_v12  ;;  %v10512_v7 = vunpack.i.l.bf16 %v10511_v12  ;;  %10819 = vrsqrt.f32 %v7927_v14  ;;  %v10085_v12 = vpack.c.bf16 %v7976_v9, %v7975_v34 }
 0x9c6   : > { %10821 = vrsqrt.f32 %v7928_v15  ;;  %v7953_v26 = vmul.f32 %v8820_v50, %v7939_v18  ;;  %v7954_v33 = vmul.f32 %v8820_v50, %v7940_v35 }
 0x9c7   : > { %v10061_v53 = vpack.c.bf16 %v10513_v41, %v10512_v7  ;;  %v10816_v41 = vpop.eup %10815 }
 0x9c8   : > { %v10818_v7 = vpop.eup %10817  ;;  %v7941_v59 = vmul.f32 %v10816_v41, %v13287_v56  ;;  %v7967_v52 = vadd.f32 %v8821_v39, %v7953_v26  ;;  %v7968_v63 = vadd.f32 %v8821_v39, %v7954_v33  ;;  %v7548_v18 = vpop.permute.xlu0 %7547  ;;  %v8327_v41 = vld [vmem:[%s13761_s13 + $0x30] sm:$0xff]  ;;  %v8330_v33 = vld [vmem:[%s13761_s13 + $0x48] sm:$0xff] }
 0x9c9   : > { %10062 = vmatprep.subr.bf16.mxu1 %v10061_v53  ;;  %v7942_v44 = vmul.f32 %v10818_v7, %v13278_v62 }
 0x9ca   : > { %10064 = vmatpush3.bf16.msra.mxu1 %v10061_v53  ;;  %v7966_v53 = vadd.f32 %v8821_v39, %v7952_v30  ;;  %v7955_v32 = vmul.f32 %v8820_v50, %v7941_v59  ;;  %v8328_v30 = vld [vmem:[%s13761_s13 + $0x38] sm:$0xff] }
 0x9cb   : > { %10070 = vmatprep.subr.bf16.mxu1 %v10069_v47  ;;  %v10101_v7 = vpack.c.bf16 %v8328_v30, %v8327_v41 }
 0x9cc   : > { %v7969_v56 = vadd.f32 %v8821_v39, %v7955_v32 }
 0x9cd   : > { %9637 = vmatmul.mubr.msk.f32.vlgmr.msra.gmra.mrb[76].mxu1 %vm3921_vm3, %v4621_v20 }
 0x9ce   : > { %10072 = vmatpush3.bf16.msra.mxu1 %v10069_v47  ;;  %9650 = vmatprep.mubr.msk.f32.mxu1 %vm3921_vm3, %v4624_v3  ;;  %v7956_v47 = vmul.f32 %v8820_v50, %v7942_v44 }
 0x9cf   : > { %10082 = vmatprep.subr.bf16.mxu1 %v10081_v21  ;;  %v10820_v14 = vpop.eup %10819 }
 0x9d0   : > { %v10822_v31 = vpop.eup %10821  ;;  %v7943_v10 = vmul.f32 %v10820_v14, %v13323_v55  ;;  %v7970_v62 = vadd.f32 %v8821_v39, %v7956_v47  ;;  %v8334_v47 = vld [vmem:[%s13761_s13 + $0x68] sm:$0xff] }
 0x9d1   : > { %9651 = vmatmul.mubr.msk.f32.vlgmr.msra.gmra.mrb[78].mxu1 %vm3921_vm3, %v4625_v61  ;;  %v7944_v15 = vmul.f32 %v10822_v31, %v13301_v58 }
 0x9d2   : > { %10084 = vmatpush3.bf16.msra.mxu1 %v10081_v21  ;;  %9681 = vmatprep.mubr.msk.f32.mxu1 %vm533_vm0, %v7965_v23  ;;  %v7957_v25 = vmul.f32 %v8820_v50, %v7943_v10 }
 0x9d3   : > { %10086 = vmatprep.subr.bf16.mxu1 %v10085_v12  ;;  %v7958_v20 = vmul.f32 %v8820_v50, %v7944_v15  ;;  %v13403_v50 = vpop.permute.xlu1 %7539 }
 0x9d4   : > { %v7971_v21 = vadd.f32 %v8821_v39, %v7957_v25 }
 0x9d5   : > { %v7972_v58 = vadd.f32 %v8821_v39, %v7958_v20  ;;  %v8321_v39 = vld [vmem:[%s13761_s13] sm:$0xff]  ;;  %v8336_v20 = vld [vmem:[%s13761_s13 + $0x78] sm:$0xff] }
 0x9d6   : > { %10088 = vmatpush3.bf16.msra.mxu1 %v10085_v12  ;;  %v8325_v12 = vld [vmem:[%s13761_s13 + $0x20] sm:$0xff] }
 0x9d7   : > { %v13405_v34 = vpop.permute.xlu1 %7541  ;;  %v10097_v23 = vpack.c.bf16 %v8326_v2, %v8325_v12 }
 0x9d9   : > { %9682 = vmatmul.mubr.msk.f32.vlgmr.msra.gmra.mrb[80].mxu1 %vm533_vm0, %v7966_v53  ;;  %v8329_v53 = vld [vmem:[%s13761_s13 + $0x40] sm:$0xff] }
 0x9da   : > { %9684 = vmatprep.mubr.msk.f32.mxu1 %vm533_vm0, %v7967_v52  ;;  %v10105_v31 = vpack.c.bf16 %v8330_v33, %v8329_v53 }
 0x9dd   : > { %9685 = vmatmul.mubr.msk.f32.gmra.mrb[82].mxu1 %vm533_vm0, %v7968_v63  ;;  %v8333_v63 = vld [vmem:[%s13761_s13 + $0x60] sm:$0xff] }
 0x9de   : > { %9687 = vmatprep.mubr.msk.f32.mxu1 %vm533_vm0, %v7969_v56  ;;  %v10113_v25 = vpack.c.bf16 %v8334_v47, %v8333_v63 }
 0x9e1   : > { %v9596_v0 = vpop.f32.mrb[70].mxu1  ;;  %9688 = vmatmul.mubr.msk.f32.gmra.mrb[84].mxu1 %vm533_vm0, %v7970_v62  ;;  %v8335_v62 = vld [vmem:[%s13761_s13 + $0x70] sm:$0xff] }
 0x9e2   : > { %9690 = vmatprep.mubr.msk.f32.mxu1 %vm533_vm0, %v7971_v21  ;;  %7553 = vrot.lane.b32.xlu1 %v9596_v0, %s10901_s28  ;;  %v6705_v55 = vpop.f32.mrb[71].mxu1 }
 0x9e3   : > { %7551 = vrot.lane.b32.xlu0 %v6705_v55, %s10901_s28  ;;  %v10117_v55 = vpack.c.bf16 %v8336_v20, %v8335_v62 }
 0x9e5   : > { %v9610_v3 = vpop.f32.mrb[72].mxu1  ;;  %9691 = vmatmul.mubr.msk.f32.gmra.mrb[86].mxu1 %vm533_vm0, %v7972_v58  ;;  %v7631_v58 = vsel %vm1204_vm1, %v13131_v27, %v7548_v18 }
 0x9e6   : > { %7573 = vrot.lane.b32.xlu1 %v13149_v19, %s10902_s29  ;;  %v6879_v51 = vpop.f32.mrb[73].mxu1 }
 0x9e7   : > { %7571 = vrot.lane.b32.xlu0 %v13151_v5, %s10902_s29 }
 0x9ea   : > { %7577 = vrot.lane.b32.xlu1 %v9610_v3, %s10902_s29 }
 0x9eb   : > { %7575 = vrot.lane.b32.xlu0 %v6879_v51, %s10902_s29 }
 0x9ee   : > { %7581 = vrot.lane.b32.xlu1 %v13153_v54, %s10902_s29 }
 0x9ef   : > { %7579 = vrot.lane.b32.xlu0 %v13155_v8, %s10902_s29 }
 0xa0b   : > { %v9624_v9 = vpop.f32.mrb[74].mxu1 }
 0xa0c   : > { %7585 = vrot.lane.b32.xlu1 %v9624_v9, %s10902_s29  ;;  %v7053_v19 = vpop.f32.mrb[75].mxu1 }
 0xa0d   : > { %v7544_v46 = vpop.permute.xlu1 %7543  ;;  %7583 = vrot.lane.b32.xlu0 %v7053_v19, %s10902_s29  ;;  %s13713_s29 = scalar_lea.vmem %s13763_s15, %s10994_s20 }
 0xa0e   : > { %v7629_v5 = vsel %vm1204_vm1, %v13338_v28, %v7544_v46  ;;  %v8322_v28 = vld [vmem:[%s13761_s13 + $0x8] sm:$0xff] }
 0xa10   : > { %7605 = vrot.lane.b32.xlu1 %v13158_v11, %s10903_s30  ;;  %v10089_v11 = vpack.c.bf16 %v8322_v28, %v8321_v39  ;;  %v7628_v28 = vsel %vm1204_vm1, %v13117_v13, %v13405_v34 }
 0xa11   : > { %v7546_v54 = vpop.permute.xlu1 %7545  ;;  %7603 = vrot.lane.b32.xlu0 %v13160_v43, %s10903_s30  ;;  %v8323_v43 = vld [vmem:[%s13761_s13 + $0x10] sm:$0xff] }
 0xa12   : > { %v7630_v8 = vsel %vm1204_vm1, %v13336_v60, %v7546_v54  ;;  %10090 = vmatprep.subr.bf16.mxu0 %v10089_v11  ;;  %v8324_v60 = vld [vmem:[%s13761_s13 + $0x18] sm:$0xff] }
 0xa13   : > { %10092 = vmatpush3.bf16.msra.mxu0 %v10089_v11 }
 0xa15   : > { %v7550_v61 = vpop.permute.xlu1 %7549 }
 0xa16   : > { %v7632_v45 = vsel %vm1204_vm1, %v13129_v6, %v7550_v61  ;;  %v10093_v6 = vpack.c.bf16 %v8324_v60, %v8323_v43  ;;  %v13505_v43 = vld [vmem:[%s13760_s12] ss:$0 sm:$0xff] }
 0xa18   : > { %10094 = vmatprep.subr.bf16.mxu0 %v10093_v6 }
 0xa19   : > { %10096 = vmatpush3.bf16.msra.mxu0 %v10093_v6 }
 0xa1a   : > { %10098 = vmatprep.subr.bf16.mxu0 %v10097_v23 }
 0xa1d   : > { %10100 = vmatpush3.bf16.msra.mxu0 %v10097_v23 }
 0xa1e   : > { %10102 = vmatprep.subr.bf16.mxu0 %v10101_v7 }
 0xa21   : > { %10104 = vmatpush3.bf16.msra.mxu0 %v10101_v7 }
 0xa22   : > { %10106 = vmatprep.subr.bf16.mxu0 %v10105_v31 }
 0xa25   : > { %10108 = vmatpush3.bf16.msra.mxu0 %v10105_v31 }
 0xa54   : > { %v7554_v35 = vpop.permute.xlu1 %7553 }
 0xa55   : > { %v7634_v26 = vsel %vm1204_vm1, %v13340_v37, %v7554_v35  ;;  %v7552_v59 = vpop.permute.xlu0 %7551  ;;  %v8331_v37 = vld [vmem:[%s13761_s13 + $0x50] sm:$0xff] }
 0xa56   : > { %v7633_v14 = vsel %vm1204_vm1, %v13342_v48, %v7552_v59  ;;  %v8332_v48 = vld [vmem:[%s13761_s13 + $0x58] sm:$0xff] }
 0xa57   : > { %v10109_v10 = vpack.c.bf16 %v8332_v48, %v8331_v37 }
 0xa58   : > { %v7574_v44 = vpop.permute.xlu1 %7573 }
 0xa59   : > { %v7572_v52 = vpop.permute.xlu0 %7571  ;;  %10110 = vmatprep.subr.bf16.mxu0 %v10109_v10 }
 0xa5a   : > { %10112 = vmatpush3.bf16.msra.mxu0 %v10109_v10 }
 0xa5b   : > { %10114 = vmatprep.subr.bf16.mxu0 %v10113_v25 }
 0xa5c   : > { %v7578_v32 = vpop.permute.xlu1 %7577 }
 0xa5d   : > { %v13466_v15 = vsel %vm3921_vm3, %v7630_v8, %v7578_v32  ;;  %v7576_v56 = vpop.permute.xlu0 %7575 }
 0xa5e   : > { %v13475_v21 = vsel %vm3921_vm3, %v7629_v5, %v7576_v56  ;;  %10116 = vmatpush3.bf16.msra.mxu0 %v10113_v25 }
 0xa5f   : > { %10118 = vmatprep.subr.bf16.mxu0 %v10117_v55 }
 0xa60   : > { %v7582_v0 = vpop.permute.xlu1 %7581 }
 0xa61   : > { %v13480_v3 = vsel %vm3921_vm3, %v7632_v45, %v7582_v0  ;;  %v7580_v51 = vpop.permute.xlu0 %7579 }
 0xa62   : > { %v13483_v9 = vsel %vm3921_vm3, %v7631_v58, %v7580_v51  ;;  %10120 = vmatpush3.bf16.msra.mxu0 %v10117_v55 }
 0xa7e   : > { %v7586_v19 = vpop.permute.xlu1 %7585 }
 0xa7f   : > { %v13486_v46 = vsel %vm3921_vm3, %v7634_v26, %v7586_v19  ;;  %v7584_v5 = vpop.permute.xlu0 %7583 }
 0xa80   : > { %v13489_v54 = vsel %vm3921_vm3, %v7633_v14, %v7584_v5 }
 0xa82   : > { %v7606_v39 = vpop.permute.xlu1 %7605 }
 0xa83   : > { %v7604_v11 = vpop.permute.xlu0 %7603 }
 0xaa0   : > { %v9638_v8 = vpop.f32.mrb[76].mxu1 }
 0xaa1   : > { %7609 = vrot.lane.b32.xlu1 %v9638_v8, %s10903_s30  ;;  %v7227_v27 = vpop.f32.mrb[77].mxu1 }
 0xaa2   : > { %7607 = vrot.lane.b32.xlu0 %v7227_v27, %s10903_s30 }
 0xaa4   : > { %v9652_v61 = vpop.f32.mrb[78].mxu1 }
 0xaa5   : > { %7613 = vrot.lane.b32.xlu1 %v13164_v57, %s10903_s30  ;;  %v7401_v45 = vpop.f32.mrb[79].mxu1  ;;  %v7627_v57 = vsel %vm1204_vm1, %v13121_v49, %v13403_v50 }
 0xaa6   : > { %7611 = vrot.lane.b32.xlu0 %v13166_v42, %s10903_s30  ;;  %v7636_v42 = vsel %vm3921_vm3, %v7628_v28, %v7574_v44  ;;  %v7635_v60 = vsel %vm3921_vm3, %v7627_v57, %v7572_v52 }
 0xaa7   : > { %v7644_v6 = vsel %vm7522_vm4, %v7636_v42, %v7606_v39  ;;  %v7643_v13 = vsel %vm7522_vm4, %v7635_v60, %v7604_v11 }
 0xaa9   : > { %7617 = vrot.lane.b32.xlu1 %v9652_v61, %s10903_s30 }
 0xaaa   : > { %7615 = vrot.lane.b32.xlu0 %v7401_v45, %s10903_s30  ;;  %s10904_s30 = smov 32  }
 0xaac   : > { %v9683_v12 = vpop.f32.mrb[80].mxu1 }
 0xaad   : > { %v8080_v34 = vadd.f32 %v9683_v12, %v13505_v43  ;;  %7661 = vrot.lane.b32.xlu1 %v7644_v6, %s10904_s30  ;;  %v8074_v2 = vpop.f32.mrb[81].mxu1  ;;  %v10905_v6 = vmov -1.0  }
 0xaae   : > { %v8075_v23 = vadd.f32 %v13505_v43, %v8074_v2  ;;  %7659 = vrot.lane.b32.xlu0 %v7643_v13, %s10904_s30 }
 0xaaf   : > { %v8122_v49 = vmul.f32 0.70710677, %v8080_v34  ;;  %v13546_v61 = vmul.f32 0.5, %v8080_v34 }
 0xab0   : > { %v8121_v50 = vmul.f32 0.70710677, %v8075_v23  ;;  %v9686_v18 = vpop.f32.mrb[82].mxu1  ;;  %v13548_v28 = vmul.f32 0.5, %v8075_v23 }
 0xab1   : > { %v8146_v41 = vand.u32 2147483647, %v8122_v49  ;;  %v13519_v30 = vadd.f32 %v9686_v18, %v13505_v43  ;;  %v8084_v35 = vpop.f32.mrb[83].mxu1  ;;  %vm8130_vm5 = vcmp.ge.f32.partialorder %v8122_v49, 0.0 }
 0xab2   : > { %v8145_v7 = vand.u32 2147483647, %v8121_v50  ;;  %v13522_v26 = vadd.f32 %v13505_v43, %v8084_v35  ;;  %vm8129_vm6 = vcmp.ge.f32.partialorder %v8121_v50, 0.0  ;;  %v13556_v12 = vsel %vm8130_vm5, 1.0, %v10905_v6 }
 0xab3   : > { %v8154_v59 = vmul.f32 0.3275911, %v8146_v41  ;;  %v13525_v53 = vmul.f32 0.70710677, %v13519_v30  ;;  %v8250_v25 = vsub.f32 0.0, %v8146_v41  ;;  %v13559_v13 = vsel %vm8129_vm6, 1.0, %v10905_v6 }
 0xab4   : > { %v8153_v14 = vmul.f32 0.3275911, %v8145_v7  ;;  %v13528_v44 = vmul.f32 0.70710677, %v13522_v26  ;;  %v9689_v31 = vpop.f32.mrb[84].mxu1  ;;  %v8249_v58 = vsub.f32 0.0, %v8145_v7 }
 0xab5   : > { %v8162_v33 = vadd.f32 1.0, %v8154_v59  ;;  %v8148_v37 = vand.u32 2147483647, %v13525_v53  ;;  %v8094_v48 = vpop.f32.mrb[85].mxu1  ;;  %v13533_v47 = vadd.f32 %v9689_v31, %v13505_v43  ;;  %v8258_v8 = vmul.f32 %v8250_v25, %v8146_v41 }
 0xab6   : > { %v8161_v52 = vadd.f32 1.0, %v8153_v14  ;;  %v8147_v63 = vand.u32 2147483647, %v13528_v44  ;;  %v13536_v20 = vadd.f32 %v13505_v43, %v8094_v48  ;;  %v8257_v11 = vmul.f32 %v8249_v58, %v8145_v7 }
 0xab7   : > { %10823 = vrcp.f32 %v8162_v33  ;;  %v8156_v32 = vmul.f32 0.3275911, %v8148_v37  ;;  %v13539_v55 = vmul.f32 0.70710677, %v13533_v47  ;;  %v8252_v45 = vsub.f32 0.0, %v8148_v37 }
 0xab8   : > { %10825 = vrcp.f32 %v8161_v52  ;;  %v9692_v10 = vpop.f32.mrb[86].mxu1  ;;  %v8155_v0 = vmul.f32 0.3275911, %v8147_v63  ;;  %v13542_v51 = vmul.f32 0.70710677, %v13536_v20  ;;  %vm8132_vm7 = vcmp.ge.f32.partialorder %v13525_v53, 0.0 }
 0xab9   : > { %v8104_v56 = vpop.f32.mrb[87].mxu1  ;;  %v8164_v62 = vadd.f32 1.0, %v8156_v32  ;;  %v8150_v5 = vand.u32 2147483647, %v13539_v55  ;;  %v13551_v42 = vadd.f32 %v9692_v10, %v13505_v43  ;;  %v8267_v50 = vmul.f32 1.442695, %v8258_v8 }
 0xaba   : > { %v8163_v19 = vadd.f32 1.0, %v8155_v0  ;;  %v8149_v27 = vand.u32 2147483647, %v13542_v51  ;;  %v13562_v2 = vadd.f32 %v13505_v43, %v8104_v56  ;;  %v8260_v41 = vmul.f32 %v8252_v45, %v8148_v37 }
 0xabb   : > { %10827 = vrcp.f32 %v8164_v62  ;;  %v8158_v39 = vmul.f32 0.3275911, %v8150_v5  ;;  %v8251_v35 = vsub.f32 0.0, %v8147_v63  ;;  %v13569_v7 = vmul.f32 0.70710677, %v13551_v42 }
 0xabc   : > { %10829 = vrcp.f32 %v8163_v19  ;;  %v8157_v57 = vmul.f32 0.3275911, %v8149_v27  ;;  %v8265_v14 = vmul.f32 1.442695, %v8257_v11  ;;  %v13572_v43 = vmul.f32 0.70710677, %v13562_v2 }
 0xabd   : > { %v8166_v34 = vadd.f32 1.0, %v8158_v39  ;;  %v8254_v33 = vsub.f32 0.0, %v8150_v5  ;;  %v8253_v31 = vsub.f32 0.0, %v8149_v27  ;;  %v8152_v52 = vand.u32 2147483647, %v13569_v7 }
 0xabe   : > { %v8165_v18 = vadd.f32 1.0, %v8157_v57  ;;  %v13582_v10 = vsel %vm8132_vm7, 1.0, %v10905_v6  ;;  %vm8131_vm8 = vcmp.ge.f32.partialorder %v13528_v44, 0.0  ;;  %v8271_v56 = vmul.f32 1.442695, %v8260_v41 }
 0xabf   : > { %10831 = vrcp.f32 %v8166_v34  ;;  %v8259_v25 = vmul.f32 %v8251_v35, %v8147_v63  ;;  %v8160_v62 = vmul.f32 0.3275911, %v8152_v52  ;;  %v8151_v0 = vand.u32 2147483647, %v13572_v43 }
 0xac0   : > { %10833 = vrcp.f32 %v8165_v18  ;;  %v8262_v39 = vmul.f32 %v8254_v33, %v8150_v5  ;;  %v8261_v11 = vmul.f32 %v8253_v31, %v8149_v27  ;;  %v8256_v41 = vsub.f32 0.0, %v8152_v52 }
 0xac1   : > { %v13553_v60 = vpop.eup %10823  ;;  %10835 = vpow2.f32 %v8267_v50  ;;  %v8168_v57 = vadd.f32 1.0, %v8160_v62  ;;  %v8159_v53 = vmul.f32 0.3275911, %v8151_v0  ;;  %v8269_v18 = vmul.f32 1.442695, %v8259_v25 }
 0xac2   : > { %v13564_v23 = vpop.eup %10825  ;;  %v8178_v49 = vmul.f32 1.0614054, %v13553_v60  ;;  %10837 = vpow2.f32 %v8265_v14  ;;  %v13598_v27 = vsel %vm8131_vm8, 1.0, %v10905_v6  ;;  %v8275_v33 = vmul.f32 1.442695, %v8262_v39 }
 0xac3   : > { %v8177_v48 = vmul.f32 1.0614054, %v13564_v23  ;;  %10839 = vrcp.f32 %v8168_v57  ;;  %v8167_v35 = vadd.f32 1.0, %v8159_v53  ;;  %v8273_v31 = vmul.f32 1.442695, %v8261_v11 }
 0xac4   : > { %v8186_v59 = vadd.f32 -1.4531521, %v8178_v49  ;;  %10841 = vpow2.f32 %v8271_v56  ;;  %vm8134_vm9 = vcmp.ge.f32.partialorder %v13539_v55, 0.0  ;;  %vm8133_vm10 = vcmp.ge.f32.partialorder %v13542_v51, 0.0 }
 0xac5   : > { %v13576_v32 = vpop.eup %10827  ;;  %v8185_v19 = vadd.f32 -1.4531521, %v8177_v48  ;;  %10843 = vrcp.f32 %v8167_v35  ;;  %v8118_v51 = vmul.f32 0.5, %v13533_v47  ;;  %vm8136_vm11 = vcmp.ge.f32.partialorder %v13569_v7, 0.0 }
 0xac6   : > { %v8194_v37 = vmul.f32 %v13553_v60, %v8186_v59  ;;  %v8180_v8 = vmul.f32 1.0614054, %v13576_v32  ;;  %v13587_v45 = vpop.eup %10829  ;;  %10845 = vpow2.f32 %v8269_v18  ;;  %vm8135_vm12 = vcmp.ge.f32.partialorder %v13572_v43, 0.0 }
 0xac7   : > { %v8193_v49 = vmul.f32 %v13564_v23, %v8185_v19  ;;  %v8179_v63 = vmul.f32 1.0614054, %v13587_v45  ;;  %10847 = vpow2.f32 %v8275_v33  ;;  %v8119_v7 = vmul.f32 0.5, %v13562_v2 }
 0xac8   : > { %v8202_v58 = vadd.f32 1.4214138, %v8194_v37  ;;  %v8188_v50 = vadd.f32 -1.4531521, %v8180_v8  ;;  %v8264_v8 = vmul.f32 %v8256_v41, %v8152_v52  ;;  %10849 = vpow2.f32 %v8273_v31 }
 0xac9   : > { %v8201_v14 = vadd.f32 1.4214138, %v8193_v49  ;;  %v8187_v48 = vadd.f32 -1.4531521, %v8179_v63  ;;  %v13593_v5 = vpop.eup %10831  ;;  %v8255_v49 = vsub.f32 0.0, %v8151_v0 }
 0xaca   : > { %v8210_v34 = vmul.f32 %v13553_v60, %v8202_v58  ;;  %v8196_v37 = vmul.f32 %v13576_v32, %v8188_v50  ;;  %v13600_v62 = vpop.eup %10833  ;;  %v8182_v53 = vmul.f32 1.0614054, %v13593_v5 }
 0xacb   : > { %v8209_v58 = vmul.f32 %v13564_v23, %v8201_v14  ;;  %v8195_v19 = vmul.f32 %v13587_v45, %v8187_v48  ;;  %v8181_v56 = vmul.f32 1.0614054, %v13600_v62  ;;  %v10836_v44 = vpop.eup %10835  ;;  %v8279_v48 = vmul.f32 1.442695, %v8264_v8 }
 0xacc   : > { %v8218_v59 = vadd.f32 -0.28449672, %v8210_v34  ;;  %v8204_v57 = vadd.f32 1.4214138, %v8196_v37  ;;  %v8190_v35 = vadd.f32 -1.4531521, %v8182_v53  ;;  %v8263_v53 = vmul.f32 %v8255_v49, %v8151_v0 }
 0xacd   : > { %v8217_v39 = vadd.f32 -0.28449672, %v8209_v58  ;;  %v8203_v11 = vadd.f32 1.4214138, %v8195_v19  ;;  %v8189_v50 = vadd.f32 -1.4531521, %v8181_v56  ;;  %10851 = vpow2.f32 %v8279_v48 }
 0xace   : > { %v8226_v25 = vmul.f32 %v13553_v60, %v8218_v59  ;;  %v8212_v63 = vmul.f32 %v13576_v32, %v8204_v57  ;;  %v10838_v59 = vpop.eup %10837  ;;  %v8198_v18 = vmul.f32 %v13593_v5, %v8190_v35 }
 0xacf   : > { %v8225_v52 = vmul.f32 %v13564_v23, %v8217_v39  ;;  %v8211_v41 = vmul.f32 %v13587_v45, %v8203_v11  ;;  %v13613_v56 = vpop.eup %10839 }
 0xad0   : > { %v8234_v34 = vadd.f32 0.2548296, %v8226_v25  ;;  %v8220_v37 = vadd.f32 -0.28449672, %v8212_v63  ;;  %v8197_v25 = vmul.f32 %v13600_v62, %v8189_v50  ;;  %v8184_v63 = vmul.f32 1.0614054, %v13613_v56  ;;  %v10842_v50 = vpop.eup %10841 }
 0xad1   : > { %v8233_v19 = vadd.f32 0.2548296, %v8225_v52  ;;  %v8219_v57 = vadd.f32 -0.28449672, %v8211_v41 }
 0xad2   : > { %v8242_v14 = vmul.f32 %v13553_v60, %v8234_v34  ;;  %v8228_v60 = vmul.f32 %v13576_v32, %v8220_v37  ;;  %v8205_v33 = vadd.f32 1.4214138, %v8197_v25  ;;  %v8206_v34 = vadd.f32 1.4214138, %v8198_v18 }
 0xad3   : > { %v8241_v11 = vmul.f32 %v13564_v23, %v8233_v19  ;;  %v8227_v8 = vmul.f32 %v13587_v45, %v8219_v57  ;;  %v8192_v41 = vadd.f32 -1.4531521, %v8184_v63 }
 0xad4   : > { %v8282_v58 = vmul.f32 %v10836_v44, %v8242_v14  ;;  %v8236_v44 = vadd.f32 0.2548296, %v8228_v60  ;;  %v8213_v31 = vmul.f32 %v13600_v62, %v8205_v33  ;;  %v8214_v35 = vmul.f32 %v13593_v5, %v8206_v34  ;;  %v13621_v14 = vpop.eup %10843 }
 0xad5   : > { %v8281_v49 = vmul.f32 %v10838_v59, %v8241_v11  ;;  %v8235_v52 = vadd.f32 0.2548296, %v8227_v8  ;;  %v8183_v25 = vmul.f32 1.0614054, %v13621_v14  ;;  %v10846_v18 = vpop.eup %10845 }
 0xad6   : > { %v8290_v39 = vsub.f32 1.0, %v8282_v58  ;;  %v8244_v23 = vmul.f32 %v13576_v32, %v8236_v44  ;;  %v8221_v37 = vadd.f32 -0.28449672, %v8213_v31  ;;  %v8222_v48 = vadd.f32 -0.28449672, %v8214_v35 }
 0xad7   : > { %v8277_v58 = vmul.f32 1.442695, %v8263_v53  ;;  %v8289_v19 = vsub.f32 1.0, %v8281_v49  ;;  %v8243_v57 = vmul.f32 %v13587_v45, %v8235_v52  ;;  %v8191_v34 = vadd.f32 -1.4531521, %v8183_v25 }
 0xad8   : > { %v8298_v0 = vmul.f32 %v8290_v39, %v13556_v12  ;;  %v8200_v12 = vmul.f32 %v13613_v56, %v8192_v41  ;;  %v8284_v59 = vmul.f32 %v10842_v50, %v8244_v23  ;;  %v8229_v60 = vmul.f32 %v13600_v62, %v8221_v37  ;;  %v10848_v39 = vpop.eup %10847 }
 0xad9   : > { %v8230_v33 = vmul.f32 %v13593_v5, %v8222_v48  ;;  %v8297_v32 = vmul.f32 %v8289_v19, %v13559_v13  ;;  %v8283_v8 = vmul.f32 %v10846_v18, %v8243_v57  ;;  %v8199_v35 = vmul.f32 %v13621_v14, %v8191_v34  ;;  %v10850_v45 = vpop.eup %10849 }
 0xada   : > { %v8306_v11 = vadd.f32 1.0, %v8298_v0  ;;  %v8208_v63 = vadd.f32 1.4214138, %v8200_v12  ;;  %v8292_v44 = vsub.f32 1.0, %v8284_v59  ;;  %v8237_v31 = vadd.f32 0.2548296, %v8229_v60  ;;  %v10852_v19 = vpop.eup %10851 }
 0xadb   : > { %v8238_v53 = vadd.f32 0.2548296, %v8230_v33  ;;  %10853 = vpow2.f32 %v8277_v58  ;;  %v8305_v49 = vadd.f32 1.0, %v8297_v32  ;;  %v8291_v50 = vsub.f32 1.0, %v8283_v8 }
 0xadc   : > { %v8216_v52 = vmul.f32 %v13613_v56, %v8208_v63  ;;  %v8300_v41 = vmul.f32 %v8292_v44, %v13582_v10  ;;  %v8245_v23 = vmul.f32 %v13600_v62, %v8237_v31  ;;  %v8207_v13 = vadd.f32 1.4214138, %v8199_v35 }
 0xadd   : > { %v8246_v0 = vmul.f32 %v13593_v5, %v8238_v53  ;;  %v8314_v37 = vmul.f32 %v8306_v11, %v13546_v61  ;;  %v8313_v48 = vmul.f32 %v8305_v49, %v13548_v28  ;;  %v8299_v25 = vmul.f32 %v8291_v50, %v13598_v27 }
 0xade   : > { %v8224_v18 = vadd.f32 -0.28449672, %v8216_v52  ;;  %v8308_v58 = vadd.f32 1.0, %v8300_v41  ;;  %v8285_v57 = vmul.f32 %v10850_v45, %v8245_v23  ;;  %v8215_v59 = vmul.f32 %v13621_v14, %v8207_v13 }
 0xadf   : > { %v8286_v12 = vmul.f32 %v10848_v39, %v8246_v0  ;;  %v8115_v10 = vmul.f32 0.5, %v13522_v26  ;;  %9725 = vmatprep.mubr.f32.mxu0 %v8313_v48  ;;  %v8307_v62 = vadd.f32 1.0, %v8299_v25  ;;  %v8116_v60 = vmul.f32 0.5, %v13519_v30 }
 0xae0   : > { %v8232_v5 = vmul.f32 %v13613_v56, %v8224_v18  ;;  %9726 = vmatmul.mubr.f32.vlgmr.msra.gmra.mrb[72].mxu0 %v8314_v37  ;;  %v8293_v61 = vsub.f32 1.0, %v8285_v57  ;;  %v8223_v33 = vadd.f32 -0.28449672, %v8215_v59  ;;  %v8142_v27 = vsel %vm8134_vm9, 1.0, %v10905_v6 }
 0xae1   : > { %v8294_v28 = vsub.f32 1.0, %v8286_v12  ;;  %v8141_v34 = vsel %vm8133_vm10, 1.0, %v10905_v6  ;;  %v8315_v39 = vmul.f32 %v8307_v62, %v8115_v10  ;;  %v8316_v11 = vmul.f32 %v8308_v58, %v8116_v60  ;;  %v13922_v60 = vld [vmem:[#allocation8_spill] sm:$0xff] }
 0xae2   : > { %v8240_v26 = vadd.f32 0.2548296, %v8232_v5  ;;  %v8301_v32 = vmul.f32 %v8293_v61, %v8141_v34  ;;  %v8231_v63 = vmul.f32 %v13621_v14, %v8223_v33  ;;  %v8117_v44 = vmul.f32 0.5, %v13536_v20 }
 0xae3   : > { %v8302_v8 = vmul.f32 %v8294_v28, %v8142_v27  ;;  %9728 = vmatprep.mubr.f32.mxu0 %v8315_v39  ;;  %v8144_v23 = vsel %vm8136_vm11, 1.0, %v10905_v6  ;;  %v8143_v13 = vsel %vm8135_vm12, 1.0, %v10905_v6  ;;  %v13923_v28 = vld [vmem:[#allocation7_spill] sm:$0xff]  ;;  %v13924_v27 = vld [vmem:[#allocation6_spill] sm:$0xff]  ;;  %v13925_v39 = vld [vmem:[#allocation9_spill] sm:$0xff] }
 0xae4   : > { %v8248_v30 = vmul.f32 %v13613_v56, %v8240_v26  ;;  %9729 = vmatmul.mubr.f32.gmra.mrb[74].mxu0 %v8316_v11  ;;  %v8309_v31 = vadd.f32 1.0, %v8301_v32  ;;  %v8239_v53 = vadd.f32 0.2548296, %v8231_v63  ;;  %v13926_v32 = vld [vmem:[#allocation38_spill] sm:$0xff] }
 0xae5   : > { %v8310_v55 = vadd.f32 1.0, %v8302_v8  ;;  %v10854_v35 = vpop.eup %10853 }
 0xae6   : > { %v8288_v45 = vmul.f32 %v10852_v19, %v8248_v30  ;;  %v8317_v49 = vmul.f32 %v8309_v31, %v8117_v44  ;;  %v8247_v50 = vmul.f32 %v13621_v14, %v8239_v53  ;;  %v8120_v14 = vmul.f32 0.5, %v13551_v42  ;;  %v13927_v30 = vld [vmem:[#allocation42_spill] sm:$0xff] }
 0xae7   : > { %v8318_v52 = vmul.f32 %v8310_v55, %v8118_v51  ;;  %v8831_v55 = vld [vmem:[%s13762_s14] ss:$0 sm:$0xff] }
 0xae8   : > { %v8296_v41 = vsub.f32 1.0, %v8288_v45  ;;  %9731 = vmatprep.mubr.f32.mxu0 %v8317_v49  ;;  %v8287_v20 = vmul.f32 %v10854_v35, %v8247_v50 }
 0xae9   : > { %9732 = vmatmul.mubr.f32.gmra.mrb[76].mxu0 %v8318_v52 }
 0xaea   : > { %v8304_v56 = vmul.f32 %v8296_v41, %v8144_v23  ;;  %v8295_v0 = vsub.f32 1.0, %v8287_v20 }
 0xaec   : > { %v8303_v47 = vmul.f32 %v8295_v0, %v8143_v13  ;;  %v8312_v37 = vadd.f32 1.0, %v8304_v56 }
 0xaee   : > { %v8311_v48 = vadd.f32 1.0, %v8303_v47  ;;  %v8320_v18 = vmul.f32 %v8312_v37, %v8120_v14 }
 0xaf0   : > { %v8319_v25 = vmul.f32 %v8311_v48, %v8119_v7 }
 0xaf2   : > { %9734 = vmatprep.mubr.f32.mxu0 %v8319_v25 }
 0xaf3   : > { %9735 = vmatmul.mubr.f32.gmra.mrb[78].mxu0 %v8320_v18 }
 0xb13   : > { %v7610_v19 = vpop.permute.xlu1 %7609 }
 0xb14   : > { %v7646_v43 = vsel %vm7522_vm4, %v13466_v15, %v7610_v19  ;;  %v7608_v58 = vpop.permute.xlu0 %7607 }
 0xb15   : > { %v7645_v57 = vsel %vm7522_vm4, %v13475_v21, %v7608_v58  ;;  %7665 = vrot.lane.b32.xlu1 %v7646_v43, %s10904_s30 }
 0xb16   : > { %7663 = vrot.lane.b32.xlu0 %v7645_v57, %s10904_s30 }
 0xb17   : > { %v7614_v6 = vpop.permute.xlu1 %7613 }
 0xb18   : > { %v7648_v42 = vsel %vm7522_vm4, %v13480_v3, %v7614_v6  ;;  %v7612_v2 = vpop.permute.xlu0 %7611 }
 0xb19   : > { %v7647_v12 = vsel %vm7522_vm4, %v13483_v9, %v7612_v2  ;;  %7669 = vrot.lane.b32.xlu1 %v7648_v42, %s10904_s30 }
 0xb1a   : > { %7667 = vrot.lane.b32.xlu0 %v7647_v12, %s10904_s30 }
 0xb1b   : > { %v7618_v15 = vpop.permute.xlu1 %7617 }
 0xb1c   : > { %v7650_v21 = vsel %vm7522_vm4, %v13486_v46, %v7618_v15  ;;  %v7616_v59 = vpop.permute.xlu0 %7615 }
 0xb1d   : > { %v7649_v10 = vsel %vm7522_vm4, %v13489_v54, %v7616_v59  ;;  %7673 = vrot.lane.b32.xlu1 %v7650_v21, %s10904_s30 }
 0xb1e   : > { %7671 = vrot.lane.b32.xlu0 %v7649_v10, %s10904_s30 }
 0xb1f   : > { %v7662_v3 = vpop.permute.xlu1 %7661 }
 0xb20   : > { %v7684_v9 = vsel %vm533_vm0, %v12986_v40, %v7662_v3  ;;  %v7660_v62 = vpop.permute.xlu0 %7659 }
 0xb21   : > { %v7683_v5 = vsel %vm533_vm0, %v12983_v24, %v7660_v62  ;;  %8475 = vrot.lane.b32.xlu1 %v7684_v9, %s10904_s30 }
 0xb22   : > { %8473 = vrot.lane.b32.xlu0 %v7683_v5, %s10904_s30 }
 0xb87   : > { %v7666_v46 = vpop.permute.xlu1 %7665 }
 0xb88   : > { %v7686_v54 = vsel %vm533_vm0, %v13922_v60, %v7666_v46  ;;  %v7664_v61 = vpop.permute.xlu0 %7663 }
 0xb89   : > { %v7685_v33 = vsel %vm533_vm0, %v13923_v28, %v7664_v61  ;;  %8479 = vrot.lane.b32.xlu1 %v7686_v54, %s10904_s30 }
 0xb8a   : > { %8477 = vrot.lane.b32.xlu0 %v7685_v33, %s10904_s30 }
 0xb8b   : > { %v7670_v40 = vpop.permute.xlu1 %7669 }
 0xb8c   : > { %v7688_v24 = vsel %vm533_vm0, %v13924_v27, %v7670_v40  ;;  %v7668_v34 = vpop.permute.xlu0 %7667 }
 0xb8d   : > { %v7687_v26 = vsel %vm533_vm0, %v13925_v39, %v7668_v34  ;;  %8483 = vrot.lane.b32.xlu1 %v7688_v24, %s10904_s30 }
 0xb8e   : > { %8481 = vrot.lane.b32.xlu0 %v7687_v26, %s10904_s30 }
 0xb8f   : > { %v7674_v11 = vpop.permute.xlu1 %7673 }
 0xb90   : > { %v7690_v8 = vsel %vm533_vm0, %v13926_v32, %v7674_v11  ;;  %v7672_v63 = vpop.permute.xlu0 %7671 }
 0xb91   : > { %v7689_v44 = vsel %vm533_vm0, %v13927_v30, %v7672_v63  ;;  %8487 = vrot.lane.b32.xlu1 %v7690_v8, %s10904_s30 }
 0xb92   : > { %8485 = vrot.lane.b32.xlu0 %v7689_v44, %s10904_s30 }
 0xb93   : > { %v8476_v49 = vpop.permute.xlu1 %8475 }
 0xb94   : > { %v8474_v41 = vpop.permute.xlu0 %8473 }
 0xbb3   : > { %v9727_v31 = vpop.f32.mrb[72].mxu0 }
 0xbb4   : > { %v8443_v53 = vadd.f32 %v9727_v31, %v13179_v16  ;;  %v8403_v35 = vpop.f32.mrb[73].mxu0 }
 0xbb5   : > { %v8442_v51 = vadd.f32 %v8403_v35, %v13198_v17 }
 0xbb6   : > { %v8458_v45 = vadd.f32 %v8831_v55, %v8443_v53 }
 0xbb7   : > { %v8457_v50 = vadd.f32 %v8831_v55, %v8442_v51  ;;  %v9730_v52 = vpop.f32.mrb[74].mxu0 }
 0xbb8   : > { %v8498_v23 = vsel %vm533_vm0, %v8458_v45, %v8476_v49  ;;  %v8445_v16 = vadd.f32 %v9730_v52, %v13184_v1  ;;  %v8413_v20 = vpop.f32.mrb[75].mxu0 }
 0xbb9   : > { %v8507_v17 = vsel %vm8505_vm13, %v8498_v23, 0.0  ;;  %v8497_v56 = vsel %vm533_vm0, %v8457_v50, %v8474_v41  ;;  %v8444_v0 = vadd.f32 %v8413_v20, %v13201_v4 }
 0xbba   : > { %8515 = vst [vmem:[%s13713_s29 + $0x8] sm:$0xff] %v8507_v17  ;;  %v8506_v13 = vsel %vm8505_vm13, %v8497_v56, 0.0  ;;  %v8460_v47 = vadd.f32 %v8831_v55, %v8445_v16 }
 0xbbb   : > { %8514 = vst [vmem:[%s13713_s29] sm:$0xff] %v8506_v13  ;;  %v8459_v37 = vadd.f32 %v8831_v55, %v8444_v0 }
 0xbbc   : > { %v9733_v7 = vpop.f32.mrb[76].mxu0 }
 0xbbd   : > { %v8447_v48 = vadd.f32 %v9733_v7, %v13191_v22  ;;  %v8423_v14 = vpop.f32.mrb[77].mxu0 }
 0xbbe   : > { %v8446_v1 = vadd.f32 %v8423_v14, %v13206_v29 }
 0xbbf   : > { %v8462_v25 = vadd.f32 %v8831_v55, %v8447_v48 }
 0xbc0   : > { %v8461_v18 = vadd.f32 %v8831_v55, %v8446_v1 }
 0xbc6   : > { %v9736_v19 = vpop.f32.mrb[78].mxu0 }
 0xbc7   : > { %v8449_v43 = vadd.f32 %v9736_v19, %v13213_v36  ;;  %v8433_v4 = vpop.f32.mrb[79].mxu0 }
 0xbc8   : > { %v8448_v58 = vadd.f32 %v8433_v4, %v13242_v38 }
 0xbc9   : > { %v8464_v57 = vadd.f32 %v8831_v55, %v8449_v43 }
 0xbca   : > { %v8463_v6 = vadd.f32 %v8831_v55, %v8448_v58 }
 0xbfb   : > { %v8480_v42 = vpop.permute.xlu1 %8479 }
 0xbfc   : > { %v8500_v22 = vsel %vm533_vm0, %v8460_v47, %v8480_v42  ;;  %v8478_v2 = vpop.permute.xlu0 %8477 }
 0xbfd   : > { %v8509_v12 = vsel %vm8505_vm13, %v8500_v22, 0.0  ;;  %v8499_v29 = vsel %vm533_vm0, %v8459_v37, %v8478_v2 }
 0xbfe   : > { %8517 = vst [vmem:[%s13713_s29 + $0x18] sm:$0xff] %v8509_v12  ;;  %v8508_v15 = vsel %vm8505_vm13, %v8499_v29, 0.0 }
 0xbff   : > { %8516 = vst [vmem:[%s13713_s29 + $0x10] sm:$0xff] %v8508_v15  ;;  %v8484_v36 = vpop.permute.xlu1 %8483 }
 0xc00   : > { %v8502_v38 = vsel %vm533_vm0, %v8462_v25, %v8484_v36  ;;  %v8482_v21 = vpop.permute.xlu0 %8481 }
 0xc01   : > { %v8511_v59 = vsel %vm8505_vm13, %v8502_v38, 0.0  ;;  %v8501_v10 = vsel %vm533_vm0, %v8461_v18, %v8482_v21 }
 0xc02   : > { %8519 = vst [vmem:[%s13713_s29 + $0x28] sm:$0xff] %v8511_v59  ;;  %v8510_v3 = vsel %vm8505_vm13, %v8501_v10, 0.0 }
 0xc03   : > { %8518 = vst [vmem:[%s13713_s29 + $0x20] sm:$0xff] %v8510_v3  ;;  %v8488_v9 = vpop.permute.xlu1 %8487 }
 0xc04   : > { %v8504_v62 = vsel %vm533_vm0, %v8464_v57, %v8488_v9  ;;  %v8486_v5 = vpop.permute.xlu0 %8485 }
 0xc05   : > { %v8513_v46 = vsel %vm8505_vm13, %v8504_v62, 0.0  ;;  %v8503_v60 = vsel %vm533_vm0, %v8463_v6, %v8486_v5 }
 0xc06   : > { %8521 = vst [vmem:[%s13713_s29 + $0x38] sm:$0xff] %v8513_v46  ;;  %v8512_v54 = vsel %vm8505_vm13, %v8503_v60, 0.0 }
 0xc07   : > { %8520 = vst [vmem:[%s13713_s29 + $0x30] sm:$0xff] %v8512_v54 }
 0xc08 PF: > { %s25_s18 = sadd.s32 1, %s10894_s18  }
 0xc09   : > { %p22_p4 = scmp.ge.s32.totalorder %s25_s18, 4  }
 0xc0b   :  { %24 = sbr.rel (!%p22_p4) target bundleno = 1 (0x1), region = 113 }

</bundles_post_ra>
